<compile_context>
chip_gen: v6e
topology: v6e:2x2x1
jax: 0.10.0
libtpu: 0.0.40
codegen_flags: <defaults>
</compile_context>

<pallas_src>
import functools

import jax
import jax.numpy as jnp
import numpy as np
from jax import lax
from jax.experimental import pallas as pl
from jax.experimental.pallas import tpu as pltpu

BN_EPS = 1e-5  # nn.BatchNorm2d default


# ----------------------------------------------------------------------------- kernels
def _conv3x3_kernel(xt_ref, xm_ref, xb_ref, w_ref, b_ref, s_ref, t_ref,
                    y_ref, sum_ref, ssq_ref, *, TR, RT, W, Cout, fuse_bn_relu):
    """One (batch, row-tile) step of a 3x3 'same' conv (stride 1) + bias.

    The previous layer's BatchNorm-normalize + ReLU is fused into the input path
    (fuse_bn_relu=True); for the first layer the input is used as-is.  The previous raw
    activations are stored WITHOUT spatial zero padding in an (rows, W+2, Cin) bf16
    layout (cols [W, W+2) are don't-care); zero padding is realized by masking, so no
    wrapper jnp.pad / extra HBM pass is needed.

    xt: (1, 1,  W+2, Cin) prev row rt*TR-1 (clamped load; masked to zero when rt == 0)
    xm: (1, TR, W+2, Cin) prev rows [rt*TR, rt*TR+TR)
    xb: (1, 1,  W+2, Cin) prev row rt*TR+TR (clamped; masked to zero when rt == RT-1)
    w : (3, 3*Cin, Cout) bf16 -- w[dh] = [w(dh,0); w(dh,1); w(dh,2)] stacked along K
    b : (1, Cout) f32 bias;  s,t: (1, Cin) f32 previous-BatchNorm scale/shift

    Outputs: y (1, TR, W+2, Cout) bf16 raw conv output (cols [W, W+2) garbage) and
    per-tile BN partial sums (reduced in the wrapper -> grid stays fully parallel).
    """
    rt = pl.program_id(1)
    Wp2 = W + 2
    M = TR * Wp2

    col = lax.broadcasted_iota(jnp.int32, (1, Wp2, 1), 1)
    col_ok = col < W

    def prep(piece, row_ok):
        # fused BN-affine + ReLU of the previous layer, masked to zero outside the valid
        # (row, col) region, cast to bf16 exactly once.
        v = piece.astype(jnp.float32)
        if fuse_bn_relu:
            v = jnp.maximum(v * s_ref[...] + t_ref[...], 0.0)
        return jnp.where(jnp.logical_and(col_ok, row_ok), v, 0.0).astype(jnp.bfloat16)

    a_t = prep(xt_ref[0], rt > 0)           # (1,  W+2, Cin)
    a_m = prep(xm_ref[0], True)             # (TR, W+2, Cin)
    a_b = prep(xb_ref[0], rt < RT - 1)      # (1,  W+2, Cin)

    # (TR+4, W+2, Cin) bf16 slab; the duplicated first/last rows are never read by valid
    # outputs (they only keep the flat windows below in-bounds for the 2 wrap columns).
    # TODO(synk): replace the 3 blocks + concat with a single overlapping element-offset
    # input block once pl.Element windows are verified on this toolchain.
    slab = jnp.concatenate([a_t, a_t, a_m, a_b, a_b], axis=0)
    a_flat = slab.reshape((TR + 4) * Wp2, -1)

    def lhs_for(dh):
        # lane-concatenate the three dw-shifted row-offset windows -> (M, 3*Cin) bf16
        base = (dh + 1) * Wp2 - 1
        return jnp.concatenate(
            [a_flat[base:base + M, :],
             a_flat[base + 1:base + 1 + M, :],
             a_flat[base + 2:base + 2 + M, :]], axis=1)

    # 3 MXU pushes with K = 3*Cin; bias folded into the first result (no zeros-init,
    # no scratch accumulator RMW passes).
    acc = jnp.dot(lhs_for(0), w_ref[0], preferred_element_type=jnp.float32) + b_ref[...]
    acc = acc + jnp.dot(lhs_for(1), w_ref[1], preferred_element_type=jnp.float32)
    acc = acc + jnp.dot(lhs_for(2), w_ref[2], preferred_element_type=jnp.float32)

    y3 = acc.reshape(TR, Wp2, Cout)
    y_ref[0] = y3.astype(jnp.bfloat16)      # full-width store, no reshape/slice relayout

    # per-tile BatchNorm partial statistics over the W valid columns only (f32, from the
    # f32 accumulator before the bf16 store)
    valid = lax.broadcasted_iota(jnp.int32, (TR, Wp2, 1), 1) < W
    ym = jnp.where(valid, y3, 0.0).reshape(M, Cout)
    sum_ref[0, 0] = jnp.sum(ym, axis=0, keepdims=True)
    ssq_ref[0, 0] = jnp.sum(ym * ym, axis=0, keepdims=True)


def _pool_bn_relu_kernel(x_ref, s_ref, t_ref, v_ref, i_ref, *, TRo, Wo, C, W):
    """Fused BatchNorm-affine + ReLU + 2x2 stride-2 max-pool with argmax.

    x: (1, 2*TRo, Wo, 2*C) bf16 raw conv3 output with adjacent column pairs packed into
       lanes ([..., :C] = even column, [..., C:] = odd column; free wrapper reshape;
       the garbage (W, W+1) column pair is never fetched by the BlockSpec).
    Outputs: pooled values f32 and flat argmax indices (row-major over the unpooled H*W
    plane, PyTorch convention), int32.  Strict '>' -> first max in window order wins.
    """
    ro = pl.program_id(1)
    s = s_ref[...]
    t = t_ref[...]

    x = x_ref[0].reshape(TRo, 2, Wo, 2 * C)   # split row pairs (leading dim only)

    def act(v):
        return jnp.maximum(v * s + t, 0.0)    # bf16 * f32 -> f32

    v00 = act(x[:, 0, :, :C])
    v01 = act(x[:, 0, :, C:])
    v10 = act(x[:, 1, :, :C])
    v11 = act(x[:, 1, :, C:])

    ho = lax.broadcasted_iota(jnp.int32, (TRo, Wo, C), 0) + ro * TRo
    wo = lax.broadcasted_iota(jnp.int32, (TRo, Wo, C), 1)

    best_v = v00
    best_i = (2 * ho) * W + (2 * wo)
    for v, idx in ((v01, (2 * ho) * W + (2 * wo + 1)),
                   (v10, (2 * ho + 1) * W + (2 * wo)),
                   (v11, (2 * ho + 1) * W + (2 * wo + 1))):
        upd = v > best_v
        best_v = jnp.where(upd, v, best_v)
        best_i = jnp.where(upd, idx, best_i)

    v_ref[0] = best_v
    i_ref[0] = best_i


# ----------------------------------------------------------------------------- tiling
def _vmem_limit_bytes():
    """Generation-aware VMEM cap: ~3/4 of physical, capped, with a conservative
    fallback (v7x has only 64 MiB per TensorCore)."""
    try:
        phys = int(pltpu.get_tpu_info().vmem_capacity_bytes)
    except Exception:
        phys = 64 << 20
    return int(min(phys * 3 // 4, 112 << 20))


def _auto_row_tile(H, W, Cin, Cout, vmem_limit):
    """Largest divisor of H whose per-step working set (double-buffered blocks, weights,
    and in-kernel temporaries: bf16 slab, per-dh lane-concatenated LHS, f32 accumulator)
    fits in roughly half the scoped VMEM limit."""
    budget = vmem_limit // 2
    Wp2 = W + 2
    best = 1
    for tr in range(1, H + 1):
        if H % tr:
            continue
        m = tr * Wp2
        blocks = (2 * (tr + 2) * Wp2 * Cin * 2     # bf16 input (main + halos), dbl-buf
                  + 2 * m * Cout * 2               # bf16 y output, dbl-buf
                  + 2 * 9 * Cin * Cout * 2         # bf16 weights, dbl-buf
                  + 8 * Cout * 4)                  # bias / stats blocks
        temps = ((tr + 4) * Wp2 * Cin * 2          # activated bf16 slab
                 + 2 * m * 3 * Cin * 2             # per-dh bf16 LHS (2 alive)
                 + 2 * m * Cout * 4)               # f32 accumulator value
        if blocks + temps + (64 << 10) <= budget:
            best = tr
    return best


def _auto_pool_tile(Ho, Wo, C, vmem_limit):
    """VMEM-budget-aware pool row tile (the pool is HBM-bound; modest tiles are fine)."""
    budget = vmem_limit // 2
    best = 1
    for tro in range(1, Ho + 1):
        if Ho % tro:
            continue
        step = (2 * 2 * tro * Wo * 2 * C * 2       # bf16 input block, dbl-buf
                + 2 * tro * Wo * C * 8             # f32 values + int32 indices, dbl-buf
                + 10 * tro * Wo * C * 4)           # in-kernel temporaries
        if step + (64 << 10) <= budget:
            best = tro
    return best


# ----------------------------------------------------------------------------- wrappers
def _conv_bn_layer(x_store, w, b, in_scale, in_shift, *, H, W, fuse_bn_relu,
                   row_tile, vmem_limit):
    """x_store: (N, H, W+2, Cin) bf16 raw previous activation (cols [W, W+2) don't-care).
    Returns raw conv output (N, H, W+2, Cout) bf16 and training-mode BN (mean, var)."""
    N = x_store.shape[0]
    Cin = x_store.shape[-1]
    Cout = w.shape[-1]
    TR = row_tile
    assert H % TR == 0
    RT = H // TR
    Wp2 = W + 2

    # [w(dh,0); w(dh,1); w(dh,2)] stacked along K for the in-kernel K=3*Cin matmuls
    w3 = w.reshape(3, 3 * Cin, Cout).astype(jnp.bfloat16)

    kernel = functools.partial(
        _conv3x3_kernel, TR=TR, RT=RT, W=W, Cout=Cout, fuse_bn_relu=fuse_bn_relu)

    # TODO(synk): single-buffer (pl.Buffered(1)) the constant-index weight spec on v7x
    # 512x512 layers once Buffered(1) is verified on this toolchain.
    y, psum, pssq = pl.pallas_call(
        kernel,
        out_shape=(
            jax.ShapeDtypeStruct((N, H, Wp2, Cout), jnp.bfloat16),
            jax.ShapeDtypeStruct((N, RT, 1, Cout), jnp.float32),
            jax.ShapeDtypeStruct((N, RT, 1, Cout), jnp.float32),
        ),
        grid=(N, RT),
        in_specs=[
            pl.BlockSpec((1, 1, Wp2, Cin),
                         lambda n, rt: (n, jnp.maximum(rt * TR - 1, 0), 0, 0)),
            pl.BlockSpec((1, TR, Wp2, Cin), lambda n, rt: (n, rt, 0, 0)),
            pl.BlockSpec((1, 1, Wp2, Cin),
                         lambda n, rt: (n, jnp.minimum(rt * TR + TR, H - 1), 0, 0)),
            pl.BlockSpec((3, 3 * Cin, Cout), lambda n, rt: (0, 0, 0)),
            pl.BlockSpec((1, Cout), lambda n, rt: (0, 0)),
            pl.BlockSpec((1, Cin), lambda n, rt: (0, 0)),
            pl.BlockSpec((1, Cin), lambda n, rt: (0, 0)),
        ],
        out_specs=(
            pl.BlockSpec((1, TR, Wp2, Cout), lambda n, rt: (n, rt, 0, 0)),
            pl.BlockSpec((1, 1, 1, Cout), lambda n, rt: (n, rt, 0, 0)),
            pl.BlockSpec((1, 1, 1, Cout), lambda n, rt: (n, rt, 0, 0)),
        ),
        compiler_params=pltpu.CompilerParams(
            dimension_semantics=("parallel", "parallel"),
            vmem_limit_bytes=vmem_limit),
    )(x_store, x_store, x_store, w3, b.reshape(1, Cout),
      in_scale.reshape(1, Cin), in_shift.reshape(1, Cin))

    # training-mode BatchNorm statistics over (N, H, W), biased variance
    # TODO(synk): E[x^2]-E[x]^2 in f32 can lose precision vs a two-pass variance at
    # large magnitudes; switch to a compensated/two-pass scheme if tolerances tighten.
    count = float(N * H * W)
    csum = jnp.sum(psum, axis=(0, 1, 2))
    cssq = jnp.sum(pssq, axis=(0, 1, 2))
    mean = csum / count
    var = cssq / count - mean * mean
    return y, mean, var


def _maxpool_bn_relu(y_store, scale, shift, *, W, pool_row_tile, vmem_limit):
    """Fused BN+ReLU (of the last conv) + 2x2/2 max-pool with argmax.
    y_store: (N, H, W+2, C) bf16 raw conv output (cols [W, W+2) don't-care)."""
    N, H, Wp2, C = y_store.shape
    Ho, Wo = H // 2, W // 2
    TRo = pool_row_tile
    assert Ho % TRo == 0
    RO = Ho // TRo
    # free reshape: adjacent column pairs -> lanes; the trailing garbage pair is simply
    # never fetched because the input block only spans the first Wo pairs.
    packed = y_store.reshape(N, H, Wp2 // 2, 2 * C)

    vals, idx = pl.pallas_call(
        functools.partial(_pool_bn_relu_kernel, TRo=TRo, Wo=Wo, C=C, W=W),
        out_shape=(
            jax.ShapeDtypeStruct((N, Ho, Wo, C), jnp.float32),
            jax.ShapeDtypeStruct((N, Ho, Wo, C), jnp.int32),
        ),
        grid=(N, RO),
        in_specs=[
            pl.BlockSpec((1, 2 * TRo, Wo, 2 * C), lambda n, ro: (n, ro, 0, 0)),
            pl.BlockSpec((1, C), lambda n, ro: (0, 0)),
            pl.BlockSpec((1, C), lambda n, ro: (0, 0)),
        ],
        out_specs=(
            pl.BlockSpec((1, TRo, Wo, C), lambda n, ro: (n, ro, 0, 0)),
            pl.BlockSpec((1, TRo, Wo, C), lambda n, ro: (n, ro, 0, 0)),
        ),
        compiler_params=pltpu.CompilerParams(
            dimension_semantics=("parallel", "parallel"),
            vmem_limit_bytes=vmem_limit),
    )(packed, scale.reshape(1, C), shift.reshape(1, C))
    return vals, idx


def segnet_down3_forward(x_nchw, params, *, row_tile=None, pool_row_tile=None):
    """Equivalent of segnetDown3.forward (train-mode BatchNorm).
    Returns (pooled outputs NCHW f32, argmax indices NCHW int32, unpooled_shape)."""
    x = jnp.transpose(x_nchw, (0, 2, 3, 1)).astype(jnp.float32)   # NCHW -> NHWC
    N, H, W, cin0 = x.shape
    assert H % 2 == 0 and W % 2 == 0
    vmem_limit = _vmem_limit_bytes()

    # Width-only pad (+2 don't-care cols) and bf16 cast of the (small, Cin-channel)
    # input; inter-layer activations stay in this (H, W+2, C) bf16 layout so there are
    # no jnp.pad HBM round trips between layers.
    x_store = jnp.pad(x, ((0, 0), (0, 0), (0, 2), (0, 0))).astype(jnp.bfloat16)

    in_scale = jnp.ones((cin0,), jnp.float32)
    in_shift = jnp.zeros((cin0,), jnp.float32)

    y = scale = shift = None
    for li, (w, b, gamma, beta) in enumerate(params):
        cin, cout = w.shape[2], w.shape[3]
        tr = (row_tile if row_tile is not None
              else _auto_row_tile(H, W, cin, cout, vmem_limit))
        y, mean, var = _conv_bn_layer(
            x_store, w, b, in_scale, in_shift,
            H=H, W=W, fuse_bn_relu=(li > 0), row_tile=tr, vmem_limit=vmem_limit)
        scale = gamma * lax.rsqrt(var + BN_EPS)
        shift = beta - mean * scale
        if li + 1 < len(params):
            # raw bf16 conv output stays in HBM; its BN-normalize + ReLU is fused into
            # the next conv kernel's input path (no standalone bn/relu HBM pass).
            x_store = y
            in_scale, in_shift = scale, shift

    C = y.shape[-1]
    unpooled_shape = (N, C, H, W)   # outputs.size() in the PyTorch (NCHW) convention
    tro = (pool_row_tile if pool_row_tile is not None
           else _auto_pool_tile(H // 2, W // 2, C, vmem_limit))
    vals, idx = _maxpool_bn_relu(y, scale, shift, W=W, pool_row_tile=tro,
                                 vmem_limit=vmem_limit)

    outputs = jnp.transpose(vals, (0, 3, 1, 2))   # back to NCHW
    # TODO(synk): PyTorch returns int64 pooling indices; int32 is used here (x64 off).
    indices = jnp.transpose(idx, (0, 3, 1, 2))
    return outputs, indices, unpooled_shape


def init_params(key, in_size, out_size):
    """Deterministic synthetic params: 3 x (conv weight HWIO, conv bias, bn gamma, bn beta)."""
    layers = []
    cin = in_size
    for _ in range(3):
        key, kw, kb, kg, kbe = jax.random.split(key, 5)
        w = jax.random.normal(kw, (3, 3, cin, out_size), jnp.float32) * np.sqrt(2.0 / (9 * cin))
        b = jax.random.normal(kb, (out_size,), jnp.float32) * 0.05
        gamma = 1.0 + 0.1 * jax.random.normal(kg, (out_size,), jnp.float32)
        beta = 0.1 * jax.random.normal(kbe, (out_size,), jnp.float32)
        layers.append((w, b, gamma, beta))
        cin = out_size
    return layers


# ----------------------------------------------------------------------------- reference
def _ref_forward(x_nchw, params):
    """Pure-JAX/XLA reference (NCHW, f32 activations, bf16 conv inputs) for the
    conv/bn/relu stack + pooled values."""
    x = x_nchw.astype(jnp.float32)
    for (w, b, g, be) in params:
        y = lax.conv_general_dilated(
            x.astype(jnp.bfloat16), w.astype(jnp.bfloat16),
            window_strides=(1, 1), padding=((1, 1), (1, 1)),
            dimension_numbers=("NCHW", "HWIO", "NCHW"),
            preferred_element_type=jnp.float32,
        ) + b[None, :, None, None]
        mean = y.mean(axis=(0, 2, 3))
        var = y.var(axis=(0, 2, 3))
        x = jnp.maximum(
            (y - mean[None, :, None, None])
            * (g * lax.rsqrt(var + BN_EPS))[None, :, None, None]
            + be[None, :, None, None], 0.0)
    N, C, H, W = x.shape
    pooled = x.reshape(N, C, H // 2, 2, W // 2, 2).max(axis=(3, 5))
    return x, pooled


# ----------------------------------------------------------------------------- main
if __name__ == "__main__":
    key = jax.random.PRNGKey(0)
    kx, kp = jax.random.split(key)

    N, C_IN, C_OUT, H, W = 2, 4, 8, 16, 16
    x = jax.random.normal(kx, (N, C_IN, H, W), jnp.float32)
    params = init_params(kp, C_IN, C_OUT)

    # row_tile=8 / pool_row_tile=4 force multi-tile grids at this toy size so the halo
    # and partial-statistics paths are exercised; real sizes can use the auto pickers.
    outputs, indices, unpooled_shape = segnet_down3_forward(
        x, params, row_tile=8, pool_row_tile=4)
    jax.block_until_ready((outputs, indices))

    # sanity checks against the pure-JAX reference.  Inter-layer activations are stored
    # in bf16, so use a tolerance that absorbs that rounding but still catches
    # structural bugs (wrong taps / masks / indices give O(1) mismatches).
    act_ref, pooled_ref = _ref_forward(x, params)
    np.testing.assert_allclose(np.asarray(outputs), np.asarray(pooled_ref),
                               rtol=3e-2, atol=3e-2)

    # each returned index must point at the location whose (reference) activation equals
    # the value this kernel pooled at that output position (robust to near-ties).
    act_flat = np.asarray(act_ref).reshape(N, C_OUT, H * W)
    gathered = np.take_along_axis(
        act_flat, np.asarray(indices).reshape(N, C_OUT, -1), axis=2
    ).reshape(N, C_OUT, H // 2, W // 2)
    np.testing.assert_allclose(gathered, np.asarray(outputs), rtol=3e-2, atol=3e-2)

    assert outputs.shape == (N, C_OUT, H // 2, W // 2)
    assert indices.shape == (N, C_OUT, H // 2, W // 2)
    assert unpooled_shape == (N, C_OUT, H, W)

    print("KERNEL_OK")
</pallas_src>

<mosaic_0001>
module attributes {stable_mosaic.version = 11 : i64} {
  func.func @_conv3x3_kernel(%arg0: i32, %arg1: i32, %arg2: memref<1x1x18x4xbf16, #tpu.memory_space<vmem>>, %arg3: memref<1x8x18x4xbf16, #tpu.memory_space<vmem>>, %arg4: memref<1x1x18x4xbf16, #tpu.memory_space<vmem>>, %arg5: memref<3x12x8xbf16, #tpu.memory_space<vmem>>, %arg6: memref<1x8xf32, #tpu.memory_space<vmem>>, %arg7: memref<1x4xf32, #tpu.memory_space<vmem>>, %arg8: memref<1x4xf32, #tpu.memory_space<vmem>>, %arg9: memref<1x8x18x8xbf16, #tpu.memory_space<vmem>>, %arg10: memref<1x1x1x8xf32, #tpu.memory_space<vmem>>, %arg11: memref<1x1x1x8xf32, #tpu.memory_space<vmem>>) attributes {dimension_semantics = [#tpu.dimension_semantics<parallel>, #tpu.dimension_semantics<parallel>], iteration_bounds = array<i64: 2, 2>, scalar_prefetch = 0 : i64, scratch_operands = 0 : i64, tpu.core_type = #tpu.core_type<tc>, window_params = [{transform_indices = @transform_0, window_bounds = array<i64: 1, 1, 18, 4>}, {transform_indices = @transform_1, window_bounds = array<i64: 1, 8, 18, 4>}, {transform_indices = @transform_2, window_bounds = array<i64: 1, 1, 18, 4>}, {pipeline_mode = #tpu.pipeline_mode<synchronous>, transform_indices = @transform_3, window_bounds = array<i64: 3, 12, 8>}, {pipeline_mode = #tpu.pipeline_mode<synchronous>, transform_indices = @transform_4, window_bounds = array<i64: 1, 8>}, {pipeline_mode = #tpu.pipeline_mode<synchronous>, transform_indices = @transform_5, window_bounds = array<i64: 1, 4>}, {pipeline_mode = #tpu.pipeline_mode<synchronous>, transform_indices = @transform_6, window_bounds = array<i64: 1, 4>}, {transform_indices = @transform_7, window_bounds = array<i64: 1, 8, 18, 8>}, {transform_indices = @transform_8, window_bounds = array<i64: 1, 1, 1, 8>}, {transform_indices = @transform_9, window_bounds = array<i64: 1, 1, 1, 8>}]} {
    %0 = tpu.iota {dimensions = array<i32: 1>} : vector<1x18x1xi32>
    %c16_i32 = arith.constant 16 : i32
    %1 = vector.broadcast %c16_i32 : i32 to vector<1x18x1xi32>
    %2 = arith.cmpi slt, %0, %1 : vector<1x18x1xi32>
    %c0 = arith.constant 0 : index
    %c0_0 = arith.constant 0 : index
    %c0_1 = arith.constant 0 : index
    %c0_2 = arith.constant 0 : index
    %3 = vector.load %arg2[%c0, %c0_0, %c0_1, %c0_2] : memref<1x1x18x4xbf16, #tpu.memory_space<vmem>>, vector<1x1x18x4xbf16>
    %4 = vector.shape_cast %3 : vector<1x1x18x4xbf16> to vector<1x18x4xbf16>
    %c0_i32 = arith.constant 0 : i32
    %5 = arith.cmpi sgt, %arg1, %c0_i32 : i32
    %6 = arith.extf %4 : vector<1x18x4xbf16> to vector<1x18x4xf32>
    %7 = vector.broadcast %5 : i1 to vector<1x18x1xi1>
    %8 = arith.andi %2, %7 : vector<1x18x1xi1>
    %cst = arith.constant 0.000000e+00 : f32
    %9 = vector.shape_cast %8 : vector<1x18x1xi1> to vector<1x18x1xi1>
    %10 = vector.broadcast %9 : vector<1x18x1xi1> to vector<1x18x4xi1>
    %11 = vector.broadcast %cst : f32 to vector<1x18x4xf32>
    %12 = arith.select %10, %6, %11 : vector<1x18x4xi1>, vector<1x18x4xf32>
    %13 = arith.truncf %12 : vector<1x18x4xf32> to vector<1x18x4xbf16>
    %c0_3 = arith.constant 0 : index
    %c0_4 = arith.constant 0 : index
    %c0_5 = arith.constant 0 : index
    %c0_6 = arith.constant 0 : index
    %14 = vector.load %arg3[%c0_3, %c0_4, %c0_5, %c0_6] : memref<1x8x18x4xbf16, #tpu.memory_space<vmem>>, vector<1x8x18x4xbf16>
    %15 = vector.shape_cast %14 : vector<1x8x18x4xbf16> to vector<8x18x4xbf16>
    %16 = arith.extf %15 : vector<8x18x4xbf16> to vector<8x18x4xf32>
    %true = arith.constant true
    %17 = vector.broadcast %true : i1 to vector<1x18x1xi1>
    %18 = arith.andi %2, %17 : vector<1x18x1xi1>
    %cst_7 = arith.constant 0.000000e+00 : f32
    %19 = vector.shape_cast %18 : vector<1x18x1xi1> to vector<1x18x1xi1>
    %20 = vector.broadcast %19 : vector<1x18x1xi1> to vector<8x18x4xi1>
    %21 = vector.broadcast %cst_7 : f32 to vector<8x18x4xf32>
    %22 = arith.select %20, %16, %21 : vector<8x18x4xi1>, vector<8x18x4xf32>
    %23 = arith.truncf %22 : vector<8x18x4xf32> to vector<8x18x4xbf16>
    %c0_8 = arith.constant 0 : index
    %c0_9 = arith.constant 0 : index
    %c0_10 = arith.constant 0 : index
    %c0_11 = arith.constant 0 : index
    %24 = vector.load %arg4[%c0_8, %c0_9, %c0_10, %c0_11] : memref<1x1x18x4xbf16, #tpu.memory_space<vmem>>, vector<1x1x18x4xbf16>
    %25 = vector.shape_cast %24 : vector<1x1x18x4xbf16> to vector<1x18x4xbf16>
    %c1_i32 = arith.constant 1 : i32
    %26 = arith.cmpi slt, %arg1, %c1_i32 : i32
    %27 = arith.extf %25 : vector<1x18x4xbf16> to vector<1x18x4xf32>
    %28 = vector.broadcast %26 : i1 to vector<1x18x1xi1>
    %29 = arith.andi %2, %28 : vector<1x18x1xi1>
    %cst_12 = arith.constant 0.000000e+00 : f32
    %30 = vector.shape_cast %29 : vector<1x18x1xi1> to vector<1x18x1xi1>
    %31 = vector.broadcast %30 : vector<1x18x1xi1> to vector<1x18x4xi1>
    %32 = vector.broadcast %cst_12 : f32 to vector<1x18x4xf32>
    %33 = arith.select %31, %27, %32 : vector<1x18x4xi1>, vector<1x18x4xf32>
    %34 = arith.truncf %33 : vector<1x18x4xf32> to vector<1x18x4xbf16>
    %35 = tpu.concatenate %13, %13, %23, %34, %34 in 0 : vector<1x18x4xbf16>, vector<1x18x4xbf16>, vector<8x18x4xbf16>, vector<1x18x4xbf16>, vector<1x18x4xbf16> -> vector<12x18x4xbf16>
    %36 = vector.shape_cast %35 : vector<12x18x4xbf16> to vector<216x4xbf16>
    %37 = vector.extract_strided_slice %36 {offsets = [17, 0], sizes = [144, 4], strides = [1, 1]} : vector<216x4xbf16> to vector<144x4xbf16>
    %38 = vector.extract_strided_slice %36 {offsets = [18, 0], sizes = [144, 4], strides = [1, 1]} : vector<216x4xbf16> to vector<144x4xbf16>
    %39 = vector.extract_strided_slice %36 {offsets = [19, 0], sizes = [144, 4], strides = [1, 1]} : vector<216x4xbf16> to vector<144x4xbf16>
    %40 = tpu.concatenate %37, %38, %39 in 1 : vector<144x4xbf16>, vector<144x4xbf16>, vector<144x4xbf16> -> vector<144x12xbf16>
    %c0_13 = arith.constant 0 : index
    %c0_14 = arith.constant 0 : index
    %c0_15 = arith.constant 0 : index
    %41 = vector.load %arg5[%c0_13, %c0_14, %c0_15] : memref<3x12x8xbf16, #tpu.memory_space<vmem>>, vector<1x12x8xbf16>
    %42 = vector.shape_cast %41 : vector<1x12x8xbf16> to vector<12x8xbf16>
    %cst_16 = arith.constant dense<0.000000e+00> : vector<144x8xf32>
    %43 = tpu.matmul %40, %42, %cst_16 {dimension_numbers = #tpu.dot_dimension_numbers<[1], [0], [0], [1], [0, 0, 1, 1], [], []>} : vector<144x12xbf16>, vector<12x8xbf16>, vector<144x8xf32> -> vector<144x8xf32>
    %c0_17 = arith.constant 0 : index
    %c0_18 = arith.constant 0 : index
    %44 = vector.load %arg6[%c0_17, %c0_18] : memref<1x8xf32, #tpu.memory_space<vmem>>, vector<1x8xf32>
    %45 = vector.broadcast %44 : vector<1x8xf32> to vector<144x8xf32>
    %46 = arith.addf %43, %45 : vector<144x8xf32>
    %47 = vector.extract_strided_slice %36 {offsets = [35, 0], sizes = [144, 4], strides = [1, 1]} : vector<216x4xbf16> to vector<144x4xbf16>
    %48 = vector.extract_strided_slice %36 {offsets = [36, 0], sizes = [144, 4], strides = [1, 1]} : vector<216x4xbf16> to vector<144x4xbf16>
    %49 = vector.extract_strided_slice %36 {offsets = [37, 0], sizes = [144, 4], strides = [1, 1]} : vector<216x4xbf16> to vector<144x4xbf16>
    %50 = tpu.concatenate %47, %48, %49 in 1 : vector<144x4xbf16>, vector<144x4xbf16>, vector<144x4xbf16> -> vector<144x12xbf16>
    %c1 = arith.constant 1 : index
    %c0_19 = arith.constant 0 : index
    %c0_20 = arith.constant 0 : index
    %51 = vector.load %arg5[%c1, %c0_19, %c0_20] : memref<3x12x8xbf16, #tpu.memory_space<vmem>>, vector<1x12x8xbf16>
    %52 = vector.shape_cast %51 : vector<1x12x8xbf16> to vector<12x8xbf16>
    %cst_21 = arith.constant dense<0.000000e+00> : vector<144x8xf32>
    %53 = tpu.matmul %50, %52, %cst_21 {dimension_numbers = #tpu.dot_dimension_numbers<[1], [0], [0], [1], [0, 0, 1, 1], [], []>} : vector<144x12xbf16>, vector<12x8xbf16>, vector<144x8xf32> -> vector<144x8xf32>
    %54 = arith.addf %46, %53 : vector<144x8xf32>
    %55 = vector.extract_strided_slice %36 {offsets = [53, 0], sizes = [144, 4], strides = [1, 1]} : vector<216x4xbf16> to vector<144x4xbf16>
    %56 = vector.extract_strided_slice %36 {offsets = [54, 0], sizes = [144, 4], strides = [1, 1]} : vector<216x4xbf16> to vector<144x4xbf16>
    %57 = vector.extract_strided_slice %36 {offsets = [55, 0], sizes = [144, 4], strides = [1, 1]} : vector<216x4xbf16> to vector<144x4xbf16>
    %58 = tpu.concatenate %55, %56, %57 in 1 : vector<144x4xbf16>, vector<144x4xbf16>, vector<144x4xbf16> -> vector<144x12xbf16>
    %c2 = arith.constant 2 : index
    %c0_22 = arith.constant 0 : index
    %c0_23 = arith.constant 0 : index
    %59 = vector.load %arg5[%c2, %c0_22, %c0_23] : memref<3x12x8xbf16, #tpu.memory_space<vmem>>, vector<1x12x8xbf16>
    %60 = vector.shape_cast %59 : vector<1x12x8xbf16> to vector<12x8xbf16>
    %cst_24 = arith.constant dense<0.000000e+00> : vector<144x8xf32>
    %61 = tpu.matmul %58, %60, %cst_24 {dimension_numbers = #tpu.dot_dimension_numbers<[1], [0], [0], [1], [0, 0, 1, 1], [], []>} : vector<144x12xbf16>, vector<12x8xbf16>, vector<144x8xf32> -> vector<144x8xf32>
    %62 = arith.addf %54, %61 : vector<144x8xf32>
    %63 = vector.shape_cast %62 : vector<144x8xf32> to vector<8x18x8xf32>
    %64 = arith.truncf %63 : vector<8x18x8xf32> to vector<8x18x8xbf16>
    %c0_25 = arith.constant 0 : index
    %c0_26 = arith.constant 0 : index
    %c0_27 = arith.constant 0 : index
    %c0_28 = arith.constant 0 : index
    %65 = vector.load %arg9[%c0_25, %c0_26, %c0_27, %c0_28] : memref<1x8x18x8xbf16, #tpu.memory_space<vmem>>, vector<1x8x18x8xbf16>
    %66 = vector.shape_cast %65 : vector<1x8x18x8xbf16> to vector<8x18x8xbf16>
    %67 = vector.shape_cast %64 : vector<8x18x8xbf16> to vector<1x8x18x8xbf16>
    tpu.vector_store %arg9[%c0_25, %c0_26, %c0_27, %c0_28], %67 {strides = array<i32>} : memref<1x8x18x8xbf16, #tpu.memory_space<vmem>>, vector<1x8x18x8xbf16>,
    %68 = tpu.iota {dimensions = array<i32: 1>} : vector<8x18x1xi32>
    %c16_i32_29 = arith.constant 16 : i32
    %69 = vector.broadcast %c16_i32_29 : i32 to vector<8x18x1xi32>
    %70 = arith.cmpi slt, %68, %69 : vector<8x18x1xi32>
    %cst_30 = arith.constant 0.000000e+00 : f32
    %71 = vector.shape_cast %70 : vector<8x18x1xi1> to vector<8x18x1xi1>
    %72 = vector.broadcast %71 : vector<8x18x1xi1> to vector<8x18x8xi1>
    %73 = vector.broadcast %cst_30 : f32 to vector<8x18x8xf32>
    %74 = arith.select %72, %63, %73 : vector<8x18x8xi1>, vector<8x18x8xf32>
    %75 = vector.shape_cast %74 : vector<8x18x8xf32> to vector<144x8xf32>
    %cst_31 = arith.constant dense<0.000000e+00> : vector<8xf32>
    %76 = vector.multi_reduction <add>, %75, %cst_31 [0] : vector<144x8xf32> to vector<8xf32>
    %77 = vector.shape_cast %76 : vector<8xf32> to vector<1x8xf32>
    %c0_32 = arith.constant 0 : index
    %c0_33 = arith.constant 0 : index
    %c0_34 = arith.constant 0 : index
    %c0_35 = arith.constant 0 : index
    %78 = vector.load %arg10[%c0_32, %c0_33, %c0_34, %c0_35] : memref<1x1x1x8xf32, #tpu.memory_space<vmem>>, vector<1x1x1x8xf32>
    %79 = vector.shape_cast %78 : vector<1x1x1x8xf32> to vector<1x8xf32>
    %80 = vector.shape_cast %77 : vector<1x8xf32> to vector<1x1x1x8xf32>
    tpu.vector_store %arg10[%c0_32, %c0_33, %c0_34, %c0_35], %80 {strides = array<i32>} : memref<1x1x1x8xf32, #tpu.memory_space<vmem>>, vector<1x1x1x8xf32>,
    %81 = arith.mulf %75, %75 : vector<144x8xf32>
    %cst_36 = arith.constant dense<0.000000e+00> : vector<8xf32>
    %82 = vector.multi_reduction <add>, %81, %cst_36 [0] : vector<144x8xf32> to vector<8xf32>
    %83 = vector.shape_cast %82 : vector<8xf32> to vector<1x8xf32>
    %c0_37 = arith.constant 0 : index
    %c0_38 = arith.constant 0 : index
    %c0_39 = arith.constant 0 : index
    %c0_40 = arith.constant 0 : index
    %84 = vector.load %arg11[%c0_37, %c0_38, %c0_39, %c0_40] : memref<1x1x1x8xf32, #tpu.memory_space<vmem>>, vector<1x1x1x8xf32>
    %85 = vector.shape_cast %84 : vector<1x1x1x8xf32> to vector<1x8xf32>
    %86 = vector.shape_cast %83 : vector<1x8xf32> to vector<1x1x1x8xf32>
    tpu.vector_store %arg11[%c0_37, %c0_38, %c0_39, %c0_40], %86 {strides = array<i32>} : memref<1x1x1x8xf32, #tpu.memory_space<vmem>>, vector<1x1x1x8xf32>,
    return
  }
  func.func @transform_0(%arg0: i32, %arg1: i32) -> (i32, i32, i32, i32) {
    %c8_i32 = arith.constant 8 : i32
    %0 = arith.muli %arg1, %c8_i32 : i32
    %c1_i32 = arith.constant 1 : i32
    %1 = arith.subi %0, %c1_i32 : i32
    %c0_i32 = arith.constant 0 : i32
    %2 = arith.maxsi %1, %c0_i32 : i32
    %c0_i32_0 = arith.constant 0 : i32
    %c0_i32_1 = arith.constant 0 : i32
    %c0_i32_2 = arith.constant 0 : i32
    return %arg0, %2, %c0_i32_0, %c0_i32_1 : i32, i32, i32, i32
  }
  func.func @transform_1(%arg0: i32, %arg1: i32) -> (i32, i32, i32, i32) {
    %c0_i32 = arith.constant 0 : i32
    %c0_i32_0 = arith.constant 0 : i32
    %c0_i32_1 = arith.constant 0 : i32
    return %arg0, %arg1, %c0_i32, %c0_i32_0 : i32, i32, i32, i32
  }
  func.func @transform_2(%arg0: i32, %arg1: i32) -> (i32, i32, i32, i32) {
    %c8_i32 = arith.constant 8 : i32
    %0 = arith.muli %arg1, %c8_i32 : i32
    %c8_i32_0 = arith.constant 8 : i32
    %1 = arith.addi %0, %c8_i32_0 : i32
    %c15_i32 = arith.constant 15 : i32
    %2 = arith.minsi %1, %c15_i32 : i32
    %c0_i32 = arith.constant 0 : i32
    %c0_i32_1 = arith.constant 0 : i32
    %c0_i32_2 = arith.constant 0 : i32
    return %arg0, %2, %c0_i32, %c0_i32_1 : i32, i32, i32, i32
  }
  func.func @transform_3(%arg0: i32, %arg1: i32) -> (i32, i32, i32) {
    %c0_i32 = arith.constant 0 : i32
    %c0_i32_0 = arith.constant 0 : i32
    %c0_i32_1 = arith.constant 0 : i32
    %c0_i32_2 = arith.constant 0 : i32
    return %c0_i32, %c0_i32_0, %c0_i32_1 : i32, i32, i32
  }
  func.func @transform_4(%arg0: i32, %arg1: i32) -> (i32, i32) {
    %c0_i32 = arith.constant 0 : i32
    %c0_i32_0 = arith.constant 0 : i32
    %c0_i32_1 = arith.constant 0 : i32
    return %c0_i32, %c0_i32_0 : i32, i32
  }
  func.func @transform_5(%arg0: i32, %arg1: i32) -> (i32, i32) {
    %c0_i32 = arith.constant 0 : i32
    %c0_i32_0 = arith.constant 0 : i32
    %c0_i32_1 = arith.constant 0 : i32
    return %c0_i32, %c0_i32_0 : i32, i32
  }
  func.func @transform_6(%arg0: i32, %arg1: i32) -> (i32, i32) {
    %c0_i32 = arith.constant 0 : i32
    %c0_i32_0 = arith.constant 0 : i32
    %c0_i32_1 = arith.constant 0 : i32
    return %c0_i32, %c0_i32_0 : i32, i32
  }
  func.func @transform_7(%arg0: i32, %arg1: i32) -> (i32, i32, i32, i32) {
    %c0_i32 = arith.constant 0 : i32
    %c0_i32_0 = arith.constant 0 : i32
    %c0_i32_1 = arith.constant 0 : i32
    return %arg0, %arg1, %c0_i32, %c0_i32_0 : i32, i32, i32, i32
  }
  func.func @transform_8(%arg0: i32, %arg1: i32) -> (i32, i32, i32, i32) {
    %c0_i32 = arith.constant 0 : i32
    %c0_i32_0 = arith.constant 0 : i32
    %c0_i32_1 = arith.constant 0 : i32
    return %arg0, %arg1, %c0_i32, %c0_i32_0 : i32, i32, i32, i32
  }
  func.func @transform_9(%arg0: i32, %arg1: i32) -> (i32, i32, i32, i32) {
    %c0_i32 = arith.constant 0 : i32
    %c0_i32_0 = arith.constant 0 : i32
    %c0_i32_1 = arith.constant 0 : i32
    return %arg0, %arg1, %c0_i32, %c0_i32_0 : i32, i32, i32, i32
  }
}

</mosaic_0001>

<bundles_post_ra>
// kernel: tpu_custom_call.1
= control target key start
LH: loop header
LB: loop body
LE: loop exit
PB: predicated region body
PF: predicated region fallthrough
CT: control target
= control target key end

     0   :  { %s9066_s0 = inlined_call_operand.vmem [shape: bf16[2,16,18,4], index: 0, kind: input, shape index: {}]   ;;  %s9067_s1 = inlined_call_operand.vmem [shape: bf16[2,16,18,4], index: 1, kind: input, shape index: {}]   ;;  %s9068_s2 = inlined_call_operand.vmem [shape: bf16[2,16,18,4], index: 2, kind: input, shape index: {}]   ;;  %s9069_s3 = inlined_call_operand.vmem [shape: bf16[3,12,8], index: 3, kind: input, shape index: {}]   ;;  %s9070_s4 = inlined_call_operand.vmem [shape: f32[1,8], index: 4, kind: input, shape index: {}]   ;;  %s9071_s5 = inlined_call_operand.vmem [shape: f32[1,4], index: 5, kind: input, shape index: {}]   ;;  %s9072_s6 = inlined_call_operand.vmem [shape: f32[1,4], index: 6, kind: input, shape index: {}]   ;;  %s9073_s7 = inlined_call_operand.vmem [shape: bf16[2,16,18,8], index: 7, kind: output, shape index: {0}]   ;;  %s9074_s8 = inlined_call_operand.hbm [shape: f32[2,2,1,8], index: 8, kind: output, shape index: {1}]   ;;  %s9075_s9 = inlined_call_operand.hbm [shape: f32[2,2,1,8], index: 9, kind: output, shape index: {2}]  }
   0x1   :  { %9127 = sst [smem:[#allocation41_spill]] %s9066_s0 }
   0x2   :  { %9128 = sst [smem:[#allocation42_spill]] %s9067_s1 }
   0x3   :  { %9129 = sst [smem:[#allocation43_spill]] %s9068_s2 }
   0x4   :  { %15 = vsyncpa [#allocation3], 0 }
   0x5   :  { %17 = vsyncpa [#allocation3 + $0x1], 0 }
   0x6   :  { %18 = vsyncpa [#allocation5], 0 }
   0x7   :  { %20 = vsyncpa [#allocation5 + $0x1], 0  ;;  %s6884_s30 = smov 0   ;;  %s6886_s10 = smov 0  }
   0x8   :  { %s6888_s5 = smov 0   ;;  %s6890_s6 = smov 0  }
   0x9   :  { %s6892_s11 = smov 0   ;;  %s6894_s12 = smov 0  }
   0xa   :  { %s6896_s13 = smov 0   ;;  %s6898_s14 = smov 0  }
   0xb LB: > { %s6268_s15 = sadd.s32 4294967295, %s6823_s14   ;;  %s6269_s16 = sadd.s32 4294967294, %s6823_s14   ;;  %s6823_s14 = sphi %s6898_s14, %s26_s14   ;;  %s6819_s13 = sphi %s6896_s13, %s9228_s13   ;;  %s6815_s12 = sphi %s6894_s12, %s9227_s12   ;;  %s6811_s11 = sphi %s6892_s11, %s9226_s11   ;;  %s6807_s6 = sphi %s6890_s6, %s9225_s6   ;;  %s6803_s5 = sphi %s6888_s5, %s9224_s5   ;;  %s6799_s10 = sphi %s6886_s10, %s9223_s10   ;;  %s6795_s30 = sphi %s6884_s30, %s9222_s30  }
   0xc   : > { %s35_s17 = sadd.s32 1, %s6815_s12  ;;  %s38_s18 = sadd.s32 1, %s6819_s13 }
   0xd   : > { %p36_p0 = scmp.ge.s32.totalorder %s35_s17, 2  ;;  %p269_p1 = scmp.ne.s32.totalorder %s6803_s5, %s6799_s10 }
   0xe   : > { %p270_p2 = scmp.eq.s32.totalorder %s6268_s15, 3  ;;  %p275_p5 = scmp.ne.s32.totalorder %s6799_s10, %s6795_s30 }
   0xf   : > { %s9230_s17 = smov (%p36_p0, %s35_s17), 0  ;;  %s9232_s18 = smov (!%p36_p0, %s38_s18), %s6819_s13 }
  0x10   : > { %s255_s19 = ssub.s32 %s6815_s12, %s9230_s17  ;;  %p6935_p3 = por %p270_p2, %p269_p1 }
  0x11   : > { %p40_p4 = scmp.ge.s32.totalorder %s9232_s18, 2  ;;  %p276_p6 = scmp.eq.s32.totalorder %s6269_s16, 3 }
  0x12   : > { %p6278_p7 = scmp.ge.s32.totalorder %s6823_s14, 1  ;;  %p388_p9 = scmp.lt.s32.totalorder %s6823_s14, 5 }
  0x13   : > { %s9234_s18 = smov (%p40_p4, %s9232_s18), 0  ;;  %p6944_p8 = por %p276_p6, %p275_p5 }
  0x14   : > { %s254_s22 = ssub.s32 %s6819_s13, %s9234_s18  ;;  %s259_s23 = sadd.s32 1, %s6803_s5 }
  0x15   : > { %s256_s24 = sor.u32 %s255_s19, %s254_s22  ;;  %p389_p10 = pnand %p6278_p7, %p388_p9 }
  0x16   : > { %p257_p11 = scmp.eq.s32.totalorder %s256_s24, 0 }
  0x17   : > { %392 = sbr.rel (%p389_p10) target bundleno = 677 (0x2a5), region = 48 }
  0x18   : > { %s6953_s25 = scalar_select %p257_p11, %s6803_s5, %s259_s23  }
  0x1c   : > { %s6956_s26 = sshll.u32 %s6807_s6, 3  ;;  %p472_p12 = scmp.lt.s32.totalorder %s6811_s11, 1  ;;  %v697_v0 = vlaneseq  ;;  %v6825_v1 = vmov 1966171168   ;;  %v6826_v6 = vmov 0.0|0.0   ;;  %vm2346_vm3 = vcmask 31744  }
  0x1d   : > { %p488_p13 = scmp.lt.s32.totalorder %s6956_s26, 15  ;;  %v695_v2 = vunpack.c.l.s4 %v6825_v1  ;;  %s6280_s15 = sadd.s32 4294967295, %s6956_s26  ;;  %vm2220_vm1 = vsmask.f32 256  ;;  %vm2377_vm4 = vcmask 64512   ;;  %vm2507_vm5 = vcmask 1045504  }
  0x1e   : > { %s473_s27 = scalar_select %p472_p12, %s6811_s11, 1  ;;  %v6961_v3 = vshrl.u32 %v697_v0, 7  ;;  %vm6830_vm6 = vmmov 0   ;;  %vm2407_vm7 = vsmask.f32 7424  ;;  %vm2479_vm8 = vcmask 97280  }
  0x1f   : > { %s489_s28 = scalar_select %p488_p13, %s6956_s26, 15  ;;  %v696_v4 = vunpack.c.0.s8 %v695_v2  ;;  %vm4679_vm9 = vcmask 60416   ;;  %vm4682_vm10 = vcmask 57344  }
  0x20   : > { %9132 = vst [vmem:[#allocation8_spill] sm:$0xff] %v6961_v3  ;;  %s6964_s29 = smul.u32 48, %s473_s27  ;;  %p470_p0 = scmp.gt.s32.totalorder %s6280_s15, 0 }
  0x21   : > { %s6597_s16 = smul.u32 3, %s489_s28  ;;  %v6968_v5 = vsub.s32 %v696_v4, %v6961_v3  ;;  %p6281_p1 = scmp.lt.s32.totalorder %s6280_s15, 15 }
  0x22   : > { %p535_p2 = scmp.gt.s32.totalorder %s6807_s6, 0  ;;  %s9133_s1 = sld [smem:[#allocation42_spill]] }
  0x23   : > { %s6971_s19 = sadd.s32 %s6597_s16, %s6964_s29  ;;  %v714_v7 = vrot.slane %v6826_v6, %v6968_v5  ;;  %s497_s28 = sadd.s32 8, %s6956_s26 }
  0x24   : > { %s9076_s22 = sshll.u32 %s6971_s19, 2  ;;  %p7032_p4 = scmp.lt.s32.totalorder %s497_s28, 15 }
  0x25   : > { %s471_s16 = scalar_select %p470_p0, %s6280_s15, 0  ;;  %v6994_v15 = vrot.slane %v714_v7, %v6968_v5 }
  0x26   : > { %s539_s23 = scalar_select %p535_p2, 1, 0 }
  0x27   : > { %s9236_s16 = smov (!%p6281_p1, %s471_s16), 15  ;;  %s9137_s0 = sld [smem:[#allocation41_spill]] }
  0x28   : > { %s6981_s27 = scalar_lea.vmem %s9133_s1, %s9076_s22  ;;  %v540_v27 = vstv %s539_s23  ;;  %s6595_s15 = smul.u32 3, %s9236_s16 }
  0x29   : > { %v566_v8 = vld [vmem:[%s6981_s27 + $0x28] sm:$0xf]  ;;  %v568_v9 = vld [vmem:[%s6981_s27 + $0x30] sm:$0xf]  ;;  %v6987_v10 = vld [vmem:[%s6981_s27 + $0x34] sm:$0xf] }
  0x2a   : > { %v6300_v11 = vcombine.low %v568_v9, %v6987_v10  ;;  %v6308_v12 = vcombine.low %v566_v8, %v566_v8  ;;  %v565_v13 = vld [vmem:[%s6981_s27 + $0x24] sm:$0xf]  ;;  %v556_v14 = vld [vmem:[%s6981_s27] sm:$0xf]  ;;  %v6998_v18 = vld [vmem:[%s6981_s27 + $0x1c] sm:$0xf]  ;;  %v6309_v19 = vcombine.low %v6987_v10, %v6987_v10  ;;  %s478_s16 = sadd.s32 %s6964_s29, %s6595_s15 }
  0x2b   : > { %v6299_v16 = vcombine.low %v565_v13, %v566_v8  ;;  %v557_v17 = vld [vmem:[%s6981_s27 + $0x4] sm:$0xf]  ;;  %v7006_v24 = vld [vmem:[%s6981_s27 + $0x3c] sm:$0xf]  ;;  %v7009_v25 = vld [vmem:[%s6981_s27 + $0x40] sm:$0xf]  ;;  %v6307_v28 = vcombine.low %v6998_v18, %v6998_v18 }
  0x2c   : > { %v960_v20 = vrot.slane %v6308_v12, %v6968_v5  ;;  %v1016_v21 = vrot.slane %v6300_v11, %v6968_v5  ;;  %v6296_v22 = vcombine.low %v556_v14, %v557_v17  ;;  %v6305_v23 = vcombine.low %v557_v17, %v557_v17  ;;  %s6286_s23 = sshll.u32 %s478_s16, 2  ;;  %s9238_s28 = smov (!%p7032_p4, %s497_s28), 15 }
  0x2d   : > { %v953_v26 = vrot.slane %v6299_v16, %v6968_v5  ;;  %v6301_v29 = vcombine.low %v7006_v24, %v7009_v25  ;;  %vm7025_vm0 = vcmp.eq.s32.totalorder %v540_v27, 1  ;;  %s480_s16 = scalar_lea.vmem %s9137_s0, %s6286_s23  ;;  %s9240_s28 = smov (!%p7032_p4, %s9238_s28), 15 }
  0x2e   : > { %v962_v30 = vcombine.high %v960_v20, %v960_v20  ;;  %v7017_v31 = vrot.slane %v960_v20, %v6968_v5  ;;  %v1024_v32 = vcombine.high %v1016_v21, %v1016_v21  ;;  %v7020_v33 = vrot.slane %v1016_v21, %v6968_v5  ;;  %v6442_v51 = vld [vmem:[%s480_s16] sm:$0xff]   ;;  %s7112_s26 = smul.u32 3, %s9240_s28  ;;  %s6827_s28 = smov 8  }
  0x2f   : > { %v961_v34 = vcombine.high %v953_v26, %v953_v26  ;;  %v7023_v35 = vrot.slane %v953_v26, %v6968_v5  ;;  %v764_v37 = vrot.slane %v6296_v22, %v6968_v5  ;;  %v771_v43 = vrot.slane %v6305_v23, %v6968_v5  ;;  %s6828_s24 = smov 4   ;;  %s9191_s2 = sld [smem:[#allocation43_spill]] }
  0x30   : > { %v7037_v38 = vrot.slane %v962_v30, %v6968_v5  ;;  %v7040_v39 = vrot.slane %v1024_v32, %v6968_v5  ;;  %v1054_v40 = vcombine.high %v7020_v33, %v7020_v33  ;;  %v2026_v41 = vcombine.low %v6994_v15, %v7020_v33  ;;  %s506_s22 = sadd.s32 %s7112_s26, %s6964_s29  ;;  %p653_p5 = scmp.lt.s32.totalorder %s6807_s6, 1 }
  0x31   : > { %v7048_v42 = vrot.slane %v961_v34, %v6968_v5  ;;  %v772_v44 = vcombine.high %v764_v37, %v764_v37  ;;  %v7052_v45 = vrot.slane %v764_v37, %v6968_v5  ;;  %v773_v52 = vcombine.high %v771_v43, %v771_v43 }
  0x32   : > { %v2024_v46 = vcombine.low %v7017_v31, %v7037_v38  ;;  %v6327_v47 = vcombine.high %v7017_v31, %v7037_v38  ;;  %v2027_v48 = vcombine.low %v7040_v39, %v1054_v40  ;;  %v7060_v49 = vrot.slane %v2026_v41, %v6968_v5  ;;  %s657_s16 = scalar_select %p653_p5, 1, 0 }
  0x33   : > { %v6326_v50 = vcombine.high %v7023_v35, %v7048_v42  ;;  %v7068_v53 = vrot.slane %v771_v43, %v6968_v5  ;;  %v7071_v54 = vrot.slane %v772_v44, %v6968_v5  ;;  %v6443_v58 = vunpack.c.l.bf16 %v6442_v51 }
  0x34   : > { %v7078_v55 = vrot.slane %v2024_v46, %v6968_v5  ;;  %v7081_v56 = vrot.slane %v6327_v47, %v6968_v5  ;;  %v7084_v57 = vrot.slane %v2027_v48, %v6968_v5  ;;  %v6444_v60 = vunpack.c.h.bf16 %v6442_v51 }
  0x35   : > { %v7087_v59 = vrot.slane %v6326_v50, %v6968_v5  ;;  %v7090_v61 = vrot.slane %v773_v52, %v6968_v5  ;;  %v802_v62 = vcombine.high %v7052_v45, %v7052_v45  ;;  %v551_v2 = vsel %vm7025_vm0, %v6443_v58, 0.0 }
  0x36   : > { %v2056_v63 = vcombine.low %v7078_v55, %v7081_v56  ;;  %v2057_v0 = vcombine.low %v7060_v49, %v7084_v57  ;;  %v552_v6 = vsel %vm7025_vm0, %v6444_v60, 0.0  ;;  %v803_v7 = vcombine.high %v7068_v53, %v7068_v53 }
  0x37   : > { %v804_v8 = vcombine.high %v7071_v54, %v7071_v54  ;;  %v554_v12 = vpack.c.bf16 %v552_v6, %v551_v2  ;;  %v6304_v13 = vpack.c.bf16 %v552_v6, %v552_v6  ;;  %v1828_v14 = vcombine.low %v6994_v15, %v7052_v45 }
  0x38   : > { %v2064_v9 = vrot.slane %v2056_v63, %v6968_v5  ;;  %v2071_v11 = vrot.slane %v2057_v0, %v6968_v5  ;;  %v1829_v16 = vcombine.low %v7071_v54, %v802_v62  ;;  %v1831_v20 = vcombine.low %v7090_v61, %v803_v7 }
  0x39   : > { %v1830_v17 = vcombine.low %v804_v8, %v7068_v53  ;;  %v700_v22 = vrot.slane %v554_v12, %v6968_v5  ;;  %v729_v23 = vrot.slane %v6304_v13, %v6968_v5  ;;  %v897_v26 = vrot.slane %v6307_v28, %v6968_v5 }
  0x3a   : > { %v7123_v21 = vcombine.low %v2064_v9, %v2071_v11  ;;  %v1838_v27 = vrot.slane %v1828_v14, %v6968_v5  ;;  %v1845_v30 = vrot.slane %v1829_v16, %v6968_v5  ;;  %v1859_v34 = vrot.slane %v1831_v20, %v6968_v5 }
  0x3b   : > { %v1852_v32 = vrot.slane %v1830_v17, %v6968_v5  ;;  %v7138_v36 = vrot.slane %v700_v22, %v6968_v5  ;;  %v730_v37 = vcombine.high %v700_v22, %v700_v22  ;;  %v731_v40 = vcombine.high %v729_v23, %v729_v23 }
  0x3c   : > { %9138 = vst [vmem:[#allocation9_spill] sm:$0xff] %v7123_v21  ;;  %2336 = vrot.lane.b32.xlu1 %v7123_v21, %s6827_s28  ;;  %v7141_v41 = vrot.slane %v729_v23, %v6968_v5  ;;  %v1860_v28 = vcombine.low %v1838_v27, %v1845_v30  ;;  %v899_v44 = vcombine.high %v897_v26, %v897_v26  ;;  %v2261_v51 = vshrl.u32 %v7123_v21, 16 }
  0x3d   : > { %9139 = vst [vmem:[#allocation10_spill] sm:$0xff] %v7138_v36  ;;  %v1861_v43 = vcombine.low %v1852_v32, %v1859_v34  ;;  %v7144_v46 = vrot.slane %v897_v26, %v6968_v5  ;;  %v7147_v47 = vrot.slane %v730_v37, %v6968_v5  ;;  %v7150_v48 = vrot.slane %v731_v40, %v6968_v5 }
  0x3e   : > { %9140 = vst [vmem:[#allocation11_spill] sm:$0xff] %v7141_v41  ;;  %v1977_v50 = vcombine.low %v7023_v35, %v7048_v42  ;;  %v1868_v52 = vrot.slane %v1860_v28, %v6968_v5  ;;  %v7158_v60 = vrot.slane %v899_v44, %v6968_v5  ;;  %v7190_v23 = vrot.slane %v2261_v51, 7  ;;  %v560_v44 = vld [vmem:[%s6981_s27 + $0x10] sm:$0xf] }
  0x3f   : > { %9141 = vst [vmem:[#allocation12_spill] sm:$0xff] %v7147_v47  ;;  %9142 = vst [vmem:[#allocation13_spill] sm:$0xff] %v7150_v48  ;;  %v1875_v58 = vrot.slane %v1861_v43, %v6968_v5  ;;  %v929_v62 = vcombine.high %v7144_v46, %v7144_v46  ;;  %v1779_v63 = vcombine.low %v7138_v36, %v7147_v47  ;;  %v2264_v30 = vshll.u32 %v7123_v21, 16  ;;  %v559_v43 = vld [vmem:[%s6981_s27 + $0xc] sm:$0xf] }
  0x40   : > { %v6322_v0 = vcombine.high %v7138_v36, %v7147_v47  ;;  %v1781_v2 = vcombine.low %v7141_v41, %v7150_v48  ;;  %v6323_v6 = vcombine.high %v7141_v41, %v7150_v48  ;;  %v931_v8 = vcombine.high %v7158_v60, %v7158_v60 }
  0x41   : > { %v7170_v7 = vcombine.low %v1868_v52, %v1875_v58  ;;  %v1975_v9 = vcombine.low %v7158_v60, %v929_v62  ;;  %v7176_v11 = vrot.slane %v1977_v50, %v6968_v5  ;;  %v1789_v12 = vrot.slane %v1779_v63, %v6968_v5 }
  0x42   : > { %v1796_v13 = vrot.slane %v6322_v0, %v6968_v5  ;;  %v1803_v14 = vrot.slane %v1781_v2, %v6968_v5  ;;  %v1810_v16 = vrot.slane %v6323_v6, %v6968_v5  ;;  %v1976_v17 = vcombine.low %v931_v8, %v6994_v15 }
  0x43   : > { %9143 = vst [vmem:[#allocation14_spill] sm:$0xff] %v7170_v7  ;;  %2328 = vrot.lane.b32.xlu1 %v7170_v7, %s6827_s28  ;;  %v7186_v20 = vrot.slane %v1975_v9, %v6968_v5  ;;  %v2008_v22 = vcombine.low %v7176_v11, %v7087_v59  ;;  %v2229_v32 = vshrl.u32 %v7170_v7, 16  ;;  %v2232_v40 = vshll.u32 %v7170_v7, 16 }
  0x44   : > { %v1811_v26 = vcombine.low %v1789_v12, %v1796_v13  ;;  %v1812_v27 = vcombine.low %v1803_v14, %v1810_v16  ;;  %v7195_v34 = vrot.slane %v1976_v17, %v6968_v5  ;;  %v1023_v28 = vrot.slane %v6309_v19, %v6968_v5 }
  0x45   : > { %v2022_v37 = vrot.slane %v2008_v22, %v6968_v5  ;;  %v2266_v52 = vor.u32 %v2264_v30, %v7190_v23  ;;  %v7208_v58 = vrot.slane %v2229_v32, 7  ;;  %v1056_v10 = vcombine.high %v7040_v39, %v7040_v39 }
  0x46   : > { %v1819_v50 = vrot.slane %v1811_v26, %v6968_v5  ;;  %v1826_v51 = vrot.slane %v1812_v27, %v6968_v5  ;;  %v2007_v62 = vcombine.low %v7186_v20, %v7195_v34  ;;  %v1025_v63 = vcombine.high %v1023_v28, %v1023_v28 }
  0x47   : > { %v7213_v0 = vrot.slane %v1023_v28, %v6968_v5  ;;  %v2234_v2 = vor.u32 %v2232_v40, %v7208_v58  ;;  %v1079_v6 = vrot.slane %v6301_v29, %v6968_v5  ;;  %v6297_v8 = vcombine.low %v559_v43, %v560_v44 }
  0x48   : > { %v1827_v19 = vcombine.low %v1819_v50, %v1826_v51  ;;  %v2015_v9 = vrot.slane %v2007_v62, %v6968_v5  ;;  %v7224_v12 = vrot.slane %v1025_v63, %v6968_v5  ;;  %v805_v28 = vcombine.high %v7090_v61, %v7090_v61 }
  0x49   : > { %9144 = vst [vmem:[#allocation15_spill] sm:$0xff] %v7213_v0  ;;  %v1055_v13 = vcombine.high %v7213_v0, %v7213_v0  ;;  %v2073_v14 = vcombine.low %v1056_v10, %v7213_v0  ;;  %v1087_v22 = vcombine.high %v1079_v6, %v1079_v6  ;;  %v7231_v26 = vrot.slane %v1079_v6, %v6968_v5 }
  0x4a   : > { %9145 = vst [vmem:[#allocation16_spill] sm:$0xff] %v7224_v12  ;;  %2326 = vrot.lane.b32.xlu0 %v1827_v19, %s6827_s28  ;;  %v2222_v16 = vshrl.u32 %v1827_v19, 16  ;;  %v2225_v17 = vshll.u32 %v1827_v19, 16  ;;  %v7233_v24 = vcombine.low %v2015_v9, %v2022_v37  ;;  %v1057_v29 = vcombine.high %v7224_v12, %v7224_v12 }
  0x4b   : > { %9146 = vst [vmem:[#allocation17_spill] sm:$0xff] %v7231_v26  ;;  %v2074_v27 = vcombine.low %v7224_v12, %v1055_v13  ;;  %v7239_v30 = vrot.slane %v2073_v14, %v6968_v5  ;;  %v7242_v40 = vrot.slane %v1087_v22, %v6968_v5  ;;  %v6306_v43 = vcombine.low %v560_v44, %v560_v44  ;;  %v574_v22 = vld [vmem:[%s6981_s27 + $0x48] sm:$0xf] }
  0x4c   : > { %9147 = vst [vmem:[#allocation18_spill] sm:$0xff] %v7233_v24  ;;  %v2224_v32 = vrot.slane %v2222_v16, 7  ;;  %v2253_v50 = vshrl.u32 %v7233_v24, 16  ;;  %v2075_v37 = vcombine.low %v1057_v29, %v6994_v15  ;;  %v827_v44 = vrot.slane %v6297_v8, %v6968_v5  ;;  %v7275_v29 = vld [vmem:[%s6981_s27 + $0x4c] sm:$0xf] }
  0x4d   : > { %9148 = vst [vmem:[#allocation19_spill] sm:$0xff] %v7242_v40  ;;  %v7249_v51 = vrot.slane %v2074_v27, %v6968_v5  ;;  %v2076_v19 = vcombine.low %v7231_v26, %v7242_v40 }
  0x4e   : > { %v2235_v63 = vsel %vm2220_vm1, %v2224_v32, %v2234_v2  ;;  %v2227_v10 = vor.u32 %v2225_v17, %v2224_v32  ;;  %v7257_v6 = vrot.slane %v2253_v50, 7  ;;  %v7261_v9 = vrot.slane %v2075_v37, %v6968_v5  ;;  %v562_v37 = vld [vmem:[%s6981_s27 + $0x18] sm:$0xf] }
  0x4f   : > { %2294 = vrot.lane.b32.xlu1 %v2235_v63, %s6828_s24  ;;  %v2105_v13 = vcombine.low %v7239_v30, %v7249_v51  ;;  %v834_v2 = vrot.slane %v6306_v43, %v6968_v5  ;;  %v7267_v14 = vrot.slane %v2076_v19, %v6968_v5  ;;  %v835_v16 = vcombine.high %v827_v44, %v827_v44 }
  0x50   : > { %v7270_v8 = vrot.slane %v827_v44, %v6968_v5  ;;  %v1877_v17 = vcombine.low %v805_v28, %v6994_v15  ;;  %v2267_v27 = vsel %vm2220_vm1, %v7257_v6, %v2266_v52  ;;  %v6310_v43 = vcombine.low %v7009_v25, %v7009_v25 }
  0x51   : > { %v2113_v32 = vrot.slane %v2105_v13, %v6968_v5  ;;  %v836_v50 = vcombine.high %v834_v2, %v834_v2  ;;  %2302 = vrot.lane.b32.xlu0 %v2267_v27, %s6828_s24  ;;  %v2106_v63 = vcombine.low %v7261_v9, %v7267_v14  ;;  %v7287_v28 = vrot.slane %v834_v2, %v6968_v5 }
  0x52   : > { %v7290_v19 = vrot.slane %v835_v16, %v6968_v5  ;;  %v1887_v52 = vrot.slane %v1877_v17, %v6968_v5  ;;  %v6302_v13 = vcombine.low %v574_v22, %v7275_v29  ;;  %v6328_v27 = vcombine.high %v7231_v26, %v7242_v40 }
  0x53   : > { %v7294_v44 = vrot.slane %v836_v50, %v6968_v5  ;;  %v2120_v62 = vrot.slane %v2106_v63, %v6968_v5  ;;  %v6298_v17 = vcombine.low %v562_v37, %v6998_v18  ;;  %v1086_v22 = vrot.slane %v6310_v43, %v6968_v5 }
  0x54   : > { %v1878_v2 = vcombine.low %v7270_v8, %v7290_v19  ;;  %v6324_v16 = vcombine.high %v7270_v8, %v7290_v19  ;;  %v7311_v25 = vrot.slane %v6302_v13, %v6968_v5  ;;  %v7314_v1 = vrot.slane %v6328_v27, %v6968_v5 }
  0x55   : > { %v1880_v50 = vcombine.low %v7287_v28, %v7294_v44  ;;  %2292 = vrot.lane.b32.xlu0 %v2227_v10, %s6828_s24  ;;  %v7317_v63 = vcombine.low %v2113_v32, %v2120_v62  ;;  %v890_v37 = vrot.slane %v6298_v17, %v6968_v5  ;;  %v1088_v13 = vcombine.high %v1086_v22, %v1086_v22 }
  0x56   : > { %9149 = vst [vmem:[#allocation20_spill] sm:$0xff] %v7314_v1  ;;  %v7320_v4 = vrot.slane %v1878_v2, %v6968_v5  ;;  %v7323_v18 = vrot.slane %v6324_v16, %v6968_v5  ;;  %v7330_v3 = vrot.slane %v1086_v22, %v6968_v5  ;;  %v7334_v10 = vrot.slane %v7311_v25, %v6968_v5 }
  0x57   : > { %9150 = vst [vmem:[#allocation21_spill] sm:$0xff] %v7317_v63  ;;  %v7327_v43 = vrot.slane %v1880_v50, %v6968_v5  ;;  %2338 = vrot.lane.b32.xlu1 %v7317_v63, %s6827_s28  ;;  %v2269_v62 = vshrl.u32 %v7317_v63, 16  ;;  %v2272_v32 = vshll.u32 %v7317_v63, 16  ;;  %v7346_v17 = vrot.slane %v1088_v13, %v6968_v5 }
  0x58   : > { %9151 = vst [vmem:[#allocation22_spill] sm:$0xff] %v7330_v3  ;;  %9152 = vst [vmem:[#allocation23_spill] sm:$0xff] %v7334_v10  ;;  %v1909_v27 = vcombine.low %v1887_v52, %v7320_v4  ;;  %v2125_v50 = vcombine.low %v6994_v15, %v7334_v10  ;;  %v898_v22 = vcombine.high %v890_v37, %v890_v37 }
  0x59   : > { %v1910_v16 = vcombine.low %v7323_v18, %v7327_v43  ;;  %9153 = vst [vmem:[#allocation24_spill] sm:$0xff] %v7346_v17  ;;  %v7350_v21 = vrot.slane %v2269_v62, 7  ;;  %v7354_v63 = vrot.slane %v890_v37, %v6968_v5  ;;  %v6325_v52 = vcombine.high %v7287_v28, %v7294_v44 }
  0x5a   : > { %v1917_v7 = vrot.slane %v1909_v27, %v6968_v5  ;;  %v2123_v13 = vcombine.low %v7330_v3, %v7346_v17  ;;  %v6329_v36 = vcombine.high %v7330_v3, %v7346_v17  ;;  %v7364_v62 = vrot.slane %v2125_v50, %v6968_v5 }
  0x5b   : > { %v1924_v2 = vrot.slane %v1910_v16, %v6968_v5  ;;  %v2274_v27 = vor.u32 %v2272_v32, %v7350_v21  ;;  %v7368_v37 = vrot.slane %v898_v22, %v6968_v5  ;;  %v928_v47 = vcombine.high %v7354_v63, %v7354_v63 }
  0x5c   : > { %v1927_v16 = vcombine.low %v6994_v15, %v7354_v63  ;;  %v7377_v48 = vrot.slane %v2123_v13, %v6968_v5  ;;  %v7380_v17 = vrot.slane %v6329_v36, %v6968_v5  ;;  %v7383_v50 = vrot.slane %v6325_v52, %v6968_v5  ;;  %v7395_v13 = vld [vmem:[%s6981_s27 + $0x58] sm:$0xf] }
  0x5d   : > { %v7374_v41 = vcombine.low %v1917_v7, %v1924_v2  ;;  %v2275_v32 = vsel %vm2220_vm1, %v7190_v23, %v2274_v27  ;;  %v930_v22 = vcombine.high %v7368_v37, %v7368_v37  ;;  %v1928_v3 = vcombine.low %v7368_v37, %v928_v47  ;;  %v577_v2 = vld [vmem:[%s6981_s27 + $0x54] sm:$0xf]  ;;  %9157 = vst [vmem:[#allocation28_spill] sm:$0xff] %v7395_v13  ;;  %s7837_s27 = sshll.u32 %s506_s22, 2 }
  0x5e   : > { %9155 = vst [vmem:[#allocation26_spill] sm:$0xff] %v7377_v48  ;;  %9156 = vst [vmem:[#allocation27_spill] sm:$0xff] %v7380_v17  ;;  %v7391_v7 = vrot.slane %v1927_v16, %v6968_v5  ;;  %2304 = vrot.lane.b32.xlu0 %v2275_v32, %s6828_s24  ;;  %v2154_v52 = vcombine.low %v7314_v1, %v7377_v48  ;;  %v2155_v47 = vcombine.low %v7380_v17, %v7364_v62  ;;  %s508_s15 = scalar_lea.vmem %s9191_s2, %s7837_s27  ;;  %s6409_s27 = sshll.u32 %s6811_s11, 1 }
  0x5f   : > { %9154 = vst [vmem:[#allocation25_spill] sm:$0xff] %v7374_v41  ;;  %2330 = vrot.lane.b32.xlu1 %v7374_v41, %s6827_s28  ;;  %v2237_v36 = vshrl.u32 %v7374_v41, 16  ;;  %v2240_v23 = vshll.u32 %v7374_v41, 16  ;;  %v1929_v16 = vcombine.low %v930_v22, %v7144_v46  ;;  %v7410_v32 = vrot.slane %v1928_v3, %v6968_v5  ;;  %s6058_s29 = sadd.s32 %s6807_s6, %s6409_s27  ;;  %s6832_s11 = smov [#allocation2]  }
  0x60   : > { %v1958_v40 = vcombine.low %v7383_v50, %v7391_v7  ;;  %v2162_v41 = vrot.slane %v2154_v52, %v6968_v5  ;;  %v2169_v12 = vrot.slane %v2155_v47, %v6968_v5  ;;  %v6303_v26 = vcombine.low %v577_v2, %v7395_v13  ;;  %s6410_s23 = sshll.u32 %s6058_s29, 4  ;;  %s6705_s0 = sshll.u32 %s6832_s11, 4  ;;  %s6706_s0 = int_to_ptr.vmem [resolvable:$false] %s6705_s0 }
  0x61   : > { %v7414_v0 = vrot.slane %v2237_v36, 7  ;;  %v7420_v1 = vrot.slane %v1929_v16, %v6968_v5  ;;  %v6311_v3 = vcombine.low %v7275_v29, %v7275_v29  ;;  %v1150_v36 = vcombine.high %v7311_v25, %v7311_v25  ;;  %s8989_s29 = scalar_lea.hbm %s9075_s9, %s6410_s23  ;;  %s6707_s1 = scalar_lea.vmem %s6706_s0, 32 }
  0x62   : > { %v1966_v27 = vrot.slane %v1958_v40, %v6968_v5  ;;  %v7426_v17 = vcombine.low %v2162_v41, %v2169_v12  ;;  %v1180_v52 = vcombine.high %v7334_v10, %v7334_v10  ;;  %v1205_v29 = vrot.slane %v6303_v26, %v6968_v5 }
  0x63   : > { %v2242_v22 = vor.u32 %v2240_v23, %v7414_v0  ;;  %v1959_v2 = vcombine.low %v7410_v32, %v7420_v1  ;;  %v1149_v40 = vrot.slane %v6311_v3, %v6968_v5  ;;  %v7445_v23 = vrot.slane %v1150_v36, %v6968_v5 }
  0x64   : > { %9158 = vst [vmem:[#allocation29_spill] sm:$0xff] %v7426_v17  ;;  %2340 = vrot.lane.b32.xlu1 %v7426_v17, %s6827_s28  ;;  %v2277_v12 = vshrl.u32 %v7426_v17, 16  ;;  %v2280_v25 = vshll.u32 %v7426_v17, 16  ;;  %v1213_v47 = vcombine.high %v1205_v29, %v1205_v29  ;;  %v7457_v13 = vrot.slane %v1205_v29, %v6968_v5 }
  0x65   : > { %v2243_v41 = vsel %vm2220_vm1, %v7208_v58, %v2242_v22  ;;  %9159 = vst [vmem:[#allocation30_spill] sm:$0xff] %v7445_v23  ;;  %v1973_v16 = vrot.slane %v1959_v2, %v6968_v5  ;;  %v1151_v3 = vcombine.high %v1149_v40, %v1149_v40  ;;  %v7450_v26 = vrot.slane %v1149_v40, %v6968_v5 }
  0x66   : > { %2296 = vrot.lane.b32.xlu0 %v2243_v41, %s6828_s24  ;;  %v7452_v58 = vrot.slane %v2277_v12, 7  ;;  %v1182_v22 = vcombine.high %v7445_v23, %v7445_v23  ;;  %v2171_v36 = vcombine.low %v7445_v23, %v1180_v52  ;;  %v7468_v40 = vrot.slane %v1213_v47, %v6968_v5 }
  0x67   : > { %9160 = vst [vmem:[#allocation31_spill] sm:$0xff] %v7450_v26  ;;  %v7460_v17 = vcombine.low %v1966_v27, %v1973_v16  ;;  %v7463_v41 = vrot.slane %v1151_v3, %v6968_v5  ;;  %v1181_v2 = vcombine.high %v7450_v26, %v7450_v26  ;;  %v2256_v52 = vshll.u32 %v7233_v24, 16 }
  0x68   : > { %v2282_v12 = vor.u32 %v2280_v25, %v7452_v58  ;;  %v2172_v10 = vcombine.low %v1182_v22, %v7450_v26  ;;  %v7473_v29 = vrot.slane %v2171_v36, %v6968_v5  ;;  %v3347_v22 = vcombine.low %v7420_v1, %v7186_v20 }
  0x69   : > { %9161 = vst [vmem:[#allocation32_spill] sm:$0xff] %v7460_v17  ;;  %2332 = vrot.lane.b32.xlu1 %v7460_v17, %s6827_s28  ;;  %v2245_v27 = vshrl.u32 %v7460_v17, 16  ;;  %v2248_v16 = vshll.u32 %v7460_v17, 16  ;;  %v1183_v47 = vcombine.high %v7463_v41, %v7463_v41  ;;  %v2173_v3 = vcombine.low %v7463_v41, %v1181_v2 }
  0x6a   : > { %v2283_v25 = vsel %vm2220_vm1, %v7350_v21, %v2282_v12  ;;  %v7488_v36 = vrot.slane %v2172_v10, %v6968_v5  ;;  %v2616_v26 = vcombine.low %v7457_v13, %v7468_v40  ;;  %v2258_v2 = vor.u32 %v2256_v52, %v7257_v6 }
  0x6b   : > { %2306 = vrot.lane.b32.xlu0 %v2283_v25, %s6828_s24  ;;  %v2247_v17 = vrot.slane %v2245_v27, 7  ;;  %v2174_v23 = vcombine.low %v1183_v47, %v6994_v15  ;;  %v7495_v48 = vrot.slane %v2173_v3, %v6968_v5  ;;  %v2318_v20 = vrot.slane %v7457_v13, %v6968_v5 }
  0x6c   : > { %v2203_v21 = vcombine.low %v7473_v29, %v7488_v36  ;;  %v1374_v10 = vcombine.low %v7052_v45, %v7071_v54  ;;  %v7510_v47 = vrot.slane %v2616_v26, %v6968_v5  ;;  %v6314_v25 = vcombine.high %v7052_v45, %v7071_v54 }
  0x6d   : > { %v2250_v12 = vor.u32 %v2248_v16, %v2247_v17  ;;  %v7507_v27 = vrot.slane %v2174_v23, %v6968_v5  ;;  %v7516_v3 = vsel %vm2220_vm1, %v2247_v17, %v2258_v2  ;;  %v1376_v16 = vcombine.low %v7068_v53, %v7090_v61 }
  0x6e   : > { %v2211_v52 = vrot.slane %v2203_v21, %v6968_v5  ;;  %v2325_v1 = vrot.slane %v2318_v20, %v6968_v5  ;;  %v7528_v6 = vrot.slane %v1374_v10, %v6968_v5  ;;  %v7532_v17 = vrot.slane %v6314_v25, %v6968_v5 }
  0x6f   : > { %v2251_v23 = vsel %vm2220_vm1, %v7414_v0, %v2250_v12  ;;  %v2204_v26 = vcombine.low %v7495_v48, %v7507_v27  ;;  %v7535_v45 = vrot.slane %v1376_v16, %v6968_v5  ;;  %v6315_v54 = vcombine.high %v7068_v53, %v7090_v61 }
  0x70   : > { %2298 = vrot.lane.b32.xlu0 %v2251_v23, %s6828_s24  ;;  %v3329_v0 = vcombine.low %v7320_v4, %v7323_v18  ;;  %v3330_v21 = vcombine.low %v7327_v43, %v7383_v50  ;;  %v865_v20 = vcombine.high %v7270_v8, %v7270_v8  ;;  %v866_v10 = vcombine.high %v7287_v28, %v7287_v28 }
  0x71   : > { %v2218_v2 = vrot.slane %v2204_v26, %v6968_v5  ;;  %v7549_v12 = vrot.slane %v6315_v54, %v6968_v5  ;;  %v2679_v53 = vcombine.low %v7528_v6, %v7532_v17  ;;  %v867_v4 = vcombine.high %v7290_v19, %v7290_v19 }
  0x72   : > { %v3337_v61 = vrot.slane %v3329_v0, %v6968_v5  ;;  %v3344_v43 = vrot.slane %v3330_v21, %v6968_v5  ;;  %v1423_v50 = vcombine.low %v6994_v15, %v7270_v8  ;;  %v1424_v25 = vcombine.low %v7290_v19, %v865_v20 }
  0x73   : > { %v7556_v18 = vcombine.low %v2211_v52, %v2218_v2  ;;  %v2680_v16 = vcombine.low %v7535_v45, %v7549_v12  ;;  %v2687_v23 = vrot.slane %v2679_v53, %v6968_v5  ;;  %v1425_v26 = vcombine.low %v867_v4, %v7287_v28 }
  0x74   : > { %v1471_v54 = vcombine.low %v7294_v44, %v866_v10  ;;  %v7571_v2 = vcombine.low %v3337_v61, %v3344_v43  ;;  %v7574_v8 = vrot.slane %v1423_v50, %v6968_v5  ;;  %v7578_v21 = vrot.slane %v1424_v25, %v6968_v5 }
  0x75   : > { %9162 = vst [vmem:[#allocation33_spill] sm:$0xff] %v7556_v18  ;;  %2342 = vrot.lane.b32.xlu1 %v7556_v18, %s6827_s28  ;;  %v2285_v52 = vshrl.u32 %v7556_v18, 16  ;;  %v2288_v0 = vshll.u32 %v7556_v18, 16  ;;  %v2694_v19 = vrot.slane %v2680_v16, %v6968_v5  ;;  %v7581_v28 = vrot.slane %v1425_v26, %v6968_v5 }
  0x76   : > { %v7584_v20 = vrot.slane %v1471_v54, %v6968_v5  ;;  %v3523_v53 = vshrl.u32 %v7571_v2, 16  ;;  %v3526_v61 = vshll.u32 %v7571_v2, 16  ;;  %v9164_v4 = vcombine.low %v7391_v7, %v7410_v32 }
  0x77   : > { %v2287_v10 = vrot.slane %v2285_v52, 7  ;;  %v2695_v50 = vcombine.low %v2687_v23, %v2694_v19  ;;  %v2696_v25 = vcombine.low %v7574_v8, %v7578_v21  ;;  %v3361_v26 = vrot.slane %v3347_v22, %v6968_v5 }
  0x78   : > { %9163 = vst [vmem:[#allocation34_spill] sm:$0xff] %v7584_v20  ;;  %v3354_v43 = vrot.slane %v9164_v4, %v6968_v5  ;;  %v2697_v16 = vcombine.low %v7581_v28, %v7584_v20  ;;  %v7599_v52 = vrot.slane %v3523_v53, 7  ;;  %v868_v18 = vcombine.high %v7294_v44, %v7294_v44 }
  0x79   : > { %v2290_v54 = vor.u32 %v2288_v0, %v2287_v10  ;;  %2334 = vrot.lane.b32.xlu1 %v7233_v24, %s6827_s28  ;;  %v1473_v7 = vcombine.low %v7354_v63, %v7368_v37  ;;  %v2873_v23 = vshrl.u32 %v2695_v50, 16  ;;  %v2704_v19 = vrot.slane %v2696_v25, %v6968_v5 }
  0x7a   : > { %v2711_v22 = vrot.slane %v2697_v16, %v6968_v5  ;;  %v2876_v4 = vshll.u32 %v2695_v50, 16  ;;  %v7611_v53 = vcombine.low %v3354_v43, %v3361_v26  ;;  %v1472_v24 = vcombine.low %v868_v18, %v6994_v15 }
  0x7b   : > { %v2291_v0 = vsel %vm2220_vm1, %v7452_v58, %v2290_v54  ;;  %v3528_v44 = vor.u32 %v3526_v61, %v7599_v52  ;;  %v6316_v32 = vcombine.high %v7354_v63, %v7368_v37  ;;  %v7621_v25 = vrot.slane %v1473_v7, %v6968_v5 }
  0x7c   : > { %2308 = vrot.lane.b32.xlu0 %v2291_v0, %s6828_s24  ;;  %v7616_v20 = vcombine.low %v2704_v19, %v2711_v22  ;;  %v2875_v58 = vrot.slane %v2873_v23, 7  ;;  %v3530_v43 = vshrl.u32 %v7611_v53, 16  ;;  %v7626_v16 = vrot.slane %v1472_v24, %v6968_v5 }
  0x7d   : > { %2344 = vrot.lane.b32.xlu1 %v2325_v1, %s6827_s28  ;;  %v1520_v18 = vcombine.low %v7144_v46, %v7158_v60  ;;  %v3533_v63 = vshll.u32 %v7611_v53, 16  ;;  %v7634_v37 = vrot.slane %v6316_v32, %v6968_v5  ;;  %v3363_v7 = vcombine.low %v7195_v34, %v7176_v11 }
  0x7e   : > { %9165 = vst [vmem:[#allocation35_spill] sm:$0xff] %v7616_v20  ;;  %v2880_v61 = vshrl.u32 %v7616_v20, 16  ;;  %v2883_v26 = vshll.u32 %v7616_v20, 16  ;;  %v3532_v54 = vrot.slane %v3530_v43, 7  ;;  %v2713_v24 = vcombine.low %v7626_v16, %v7621_v25 }
  0x7f   : > { %v7637_v1 = vrot.slane %v1520_v18, %v6968_v5  ;;  %v9167_v32 = vcombine.low %v7087_v59, %v7078_v55  ;;  %v991_v22 = vcombine.high %v7023_v35, %v7023_v35  ;;  %v993_v0 = vcombine.high %v7048_v42, %v7048_v42 }
  0x80   : > { %2300 = vrot.lane.b32.xlu0 %v7516_v3, %s6828_s24  ;;  %v7645_v23 = vrot.slane %v2880_v61, 7  ;;  %v2878_v43 = vor.u32 %v2876_v4, %v2875_v58  ;;  %v2721_v34 = vrot.slane %v2713_v24, %v6968_v5  ;;  %v3371_v3 = vrot.slane %v3363_v7, %v6968_v5 }
  0x81   : > { %9166 = vst [vmem:[#allocation36_spill] sm:$0xff] %v7637_v1  ;;  %v3378_v19 = vrot.slane %v9167_v32, %v6968_v5  ;;  %2977 = vrot.lane.b32.xlu1 %v2695_v50, %s6827_s28  ;;  %v2714_v11 = vcombine.low %v7634_v37, %v7637_v1  ;;  %v6317_v55 = vcombine.high %v7144_v46, %v7158_v60 }
  0x82   : > { %v2885_v18 = vor.u32 %v2883_v26, %v7645_v23  ;;  %v1522_v59 = vcombine.low %v6994_v15, %v7023_v35  ;;  %v1523_v61 = vcombine.low %v7048_v42, %v991_v22  ;;  %v3535_v32 = vor.u32 %v3533_v63, %v3532_v54 }
  0x83   : > { %v2728_v50 = vrot.slane %v2714_v11, %v6968_v5  ;;  %v7667_v4 = vcombine.low %v3371_v3, %v3378_v19  ;;  %v1569_v1 = vcombine.low %v993_v0, %v7017_v31  ;;  %v7673_v26 = vrot.slane %v6317_v55, %v6968_v5 }
  0x84   : > { %2310 = vrot.lane.b32.xlu0 %v2287_v10, %s6828_s24  ;;  %v2886_v24 = vsel %vm2220_vm1, %v2875_v58, %v2885_v18  ;;  %v7676_v46 = vrot.slane %v1522_v59, %v6968_v5  ;;  %v7679_v35 = vrot.slane %v1523_v61, %v6968_v5  ;;  %v9171_v7 = vcombine.low %v7081_v56, %v7060_v49 }
  0x85   : > { %3593 = vrot.lane.b32.xlu1 %v3528_v44, %s6828_s24  ;;  %v7682_v42 = vcombine.low %v2721_v34, %v2728_v50  ;;  %v3538_v60 = vshrl.u32 %v7667_v4, 16  ;;  %v3541_v63 = vshll.u32 %v7667_v4, 16  ;;  %v7687_v10 = vrot.slane %v1569_v1, %v6968_v5 }
  0x86   : > { %9168 = vst [vmem:[#allocation37_spill] sm:$0xff] %v7676_v46  ;;  %9169 = vst [vmem:[#allocation38_spill] sm:$0xff] %v7679_v35  ;;  %v2730_v58 = vcombine.low %v7673_v26, %v7676_v46  ;;  %v3388_v19 = vrot.slane %v9171_v7, %v6968_v5  ;;  %v9172_v44 = vcombine.low %v7084_v57, %v7239_v30 }
  0x87   : > { %9170 = vst [vmem:[#allocation39_spill] sm:$0xff] %v7682_v42  ;;  %v992_v0 = vcombine.high %v7017_v31, %v7017_v31  ;;  %v2888_v11 = vshrl.u32 %v7682_v42, 16  ;;  %v2891_v1 = vshll.u32 %v7682_v42, 16  ;;  %v3540_v34 = vrot.slane %v3538_v60, 7 }
  0x88   : > { %v3395_v22 = vrot.slane %v9172_v44, %v6968_v5  ;;  %v2731_v3 = vcombine.low %v7679_v35, %v7687_v10  ;;  %2943 = vrot.lane.b32.xlu0 %v2878_v43, %s6828_s24  ;;  %v2738_v49 = vrot.slane %v2730_v58, %v6968_v5  ;;  %v994_v57 = vcombine.high %v7037_v38, %v7037_v38 }
  0x89   : > { %v1570_v30 = vcombine.low %v7037_v38, %v992_v0  ;;  %3613 = vrot.lane.b32.xlu1 %v7571_v2, %s6827_s28  ;;  %v7714_v31 = vrot.slane %v2888_v11, 7  ;;  %v3543_v18 = vor.u32 %v3541_v63, %v3540_v34  ;;  %v1572_v43 = vcombine.low %v7020_v33, %v7040_v39  ;;  %v9175_v0 = vld [vmem:[#allocation20_spill] sm:$0xff] }
  0x8a   : > { %v7707_v56 = vcombine.low %v3388_v19, %v3395_v22  ;;  %v2745_v55 = vrot.slane %v2731_v3, %v6968_v5  ;;  %v1571_v50 = vcombine.low %v994_v57, %v6994_v15  ;;  %v3536_v38 = vsel %vm2220_vm1, %v7599_v52, %v3535_v32  ;;  %v9178_v57 = vld [vmem:[#allocation16_spill] sm:$0xff] }
  0x8b   : > { %v7723_v60 = vrot.slane %v1570_v30, %v6968_v5  ;;  %v7728_v2 = vsel %vm2220_vm1, %v3532_v54, %v3543_v18  ;;  %v7733_v58 = vrot.slane %v1572_v43, %v6968_v5  ;;  %v6318_v44 = vcombine.high %v7020_v33, %v7040_v39  ;;  %v9179_v30 = vld [vmem:[#allocation15_spill] sm:$0xff] }
  0x8c   : > { %v3546_v59 = vshrl.u32 %v7707_v56, 16  ;;  %v3549_v61 = vshll.u32 %v7707_v56, 16  ;;  %v7730_v63 = vcombine.low %v2738_v49, %v2745_v55  ;;  %2945 = vrot.lane.b32.xlu0 %v2886_v24, %s6828_s24  ;;  %v7737_v19 = vrot.slane %v1571_v50, %v6968_v5 }
  0x8d   : > { %v9174_v52 = vcombine.low %v7249_v51, %v7261_v9  ;;  %3615 = vrot.lane.b32.xlu1 %v7611_v53, %s6827_s28  ;;  %v2893_v32 = vor.u32 %v2891_v1, %v7714_v31  ;;  %v9176_v11 = vcombine.low %v7267_v14, %v9175_v0  ;;  %v7755_v39 = vrot.slane %v6318_v44, %v6968_v5  ;;  %v9177_v9 = vld [vmem:[#allocation17_spill] sm:$0xff] }
  0x8e   : > { %9173 = vst [vmem:[#allocation40_spill] sm:$0xff] %v7730_v63  ;;  %v3548_v7 = vrot.slane %v3546_v59, 7  ;;  %v2896_v22 = vshrl.u32 %v7730_v63, 16  ;;  %v2899_v24 = vshll.u32 %v7730_v63, 16  ;;  %v2747_v51 = vcombine.low %v7723_v60, %v7737_v19 }
  0x8f   : > { %v3405_v54 = vrot.slane %v9174_v52, %v6968_v5  ;;  %v3412_v3 = vrot.slane %v9176_v11, %v6968_v5  ;;  %v1117_v53 = vcombine.high %v9177_v9, %v9177_v9  ;;  %v1619_v18 = vcombine.low %v9179_v30, %v9178_v57  ;;  %v9180_v11 = vld [vmem:[#allocation19_spill] sm:$0xff] }
  0x90   : > { %v3551_v33 = vor.u32 %v3549_v61, %v3548_v7  ;;  %v7761_v1 = vrot.slane %v2896_v22, 7  ;;  %v6319_v14 = vcombine.high %v9179_v30, %v9178_v57  ;;  %2979 = vrot.lane.b32.xlu0 %v7616_v20, %s6827_s28  ;;  %v2748_v43 = vcombine.low %v7733_v58, %v7755_v39 }
  0x91   : > { %v7763_v49 = vcombine.low %v3405_v54, %v3412_v3  ;;  %v2755_v59 = vrot.slane %v2747_v51, %v6968_v5  ;;  %v1621_v61 = vcombine.low %v6994_v15, %v9177_v9  ;;  %v2894_v50 = vsel %vm2220_vm1, %v7645_v23, %v2893_v32  ;;  %2981 = vrot.lane.b32.xlu1 %v7682_v42, %s6827_s28  ;;  %v9182_v51 = vld [vmem:[#allocation27_spill] sm:$0xff] }
  0x92   : > { %v7772_v55 = vsel %vm2220_vm1, %v3540_v34, %v3551_v33  ;;  %v7786_v34 = vrot.slane %v1619_v18, %v6968_v5  ;;  %v2762_v54 = vrot.slane %v2748_v43, %v6968_v5  ;;  %v7790_v22 = vrot.slane %v6319_v14, %v6968_v5  ;;  %v9181_v33 = vld [vmem:[#allocation26_spill] sm:$0xff] }
  0x93   : > { %v3554_v44 = vshrl.u32 %v7763_v49, 16  ;;  %v3557_v52 = vshll.u32 %v7763_v49, 16  ;;  %v7793_v0 = vrot.slane %v1621_v61, %v6968_v5  ;;  %v1667_v23 = vcombine.low %v9180_v11, %v1117_v53  ;;  %v9186_v53 = vld [vmem:[#allocation22_spill] sm:$0xff] }
  0x94   : > { %v2901_v32 = vor.u32 %v2899_v24, %v7761_v1  ;;  %v9183_v9 = vcombine.low %v9181_v33, %v9182_v51  ;;  %v9184_v30 = vcombine.low %v7364_v62, %v7473_v29  ;;  %3595 = vrot.lane.b32.xlu0 %v3536_v38, %s6828_s24  ;;  %v7806_v14 = vcombine.low %v2755_v59, %v2762_v54  ;;  %v9187_v59 = vld [vmem:[#allocation24_spill] sm:$0xff] }
  0x95   : > { %v3556_v3 = vrot.slane %v3554_v44, 7  ;;  %v7809_v43 = vrot.slane %v1667_v23, %v6968_v5  ;;  %v2764_v24 = vcombine.low %v7786_v34, %v7790_v22  ;;  %v1118_v61 = vcombine.high %v9186_v53, %v9186_v53  ;;  %3617 = vrot.lane.b32.xlu1 %v7667_v4, %s6827_s28 }
  0x96   : > { %v3422_v57 = vrot.slane %v9183_v9, %v6968_v5  ;;  %v3429_v18 = vrot.slane %v9184_v30, %v6968_v5  ;;  %9185 = vst [vmem:[#allocation20_spill] sm:$0xff] %v7806_v14  ;;  %v1119_v38 = vcombine.high %v9180_v11, %v9180_v11  ;;  %v1120_v44 = vcombine.high %v9187_v59, %v9187_v59 }
  0x97   : > { %v3559_v62 = vor.u32 %v3557_v52, %v3556_v3  ;;  %v2904_v54 = vshrl.u32 %v7806_v14, 16  ;;  %v2907_v23 = vshll.u32 %v7806_v14, 16  ;;  %v2765_v33 = vcombine.low %v7793_v0, %v7809_v43 }
  0x98   : > { %v7817_v29 = vcombine.low %v3422_v57, %v3429_v18  ;;  %v2772_v51 = vrot.slane %v2764_v24, %v6968_v5  ;;  %v1668_v11 = vcombine.low %v1119_v38, %v9186_v53  ;;  %2947 = vrot.lane.b32.xlu0 %v2894_v50, %s6828_s24  ;;  %v1670_v18 = vcombine.low %v1120_v44, %v6994_v15  ;;  %v9189_v38 = vld [vmem:[#allocation23_spill] sm:$0xff] }
  0x99   : > { %v7829_v4 = vsel %vm2220_vm1, %v3548_v7, %v3559_v62  ;;  %v7840_v57 = vrot.slane %v2904_v54, 7  ;;  %v2779_v30 = vrot.slane %v2765_v33, %v6968_v5  ;;  %v1669_v7 = vcombine.low %v9187_v59, %v1118_v61  ;;  %2983 = vrot.lane.b32.xlu1 %v7730_v63, %s6827_s28  ;;  %v9188_v62 = vld [vmem:[#allocation30_spill] sm:$0xff] }
  0x9a   : > { %v3562_v52 = vshrl.u32 %v7817_v29, 16  ;;  %v3565_v9 = vshll.u32 %v7817_v29, 16  ;;  %v7848_v53 = vrot.slane %v1668_v11, %v6968_v5  ;;  %v1716_v42 = vcombine.low %v9189_v38, %v9188_v62 }
  0x9b   : > { %v9190_v50 = vcombine.low %v7488_v36, %v7495_v48  ;;  %v2902_v61 = vsel %vm2220_vm1, %v7714_v31, %v2901_v32  ;;  %v7858_v59 = vcombine.low %v2772_v51, %v2779_v30  ;;  %v7861_v44 = vrot.slane %v1669_v7, %v6968_v5 }
  0x9c   : > { %v3564_v24 = vrot.slane %v3562_v52, 7  ;;  %v7864_v33 = vrot.slane %v1670_v18, %v6968_v5  ;;  %v7872_v48 = vrot.slane %v1716_v42, %v6968_v5  ;;  %v9192_v36 = vcombine.low %v7507_v27, %v7510_v47  ;;  %3597 = vrot.lane.b32.xlu0 %v7728_v2, %s6828_s24  ;;  %v9193_v2 = vld [vmem:[#allocation31_spill] sm:$0xff] }
  0x9d   : > { %v3439_v54 = vrot.slane %v9190_v50, %v6968_v5  ;;  %v6320_v32 = vcombine.high %v9189_v38, %v9188_v62  ;;  %v2909_v51 = vor.u32 %v2907_v23, %v7840_v57  ;;  %v2912_v11 = vshrl.u32 %v7858_v59, 16  ;;  %3619 = vrot.lane.b32.xlu1 %v7707_v56, %s6827_s28  ;;  %v6446_v18 = vld [vmem:[%s508_s15] sm:$0xff]  }
  0x9e   : > { %v3567_v52 = vor.u32 %v3565_v9, %v3564_v24  ;;  %v3446_v31 = vrot.slane %v9192_v36, %v6968_v5  ;;  %v2915_v9 = vshll.u32 %v7858_v59, 16  ;;  %v2781_v42 = vcombine.low %v7848_v53, %v7861_v44 }
  0x9f   : > { %v2782_v30 = vcombine.low %v7864_v33, %v7872_v48  ;;  %v1718_v23 = vcombine.low %v9193_v2, %v7463_v41  ;;  %v7898_v62 = vrot.slane %v2912_v11, 7  ;;  %v6321_v50 = vcombine.high %v9193_v2, %v7463_v41 }
  0xa0   : > { %v7890_v27 = vsel %vm2220_vm1, %v3556_v3, %v3567_v52  ;;  %v7894_v7 = vcombine.low %v3439_v54, %v3446_v31  ;;  %v2789_v38 = vrot.slane %v2781_v42, %v6968_v5  ;;  %v7904_v56 = vrot.slane %v6320_v32, %v6968_v5  ;;  %2949 = vrot.lane.b32.xlu0 %v2902_v61, %s6828_s24 }
  0xa1   : > { %v2796_v3 = vrot.slane %v2782_v30, %v6968_v5  ;;  %v7912_v36 = vrot.slane %v1718_v23, %v6968_v5  ;;  %v2910_v31 = vsel %vm2220_vm1, %v7761_v1, %v2909_v51  ;;  %v7918_v41 = vrot.slane %v6321_v50, %v6968_v5  ;;  %2985 = vrot.lane.b32.xlu1 %v7806_v14, %s6827_s28  ;;  %v9195_v50 = vld [vmem:[#allocation28_spill] sm:$0xff] }
  0xa2   : > { %v3570_v54 = vshrl.u32 %v7894_v7, 16  ;;  %v3573_v52 = vshll.u32 %v7894_v7, 16  ;;  %v2798_v32 = vcombine.low %v6994_v15, %v7457_v13  ;;  %v6447_v11 = vunpack.c.l.bf16 %v6446_v18 }
  0xa3   : > { %v7924_v42 = vcombine.low %v2789_v38, %v2796_v3  ;;  %v2806_v61 = vcombine.low %v7904_v56, %v7912_v36  ;;  %v6448_v2 = vunpack.c.h.bf16 %v6446_v18  ;;  %v2917_v1 = vor.u32 %v2915_v9, %v7898_v62 }
  0xa4   : > { %v7926_v30 = vrot.slane %v3570_v54, 7  ;;  %v2805_v51 = vrot.slane %v2798_v32, %v6968_v5  ;;  %v658_v23 = vstv %s657_s16  ;;  %v6312_v63 = vcombine.low %v9195_v50, %v9195_v50  ;;  %3599 = vrot.lane.b32.xlu0 %v7772_v55, %s6828_s24  ;;  %s9220_s16 = sshll.u32 %s6971_s19, 2  ;;  %s8970_s19 = sand.u32 1, %s6799_s10  }
  0xa5   : > { %9194 = vst [vmem:[#allocation17_spill] sm:$0xff] %v7924_v42  ;;  %v2920_v20 = vshrl.u32 %v7924_v42, 16  ;;  %v2923_v14 = vshll.u32 %v7924_v42, 16  ;;  %v2814_v3 = vrot.slane %v2806_v61, %v6968_v5  ;;  %vm659_vm2 = vcmp.eq.s32.totalorder %v658_v23, 1  ;;  %3621 = vrot.lane.b32.xlu1 %v7763_v49, %s6827_s28 }
  0xa6   : > { %v3575_v38 = vor.u32 %v3573_v52, %v7926_v30  ;;  %v2807_v18 = vcombine.low %v7918_v41, %v2805_v51  ;;  %v1212_v9 = vrot.slane %v6312_v63, %v6968_v5  ;;  %v6341_v54 = vcombine.high %v7457_v13, %v7468_v40 }
  0xa7   : > { %v7946_v32 = vrot.slane %v2920_v20, 7  ;;  %v669_v61 = vsel %vm659_vm2, %v6447_v11, 0.0  ;;  %v670_v50 = vsel %vm659_vm2, %v6448_v2, 0.0  ;;  %v1243_v63 = vcombine.high %v7457_v13, %v7457_v13 }
  0xa8   : > { %v7949_v52 = vsel %vm2220_vm1, %v3564_v24, %v3575_v38  ;;  %v2821_v55 = vrot.slane %v2807_v18, %v6968_v5  ;;  %v672_v46 = vpack.c.bf16 %v670_v50, %v669_v61  ;;  %v1214_v51 = vcombine.high %v1212_v9, %v1212_v9  ;;  %2951 = vrot.lane.b32.xlu0 %v2910_v31, %s6828_s24 }
  0xa9   : > { %v1228_v23 = vrot.slane %v1212_v9, %v6968_v5  ;;  %v1245_v35 = vcombine.high %v7468_v40, %v7468_v40  ;;  %v2918_v2 = vsel %vm2220_vm1, %v7840_v57, %v2917_v1  ;;  %2987 = vrot.lane.b32.xlu1 %v7858_v59, %s6827_s28  ;;  %v2823_v13 = vcombine.low %v7468_v40, %v1243_v63 }
  0xaa   : > { %v7958_v20 = vcombine.low %v2814_v3, %v2821_v55  ;;  %v1242_v49 = vrot.slane %v1214_v51, %v6968_v5  ;;  %v1268_v24 = vrot.slane %v672_v46, %v6968_v5  ;;  %v6313_v18 = vpack.c.bf16 %v670_v50, %v670_v50 }
  0xab   : > { %v1244_v11 = vcombine.high %v1228_v23, %v1228_v23  ;;  %v2824_v38 = vcombine.low %v1245_v35, %v1228_v23  ;;  %v2925_v9 = vor.u32 %v2923_v14, %v7946_v32  ;;  %v7972_v61 = vrot.slane %v6341_v54, %v6968_v5 }
  0xac   : > { %9196 = vst [vmem:[#allocation16_spill] sm:$0xff] %v7958_v20  ;;  %v7969_v31 = vrot.slane %v1268_v24, %v6968_v5  ;;  %v2618_v3 = vcombine.low %v1228_v23, %v1242_v49  ;;  %v6342_v46 = vcombine.high %v1228_v23, %v1242_v49  ;;  %v1246_v55 = vcombine.high %v1242_v49, %v1242_v49 }
  0xad   : > { %v2825_v51 = vcombine.low %v1242_v49, %v1244_v11  ;;  %v2833_v57 = vrot.slane %v2823_v13, %v6968_v5  ;;  %3601 = vrot.lane.b32.xlu0 %v7829_v4, %s6828_s24  ;;  %v2928_v40 = vshrl.u32 %v7958_v20, 16  ;;  %v2840_v1 = vrot.slane %v2824_v38, %v6968_v5  ;;  %3623 = vrot.lane.b32.xlu1 %v7817_v29, %s6827_s28 }
  0xae   : > { %v7979_v35 = vrot.slane %v2618_v3, %v6968_v5  ;;  %v3448_v14 = vcombine.low %v6994_v15, %v7969_v31  ;;  %v7987_v54 = vrot.slane %v6342_v46, %v6968_v5  ;;  %v2826_v50 = vcombine.low %v1246_v55, %v6994_v15 }
  0xaf   : > { %v2847_v4 = vrot.slane %v2825_v51, %v6968_v5  ;;  %v1275_v23 = vrot.slane %v6313_v18, %v6968_v5  ;;  %v2931_v63 = vshll.u32 %v7958_v20, 16  ;;  %v2855_v13 = vcombine.low %v2833_v57, %v2840_v1 }
  0xb0   : > { %v3455_v49 = vrot.slane %v3448_v14, %v6968_v5  ;;  %v3456_v11 = vcombine.low %v7972_v61, %v7979_v35  ;;  %v2854_v38 = vrot.slane %v2826_v50, %v6968_v5  ;;  %v1276_v29 = vcombine.high %v1268_v24, %v1268_v24 }
  0xb1   : > { %v1277_v3 = vcombine.high %v1275_v23, %v1275_v23  ;;  %v7998_v46 = vrot.slane %v1275_v23, %v6968_v5  ;;  %2953 = vrot.lane.b32.xlu0 %v2918_v2, %s6828_s24  ;;  %v8001_v55 = vrot.slane %v2928_v40, 7  ;;  %v2863_v14 = vrot.slane %v2855_v13, %v6968_v5  ;;  %2989 = vrot.lane.b32.xlu1 %v7924_v42, %s6827_s28 }
  0xb2   : > { %v3457_v18 = vcombine.low %v7987_v54, %v3455_v49  ;;  %v3464_v51 = vrot.slane %v3456_v11, %v6968_v5  ;;  %v2856_v57 = vcombine.low %v2847_v4, %v2854_v38  ;;  %v8009_v24 = vrot.slane %v1276_v29, %v6968_v5 }
  0xb3   : > { %v8012_v1 = vrot.slane %v1277_v3, %v6968_v5  ;;  %v1306_v2 = vcombine.high %v7969_v31, %v7969_v31  ;;  %v2926_v40 = vsel %vm2220_vm1, %v7898_v62, %v2925_v9  ;;  %v1307_v23 = vcombine.high %v7998_v46, %v7998_v46 }
  0xb4   : > { %v3471_v50 = vrot.slane %v3457_v18, %v6968_v5  ;;  %v2870_v49 = vrot.slane %v2856_v57, %v6968_v5  ;;  %v1308_v4 = vcombine.high %v8009_v24, %v8009_v24  ;;  %v2933_v62 = vor.u32 %v2931_v63, %v8001_v55 }
  0xb5   : > { %v1309_v11 = vcombine.high %v8012_v1, %v8012_v1  ;;  %v3473_v13 = vcombine.low %v8009_v24, %v1306_v2  ;;  %3603 = vrot.lane.b32.xlu0 %v7890_v27, %s6828_s24  ;;  %v3475_v38 = vcombine.low %v8012_v1, %v1307_v23  ;;  %v2969_v29 = vrot.slane %v7969_v31, %v6968_v5 }
  0xb6   : > { %v3472_v9 = vcombine.low %v3464_v51, %v3471_v50  ;;  %3625 = vrot.lane.b32.xlu1 %v7894_v7, %s6827_s28  ;;  %v8035_v3 = vcombine.low %v2863_v14, %v2870_v49  ;;  %v3474_v18 = vcombine.low %v1308_v4, %v7998_v46  ;;  %v8041_v51 = vpop.permute.xlu1 %2336  ;;  %v1601_v50 = vcombine.low %v7687_v10, %v7723_v60 }
  0xb7   : > { %v3476_v57 = vcombine.low %v1309_v11, %v6994_v15  ;;  %v3483_v2 = vrot.slane %v3473_v13, %v6968_v5  ;;  %v3497_v63 = vrot.slane %v3475_v38, %v6968_v5  ;;  %v2934_v14 = vsel %vm2220_vm1, %v7946_v32, %v2933_v62  ;;  %v9197_v38 = vld [vmem:[#allocation13_spill] sm:$0xff] }
  0xb8   : > { %v3578_v27 = vshrl.u32 %v3472_v9, 16  ;;  %v3581_v42 = vshll.u32 %v3472_v9, 16  ;;  %v3490_v23 = vrot.slane %v3474_v18, %v6968_v5  ;;  %v2936_v4 = vshrl.u32 %v8035_v3, 16 }
  0xb9   : > { %v3504_v7 = vrot.slane %v3476_v57, %v6968_v5  ;;  %2955 = vrot.lane.b32.xlu0 %v2926_v40, %s6828_s24  ;;  %v8054_v11 = vrot.slane %v2969_v29, %v6968_v5  ;;  %v1602_v13 = vcombine.low %v7737_v19, %v7733_v58  ;;  %v756_v40 = vcombine.high %v9197_v38, %v9197_v38  ;;  %v9198_v29 = vld [vmem:[#allocation11_spill] sm:$0xff] }
  0xba   : > { %v8050_v49 = vrot.slane %v3578_v27, 7  ;;  %2991 = vrot.lane.b32.xlu1 %v7958_v20, %s6827_s28  ;;  %v3505_v10 = vcombine.low %v3483_v2, %v3490_v23  ;;  %v1609_v62 = vrot.slane %v1601_v50, %v6968_v5  ;;  %v1406_v18 = vcombine.low %v7532_v17, %v7535_v45  ;;  %v2329_v17 = vpop.permute.xlu1 %2328  ;;  %v9199_v45 = vld [vmem:[#allocation12_spill] sm:$0xff] }
  0xbb   : > { %v3506_v60 = vcombine.low %v3497_v63, %v3504_v7  ;;  %v754_v57 = vcombine.high %v9198_v29, %v9198_v29  ;;  %v2939_v27 = vshll.u32 %v8035_v3, 16  ;;  %v1373_v58 = vcombine.low %v756_v40, %v6994_v15  ;;  %v9200_v40 = vld [vmem:[#allocation10_spill] sm:$0xff] }
  0xbc   : > { %v3583_v32 = vor.u32 %v3581_v42, %v8050_v49  ;;  %v3513_v2 = vrot.slane %v3505_v10, %v6968_v5  ;;  %v8076_v42 = vrot.slane %v2936_v4, 7  ;;  %v755_v50 = vcombine.high %v9199_v45, %v9199_v45  ;;  %v8082_v10 = vpop.permute.xlu0 %2326 }
  0xbd   : > { %v3520_v63 = vrot.slane %v3506_v60, %v6968_v5  ;;  %3605 = vrot.lane.b32.xlu0 %v7949_v52, %s6828_s24  ;;  %v1327_v23 = vcombine.low %v9197_v38, %v754_v57  ;;  %v1616_v60 = vrot.slane %v1602_v13, %v6968_v5  ;;  %v1383_v52 = vrot.slane %v1373_v58, %v6968_v5 }
  0xbe   : > { %v3584_v19 = vsel %vm2220_vm1, %v7926_v30, %v3583_v32  ;;  %3627 = vrot.lane.b32.xlu1 %v3472_v9, %s6827_s28  ;;  %v753_v30 = vcombine.high %v9200_v40, %v9200_v40  ;;  %v1420_v4 = vrot.slane %v1406_v18, %v6968_v5  ;;  %v1326_v32 = vcombine.low %v755_v50, %v9198_v29 }
  0xbf   : > { %v3521_v7 = vcombine.low %v3513_v2, %v3520_v63  ;;  %v1355_v20 = vrot.slane %v1327_v23, %v6968_v5  ;;  %v1324_v38 = vcombine.low %v6994_v15, %v9200_v40  ;;  %v1405_v2 = vcombine.low %v1383_v52, %v7528_v6  ;;  %v6698_v63 = vld [vmem:[%s9069_s3] sm:$0x3f]  }
  0xc0   : > { %v1325_v13 = vcombine.low %v9199_v45, %v753_v30  ;;  %v2941_v18 = vor.u32 %v2939_v27, %v8076_v42  ;;  %v1348_v29 = vrot.slane %v1326_v32, %v6968_v5  ;;  %v1617_v23 = vcombine.low %v1609_v62, %v1616_v60 }
  0xc1   : > { %v3586_v9 = vshrl.u32 %v3521_v7, 16  ;;  %v3589_v57 = vshll.u32 %v3521_v7, 16  ;;  %2957 = vrot.lane.b32.xlu0 %v2934_v14, %s6828_s24  ;;  %v1334_v58 = vrot.slane %v1324_v38, %v6968_v5  ;;  %v1413_v6 = vrot.slane %v1405_v2, %v6968_v5  ;;  %v2295_v52 = vpop.permute.xlu1 %2294 }
  0xc2   : > { %2993 = vrot.lane.b32.xlu1 %v8035_v3, %s6827_s28  ;;  %v1341_v45 = vrot.slane %v1325_v13, %v6968_v5  ;;  %v1357_v14 = vcombine.low %v1348_v29, %v1355_v20  ;;  %v6829_v40 = vmov 0.0   ;;  %v1650_v20 = vcombine.low %v7755_v39, %v7786_v34 }
  0xc3   : > { %v8104_v50 = vrot.slane %v3586_v9, 7  ;;  %6479 = vmatprep.subr.bf16.mxu0 %v6829_v40  ;;  %6593 = vmatprep.subr.bf16.mxu1 %v6829_v40  ;;  %v2303_v30 = vpop.permute.xlu0 %2302  ;;  %v1421_v32 = vcombine.low %v1413_v6, %v1420_v4  ;;  %v2509_v9 = vsel %vm2507_vm5, %v6698_v63, 0  ;;  %v1651_v60 = vcombine.low %v7790_v22, %v7793_v0 }
  0xc4   : > { %v1356_v38 = vcombine.low %v1334_v58, %v1341_v45  ;;  %v1371_v62 = vrot.slane %v1357_v14, %v6968_v5  ;;  %6480 = vmatpush3.bf16.msra.mxu0 %v2509_v9  ;;  %v2942_v2 = vsel %vm2220_vm1, %v8001_v55, %v2941_v18  ;;  %v2364_v13 = vsel %vm2346_vm3, %v1617_v23, %v2303_v30 }
  0xc5   : > { %v3591_v27 = vor.u32 %v3589_v57, %v8104_v50  ;;  %3607 = vrot.lane.b32.xlu0 %v3584_v19, %s6828_s24  ;;  %v2352_v57 = vsel %vm2346_vm3, %v1421_v32, %v2295_v52  ;;  %6594 = vmatpush3.bf16.msra.mxu1 %v2509_v9  ;;  %v1658_v0 = vrot.slane %v1650_v20, %v6968_v5 }
  0xc6   : > { %3629 = vrot.lane.b32.xlu1 %v3521_v7, %s6827_s28  ;;  %v1364_v19 = vrot.slane %v1356_v38, %v6968_v5  ;;  %6481 = vmatprep.mubr.msk.bf16.mxu0 %vm6830_vm6, %v6829_v40  ;;  %v8133_v22 = vsel %vm2377_vm4, %v2352_v57, %v2329_v17  ;;  %v1665_v55 = vrot.slane %v1651_v60, %v6968_v5  ;;  %v6700_v60 = vld [vmem:[%s9069_s3 + $0x8] sm:$0x3f]  }
  0xc7   : > { %v3592_v4 = vsel %vm2220_vm1, %v8050_v49, %v3591_v27  ;;  %v2293_v39 = vpop.permute.xlu0 %2292  ;;  %6501 = vmatprep.mubr.msk.bf16.mxu1 %vm6830_vm6, %v6829_v40  ;;  %6555 = vmatprep.subr.bf16.mxu0 %v6829_v40  ;;  %v2389_v49 = vsel %vm2377_vm4, %v2364_v13, %v8041_v51  ;;  %v1699_v63 = vcombine.low %v7809_v43, %v7848_v53  ;;  %v2414_v58 = vshll.u32 %v8133_v22, 16 }
  0xc8   : > { %v1372_v34 = vcombine.low %v1364_v19, %v1371_v62  ;;  %6517 = vmatprep.subr.bf16.mxu1 %v6829_v40  ;;  %v1700_v17 = vcombine.low %v7861_v44, %v7864_v33  ;;  %v1454_v29 = vcombine.low %v7549_v12, %v7574_v8  ;;  %v2442_v51 = vshll.u32 %v2389_v49, 16  ;;  %v6699_v12 = vld [vmem:[%s9069_s3 + $0x10] sm:$0x3f]  }
  0xc9   : > { %2959 = vrot.lane.b32.xlu0 %v2942_v2, %s6828_s24  ;;  %v8153_v6 = vrot.slane %v1699_v63, %v6968_v5  ;;  %v1666_v45 = vcombine.low %v1658_v0, %v1665_v55  ;;  %v1455_v43 = vcombine.low %v7578_v21, %v7581_v28  ;;  %v1748_v33 = vcombine.low %v7872_v48, %v7904_v56  ;;  %v2339_v14 = vpop.permute.xlu1 %2338 }
  0xca   : > { %2995 = vrot.lane.b32.xlu1 %v8054_v11, %s6827_s28  ;;  %v2349_v7 = vsel %vm2346_vm3, %v1372_v34, %v2293_v39  ;;  %v8159_v53 = vrot.slane %v1700_v17, %v6968_v5  ;;  %v1462_v23 = vrot.slane %v1454_v29, %v6968_v5  ;;  %v2416_v28 = vrot.slane %v2414_v58, 1  ;;  %s8517_s28 = scalar_lea.vmem %s9073_s7, %s9220_s16  ;;  %s9126_s16 = scalar_lea.vmem [#allocation4], %s8970_s19 }
  0xcb   : > { %v2379_v18 = vsel %vm2377_vm4, %v2349_v7, %v8082_v10  ;;  %v1749_v10 = vcombine.low %v7912_v36, %v7918_v41  ;;  %v8172_v27 = vrot.slane %v1748_v33, %v6968_v5  ;;  %v8179_v48 = vrot.slane %v2442_v51, 1  ;;  %s6077_s26 = sshll.u32 %s9126_s16, 4  ;;  %s6040_s16 = scalar_lea.sflag [#allocation3], %s8970_s19  ;;  %s8991_s26 = int_to_ptr.vmem [resolvable:$true] %s6077_s26 }
  0xcc   : > { %v2410_v11 = vshll.u32 %v2379_v18, 16  ;;  %v2408_v8 = vshrl.u32 %v2379_v18, 16  ;;  %v1715_v21 = vcombine.low %v8153_v6, %v8159_v53  ;;  %v1469_v36 = vrot.slane %v1455_v43, %v6968_v5 }
  0xcd   : > { %3609 = vrot.lane.b32.xlu0 %v3592_v4, %s6828_s24  ;;  %v8175_v30 = vrot.slane %v1749_v10, %v6968_v5  ;;  %v3774_v41 = vsel %vm2507_vm5, %v6699_v12, 0  ;;  %v2648_v32 = vcombine.low %v7510_v47, %v7972_v61  ;;  %v2446_v61 = vshrl.u32 %v2389_v49, 16 }
  0xce   : > { %v2412_v44 = vrot.slane %v2410_v11, 1  ;;  %v6355_v57 = vcombine.high %v7969_v31, %v8009_v24  ;;  %v3268_v19 = vcombine.low %v7998_v46, %v8012_v1  ;;  %v6356_v13 = vcombine.high %v7998_v46, %v8012_v1  ;;  %v9201_v1 = vld [vmem:[#allocation34_spill] sm:$0xff] }
  0xcf   : > { %v1764_v62 = vcombine.low %v8172_v27, %v8175_v30  ;;  %v8197_v47 = vrot.slane %v2648_v32, %v6968_v5  ;;  %v2448_v39 = vor.u32 %v2446_v61, %v8179_v48  ;;  %v1503_v17 = vcombine.low %v9201_v1, %v7626_v16 }
  0xd0   : > { %v2413_v52 = vor.u32 %v2412_v44, %v2408_v8  ;;  %v2305_v56 = vpop.permute.xlu0 %2304  ;;  %v3283_v7 = vrot.slane %v6355_v57, %v6968_v5  ;;  %v1504_v18 = vcombine.low %v7621_v25, %v7634_v37  ;;  %v9203_v57 = vld [vmem:[#allocation38_spill] sm:$0xff] }
  0xd1   : > { %2961 = vrot.lane.b32.xlu0 %v8076_v42, %s6828_s24  ;;  %v2367_v38 = vsel %vm2346_vm3, %v1666_v45, %v2305_v56  ;;  %v2649_v42 = vcombine.low %v7979_v35, %v7987_v54  ;;  %v3266_v35 = vcombine.low %v7969_v31, %v8009_v24  ;;  %v1470_v54 = vcombine.low %v1462_v23, %v1469_v36  ;;  %v2331_v0 = vpop.permute.xlu1 %2330 }
  0xd2   : > { %v2417_v9 = vsel %vm2407_vm7, %v2413_v52, %v2416_v28  ;;  %v2391_v20 = vsel %vm2377_vm4, %v2367_v38, %v2339_v14  ;;  %v3290_v31 = vrot.slane %v3268_v19, %v6968_v5  ;;  %v3297_v24 = vrot.slane %v6356_v13, %v6968_v5  ;;  %v9204_v19 = vld [vmem:[#allocation37_spill] sm:$0xff] }
  0xd3   : > { %6482 = vmatmul.mubr.msk.bf16.vlgmr.msra.gmra.mxu0 %vm2479_vm8, %v2417_v9  ;;  %v2449_v2 = vshll.u32 %v2391_v20, 16  ;;  %v8202_v4 = vrot.slane %v2649_v42, %v6968_v5  ;;  %v3276_v49 = vrot.slane %v3266_v35, %v6968_v5  ;;  %v2418_v45 = vshrl.u32 %v8133_v22, 16  ;;  %v9202_v35 = vld [vmem:[#allocation36_spill] sm:$0xff] }
  0xd4   : > { %6556 = vmatpush3.bf16.msra.mxu0 %v3774_v41  ;;  %6485 = vmatprep.mubr.msk.bf16.mxu0 %vm6830_vm6, %v6829_v40  ;;  %v3299_v11 = vcombine.low %v3290_v31, %v3297_v24  ;;  %v1511_v12 = vrot.slane %v1503_v17, %v6968_v5  ;;  %v1518_v8 = vrot.slane %v1504_v18, %v6968_v5  ;;  %v2453_v36 = vshrl.u32 %v2391_v20, 16 }
  0xd5   : > { %3611 = vrot.lane.b32.xlu0 %v8104_v50, %s6828_s24  ;;  %v2451_v34 = vrot.slane %v2449_v2, 1  ;;  %v2664_v55 = vcombine.low %v8197_v47, %v8202_v4  ;;  %v3141_v50 = vsel %vm2507_vm5, %v6700_v60, 0  ;;  %v3298_v58 = vcombine.low %v3276_v49, %v3283_v7  ;;  %s461_s24 = scalar_lea.vmem [#allocation2], %s8970_s19 }
  0xd6   : > { %v8237_v25 = vrot.slane %v3299_v11, %v6968_v5  ;;  %v2341_v37 = vpop.permute.xlu1 %2340  ;;  %v2420_v44 = vor.u32 %v2418_v45, %v2416_v28  ;;  %v1519_v56 = vcombine.low %v1511_v12, %v1518_v8  ;;  %v1553_v13 = vcombine.low %v9204_v19, %v9203_v57  ;;  %s6062_s15 = sshll.u32 %s461_s24, 4  ;;  %s8983_s15 = int_to_ptr.vmem [resolvable:$true] %s6062_s15 }
  0xd7   : > { %v2452_v46 = vsel %vm2407_vm7, %v2448_v39, %v2451_v34  ;;  %v8234_v16 = vrot.slane %v3298_v58, %v6968_v5  ;;  %v2455_v32 = vor.u32 %v2453_v36, %v2451_v34  ;;  %v1771_v24 = vrot.slane %v6994_v15, %v6968_v5  ;;  %v9205_v36 = vld [vmem:[#allocation14_spill] sm:$0xff]  ;;  %s6701_s22 = scalar_lea.vmem %s8983_s15, 16  ;;  %p6708_p10 = scmp.lt.s32.totalorder %s8983_s15, %s6706_s0 }
  0xd8   : > { %v2297_v63 = vpop.permute.xlu0 %2296  ;;  %6502 = vmatmul.mubr.msk.bf16.vlgmr.msra.gmra.mxu1 %vm2479_vm8, %v2452_v46  ;;  %v1567_v49 = vrot.slane %v1553_v13, %v6968_v5  ;;  %p6702_p6 = scmp.ne.s32.totalorder %s8983_s15, %s6701_s22  ;;  %p6709_p11 = scmp.lt.s32.totalorder %s6707_s1, %s6701_s22 }
  0xd9   : > { %v2355_v29 = vsel %vm2346_vm3, %v1470_v54, %v2297_v63  ;;  %6518 = vmatpush3.bf16.msra.mxu1 %v3141_v50  ;;  %6505 = vmatprep.mubr.msk.bf16.mxu1 %vm6830_vm6, %v6829_v40  ;;  %v3314_v10 = vcombine.low %v8234_v16, %v8237_v25  ;;  %v1552_v54 = vcombine.low %v9202_v35, %v7673_v26  ;;  %v9207_v35 = vld [vmem:[#allocation25_spill] sm:$0xff] }
  0xda   : > { %v2383_v51 = vsel %vm2377_vm4, %v2355_v29, %v2331_v0  ;;  %v8277_v11 = vrot.slane %v1771_v24, %v6968_v5  ;;  %p6703_p7 = pnand %p6702_p6, %p6935_p3  ;;  %p6710_p12 = por %p6709_p11, %p6708_p10 }
  0xdb   : > { %v2421_v43 = vshll.u32 %v2383_v51, 16  ;;  %v2333_v28 = vpop.permute.xlu1 %2332  ;;  %v2425_v42 = vshrl.u32 %v2383_v51, 16  ;;  %v1560_v0 = vrot.slane %v1552_v54, %v6968_v5 }
  0xdc   : > { %p6704_p9 = pneg %p6703_p7 }
  0xdd   : > { %v2423_v33 = vrot.slane %v2421_v43, 1  ;;  %v2307_v23 = vpop.permute.xlu0 %2306  ;;  %v1568_v7 = vcombine.low %v1560_v0, %v1567_v49 }
  0xde   : > { %v2370_v22 = vsel %vm2346_vm3, %v1715_v21, %v2307_v23  ;;  %p6711_p13 = pnand %p6710_p12, %p6704_p9 }
  0xdf   : > { %v2424_v52 = vsel %vm2407_vm7, %v2420_v44, %v2423_v33  ;;  %v2393_v14 = vsel %vm2377_vm4, %v2370_v22, %v2341_v37  ;;  %v2427_v20 = vor.u32 %v2425_v42, %v2423_v33 }
  0xe0   : > { %6486 = vmatmul.mubr.msk.bf16.gmra.mxu0 %vm2479_vm8, %v2424_v52  ;;  %v2456_v41 = vshll.u32 %v2393_v14, 16  ;;  %v2460_v46 = vshrl.u32 %v2393_v14, 16 }
  0xe1   : > { %6489 = vmatprep.mubr.msk.bf16.mxu0 %vm6830_vm6, %v6829_v40 }
  0xe2   : > { %v2458_v38 = vrot.slane %v2456_v41, 1  ;;  %v2299_v9 = vpop.permute.xlu0 %2298 }
  0xe3   : > { %v2358_v6 = vsel %vm2346_vm3, %v1519_v56, %v2299_v9  ;;  %v9206_v9 = vld [vmem:[#allocation35_spill] sm:$0xff] }
  0xe4   : > { %v2385_v53 = vsel %vm2377_vm4, %v2358_v6, %v2333_v28  ;;  %v2459_v21 = vsel %vm2407_vm7, %v2455_v32, %v2458_v38  ;;  %v2462_v18 = vor.u32 %v2460_v46, %v2458_v38 }
  0xe5   : > { %v2428_v60 = vshll.u32 %v2385_v53, 16  ;;  %6506 = vmatmul.mubr.msk.bf16.gmra.mxu1 %vm2479_vm8, %v2459_v21 }
  0xe6   : > { %6509 = vmatprep.mubr.msk.bf16.mxu1 %vm6830_vm6, %v6829_v40 }
  0xe7   : > { %v2430_v61 = vrot.slane %v2428_v60, 1  ;;  %v2343_v2 = vpop.permute.xlu1 %2342 }
  0xe9   : > { %v2431_v39 = vsel %vm2407_vm7, %v2427_v20, %v2430_v61 }
  0xea   : > { %6490 = vmatmul.mubr.msk.bf16.gmra.mxu0 %vm2479_vm8, %v2431_v39 }
  0xeb   : > { %v2335_v34 = vpop.permute.xlu1 %2334  ;;  %6493 = vmatprep.mubr.msk.bf16.mxu0 %vm6830_vm6, %v6829_v40 }
  0xee   : > { %v2309_v50 = vpop.permute.xlu0 %2308 }
  0xef   : > { %v2373_v26 = vsel %vm2346_vm3, %v1764_v62, %v2309_v50  ;;  %v2345_v31 = vpop.permute.xlu1 %2344  ;;  %v2432_v62 = vshrl.u32 %v2385_v53, 16 }
  0xf0   : > { %v2395_v63 = vsel %vm2377_vm4, %v2373_v26, %v2343_v2 }
  0xf1   : > { %v2463_v1 = vshll.u32 %v2395_v63, 16  ;;  %v2434_v43 = vor.u32 %v2432_v62, %v2430_v61  ;;  %v2467_v44 = vshrl.u32 %v2395_v63, 16 }
  0xf2   : > { %v2301_v17 = vpop.permute.xlu0 %2300 }
  0xf3   : > { %v2465_v29 = vrot.slane %v2463_v1, 1  ;;  %v2361_v58 = vsel %vm2346_vm3, %v1568_v7, %v2301_v17  ;;  %v2978_v27 = vpop.permute.xlu1 %2977 }
  0xf4   : > { %v2387_v30 = vsel %vm2377_vm4, %v2361_v58, %v2335_v34 }
  0xf5   : > { %v2435_v51 = vshll.u32 %v2387_v30, 16  ;;  %v2466_v45 = vsel %vm2407_vm7, %v2462_v18, %v2465_v29  ;;  %v2469_v52 = vor.u32 %v2467_v44, %v2465_v29  ;;  %v2439_v14 = vshrl.u32 %v2387_v30, 16 }
  0xf6   : > { %6510 = vmatmul.mubr.msk.bf16.gmra.mxu1 %vm2479_vm8, %v2466_v45  ;;  %v2311_v15 = vpop.permute.xlu0 %2310 }
  0xf7   : > { %v2437_v37 = vrot.slane %v2435_v51, 1  ;;  %v2376_v12 = vsel %vm2346_vm3, %v8277_v11, %v2311_v15  ;;  %v3594_v8 = vpop.permute.xlu1 %3593  ;;  %6513 = vmatprep.mubr.msk.bf16.mxu1 %vm6830_vm6, %v6829_v40 }
  0xf8   : > { %v2397_v5 = vsel %vm2377_vm4, %v2376_v12, %v2345_v31  ;;  %v3632_v6 = vsel %vm2346_vm3, %v9206_v9, %v3594_v8  ;;  %v9208_v31 = vld [vmem:[#allocation39_spill] sm:$0xff] }
  0xf9   : > { %v2470_v33 = vshll.u32 %v2397_v5, 16  ;;  %v2438_v23 = vsel %vm2407_vm7, %v2434_v43, %v2437_v37  ;;  %v2441_v38 = vor.u32 %v2439_v14, %v2437_v37  ;;  %v9210_v5 = vld [vmem:[#allocation40_spill] sm:$0xff] }
  0xfa   : > { %v2944_v22 = vpop.permute.xlu0 %2943  ;;  %6494 = vmatmul.mubr.msk.bf16.gmra.mxu0 %vm2479_vm8, %v2438_v23 }
  0xfb   : > { %v2472_v56 = vrot.slane %v2470_v33, 1  ;;  %v2998_v41 = vsel %vm2346_vm3, %v9205_v36, %v2944_v22  ;;  %v3614_v28 = vpop.permute.xlu1 %3613  ;;  %6497 = vmatprep.mubr.msk.bf16.mxu0 %vm6830_vm6, %v6829_v40  ;;  %v2445_v61 = vsel %vm2407_vm7, %v2441_v38, %v8179_v48 }
  0xfc   : > { %v3020_v32 = vsel %vm2377_vm4, %v2998_v41, %v2978_v27  ;;  %v3654_v20 = vsel %vm2377_vm4, %v3632_v6, %v3614_v28  ;;  %v9209_v27 = vld [vmem:[#allocation32_spill] sm:$0xff]  ;;  %v9211_v28 = vld [vmem:[#allocation18_spill] sm:$0xff] }
  0xfd   : > { %v2473_v53 = vsel %vm2407_vm7, %v2469_v52, %v2472_v56  ;;  %v3044_v21 = vshll.u32 %v3020_v32, 16  ;;  %v3677_v19 = vshll.u32 %v3654_v20, 16  ;;  %v3042_v34 = vshrl.u32 %v3020_v32, 16 }
  0xfe   : > { %6514 = vmatmul.mubr.msk.bf16.gmra.mxu1 %vm2479_vm8, %v2473_v53  ;;  %v2946_v42 = vpop.permute.xlu0 %2945  ;;  %v3675_v48 = vshrl.u32 %v3654_v20, 16 }
  0xff   : > { %v3616_v60 = vpop.permute.xlu1 %3615  ;;  %6519 = vmatprep.mubr.msk.bf16.mxu1 %vm6830_vm6, %v6829_v40  ;;  %v3046_v2 = vrot.slane %v3044_v21, 1  ;;  %v3000_v54 = vsel %vm2346_vm3, %v9207_v35, %v2946_v42  ;;  %v3679_v7 = vrot.slane %v3677_v19, 1 }
 0x101   : > { %v3047_v49 = vor.u32 %v3046_v2, %v3042_v34  ;;  %v3680_v29 = vor.u32 %v3679_v7, %v3675_v48 }
 0x102   : > { %v2980_v57 = vpop.permute.xlu0 %2979  ;;  %6498 = vmatmul.mubr.msk.bf16.gmra.mxu0 %vm2479_vm8, %v2445_v61  ;;  %v9212_v61 = vld [vmem:[#allocation20_spill] sm:$0xff] }
 0x103   : > { %v3022_v13 = vsel %vm2377_vm4, %v3000_v54, %v2980_v57  ;;  %v2982_v39 = vpop.permute.xlu1 %2981  ;;  %6557 = vmatprep.mubr.msk.bf16.mxu0 %vm6830_vm6, %v6829_v40 }
 0x104   : > { %v3048_v0 = vshll.u32 %v3022_v13, 16  ;;  %v3052_v45 = vshrl.u32 %v3022_v13, 16 }
 0x106   : > { %v3050_v50 = vrot.slane %v3048_v0, 1  ;;  %v3596_v26 = vpop.permute.xlu0 %3595 }
 0x107   : > { %v3634_v24 = vsel %vm2346_vm3, %v9208_v31, %v3596_v26  ;;  %v3618_v63 = vpop.permute.xlu1 %3617 }
 0x108   : > { %v3051_v46 = vsel %vm2407_vm7, %v3047_v49, %v3050_v50  ;;  %v3656_v1 = vsel %vm2377_vm4, %v3634_v24, %v3616_v60  ;;  %v3054_v12 = vor.u32 %v3052_v45, %v3050_v50  ;;  %v9213_v49 = vld [vmem:[#allocation9_spill] sm:$0xff] }
 0x109   : > { %v3681_v17 = vshll.u32 %v3656_v1, 16  ;;  %6520 = vmatmul.mubr.msk.bf16.vlgmr.msra.gmra.mxu1 %vm2479_vm8, %v3051_v46  ;;  %v3685_v22 = vshrl.u32 %v3656_v1, 16 }
 0x10a   : > { %v2948_v18 = vpop.permute.xlu0 %2947  ;;  %6523 = vmatprep.mubr.msk.bf16.mxu1 %vm6830_vm6, %v6829_v40 }
 0x10b   : > { %v3683_v58 = vrot.slane %v3681_v17, 1  ;;  %v3002_v30 = vsel %vm2346_vm3, %v9209_v27, %v2948_v18  ;;  %v2984_v62 = vpop.permute.xlu1 %2983 }
 0x10c   : > { %v3024_v51 = vsel %vm2377_vm4, %v3002_v30, %v2982_v39 }
 0x10d   : > { %v3684_v15 = vsel %vm2407_vm7, %v3680_v29, %v3683_v58  ;;  %v3055_v43 = vshll.u32 %v3024_v51, 16  ;;  %v3687_v36 = vor.u32 %v3685_v22, %v3683_v58  ;;  %v3059_v6 = vshrl.u32 %v3024_v51, 16  ;;  %v9215_v22 = vld [vmem:[#allocation17_spill] sm:$0xff] }
 0x10e   : > { %v3598_v37 = vpop.permute.xlu0 %3597  ;;  %6558 = vmatmul.mubr.msk.bf16.vlgmr.msra.gmra.mxu0 %vm2479_vm8, %v3684_v15  ;;  %v9214_v15 = vld [vmem:[#allocation21_spill] sm:$0xff] }
 0x10f   : > { %v3057_v8 = vrot.slane %v3055_v43, 1  ;;  %v3636_v44 = vsel %vm2346_vm3, %v9210_v5, %v3598_v37  ;;  %6561 = vmatprep.mubr.msk.bf16.mxu0 %vm6830_vm6, %v6829_v40  ;;  %v3620_v33 = vpop.permute.xlu1 %3619 }
 0x110   : > { %v3658_v23 = vsel %vm2377_vm4, %v3636_v44, %v3618_v63 }
 0x111   : > { %v3688_v52 = vshll.u32 %v3658_v23, 16  ;;  %v3058_v14 = vsel %vm2407_vm7, %v3054_v12, %v3057_v8  ;;  %v3061_v60 = vor.u32 %v3059_v6, %v3057_v8  ;;  %v3692_v57 = vshrl.u32 %v3658_v23, 16  ;;  %v9216_v6 = vld [vmem:[#allocation29_spill] sm:$0xff] }
 0x112   : > { %6524 = vmatmul.mubr.msk.bf16.gmra.mxu1 %vm2479_vm8, %v3058_v14  ;;  %v2950_v56 = vpop.permute.xlu0 %2949 }
 0x113   : > { %v3690_v41 = vrot.slane %v3688_v52, 1  ;;  %v3004_v32 = vsel %vm2346_vm3, %v9211_v28, %v2950_v56  ;;  %6527 = vmatprep.mubr.msk.bf16.mxu1 %vm6830_vm6, %v6829_v40  ;;  %v2986_v38 = vpop.permute.xlu1 %2985 }
 0x114   : > { %v3026_v9 = vsel %vm2377_vm4, %v3004_v32, %v2984_v62 }
 0x115   : > { %v3062_v53 = vshll.u32 %v3026_v9, 16  ;;  %v3691_v21 = vsel %vm2407_vm7, %v3687_v36, %v3690_v41  ;;  %v3694_v34 = vor.u32 %v3692_v57, %v3690_v41  ;;  %v3066_v7 = vshrl.u32 %v3026_v9, 16  ;;  %v9217_v57 = vld [vmem:[#allocation16_spill] sm:$0xff] }
 0x116   : > { %v3600_v42 = vpop.permute.xlu0 %3599  ;;  %6562 = vmatmul.mubr.msk.bf16.gmra.mxu0 %vm2479_vm8, %v3691_v21 }
 0x117   : > { %v3064_v20 = vrot.slane %v3062_v53, 1  ;;  %v3638_v2 = vsel %vm2346_vm3, %v9212_v61, %v3600_v42  ;;  %6565 = vmatprep.mubr.msk.bf16.mxu0 %vm6830_vm6, %v6829_v40  ;;  %v3622_v35 = vpop.permute.xlu1 %3621 }
 0x118   : > { %v3660_v54 = vsel %vm2377_vm4, %v3638_v2, %v3620_v33 }
 0x119   : > { %v3695_v19 = vshll.u32 %v3660_v54, 16  ;;  %v3065_v13 = vsel %vm2407_vm7, %v3061_v60, %v3064_v20  ;;  %v3068_v46 = vor.u32 %v3066_v7, %v3064_v20  ;;  %v3699_v58 = vshrl.u32 %v3660_v54, 16  ;;  %v9218_v7 = vld [vmem:[#allocation33_spill] sm:$0xff] }
 0x11a   : > { %6528 = vmatmul.mubr.msk.bf16.gmra.mxu1 %vm2479_vm8, %v3065_v13  ;;  %v2952_v39 = vpop.permute.xlu0 %2951 }
 0x11b   : > { %v3697_v0 = vrot.slane %v3695_v19, 1  ;;  %v3006_v50 = vsel %vm2346_vm3, %v9213_v49, %v2952_v39  ;;  %6531 = vmatprep.mubr.msk.bf16.mxu1 %vm6830_vm6, %v6829_v40  ;;  %v2988_v26 = vpop.permute.xlu1 %2987 }
 0x11c   : > { %v3028_v48 = vsel %vm2377_vm4, %v3006_v50, %v2986_v38 }
 0x11d   : > { %v3069_v31 = vshll.u32 %v3028_v48, 16  ;;  %v3698_v24 = vsel %vm2407_vm7, %v3694_v34, %v3697_v0  ;;  %v3701_v51 = vor.u32 %v3699_v58, %v3697_v0  ;;  %v3073_v12 = vshrl.u32 %v3028_v48, 16 }
 0x11e   : > { %6566 = vmatmul.mubr.msk.bf16.gmra.mxu0 %vm2479_vm8, %v3698_v24 }
 0x11f   : > { %v3602_v63 = vpop.permute.xlu0 %3601  ;;  %v3071_v1 = vrot.slane %v3069_v31, 1  ;;  %6569 = vmatprep.mubr.msk.bf16.mxu0 %vm6830_vm6, %v6829_v40  ;;  %v3624_v18 = vpop.permute.xlu1 %3623 }
 0x120   : > { %v3640_v17 = vsel %vm2346_vm3, %v7858_v59, %v3602_v63 }
 0x121   : > { %v3662_v29 = vsel %vm2377_vm4, %v3640_v17, %v3622_v35  ;;  %v3072_v30 = vsel %vm2407_vm7, %v3068_v46, %v3071_v1  ;;  %v3075_v33 = vor.u32 %v3073_v12, %v3071_v1 }
 0x122   : > { %v3702_v27 = vshll.u32 %v3662_v29, 16  ;;  %6532 = vmatmul.mubr.msk.bf16.gmra.mxu1 %vm2479_vm8, %v3072_v30  ;;  %v3706_v36 = vshrl.u32 %v3662_v29, 16 }
 0x123   : > { %v2954_v62 = vpop.permute.xlu0 %2953  ;;  %6535 = vmatprep.mubr.msk.bf16.mxu1 %vm6830_vm6, %v6829_v40  ;;  %v2990_v59 = vpop.permute.xlu1 %2989 }
 0x124   : > { %v3704_v45 = vrot.slane %v3702_v27, 1  ;;  %v3008_v43 = vsel %vm2346_vm3, %v9214_v15, %v2954_v62 }
 0x125   : > { %v3030_v37 = vsel %vm2377_vm4, %v3008_v43, %v2988_v26 }
 0x126   : > { %v3076_v8 = vshll.u32 %v3030_v37, 16  ;;  %v3705_v5 = vsel %vm2407_vm7, %v3701_v51, %v3704_v45  ;;  %v3708_v38 = vor.u32 %v3706_v36, %v3704_v45  ;;  %v3080_v60 = vshrl.u32 %v3030_v37, 16 }
 0x127   : > { %v3604_v44 = vpop.permute.xlu0 %3603  ;;  %6570 = vmatmul.mubr.msk.bf16.gmra.mxu0 %vm2479_vm8, %v3705_v5 }
 0x128   : > { %v3078_v23 = vrot.slane %v3076_v8, 1  ;;  %v3642_v52 = vsel %vm2346_vm3, %v9215_v22, %v3604_v44  ;;  %6573 = vmatprep.mubr.msk.bf16.mxu0 %vm6830_vm6, %v6829_v40  ;;  %v3626_v14 = vpop.permute.xlu1 %3625 }
 0x129   : > { %v3664_v56 = vsel %vm2377_vm4, %v3642_v52, %v3624_v18 }
 0x12a   : > { %v3709_v41 = vshll.u32 %v3664_v56, 16  ;;  %v3079_v28 = vsel %vm2407_vm7, %v3075_v33, %v3078_v23  ;;  %v3082_v35 = vor.u32 %v3080_v60, %v3078_v23  ;;  %v3713_v34 = vshrl.u32 %v3664_v56, 16 }
 0x12b   : > { %6536 = vmatmul.mubr.msk.bf16.gmra.mxu1 %vm2479_vm8, %v3079_v28  ;;  %v2956_v32 = vpop.permute.xlu0 %2955 }
 0x12c   : > { %v3711_v9 = vrot.slane %v3709_v41, 1  ;;  %v3010_v53 = vsel %vm2346_vm3, %v9216_v6, %v2956_v32  ;;  %6539 = vmatprep.mubr.msk.bf16.mxu1 %vm6830_vm6, %v6829_v40  ;;  %v2992_v21 = vpop.permute.xlu1 %2991 }
 0x12d   : > { %v3032_v42 = vsel %vm2377_vm4, %v3010_v53, %v2990_v59 }
 0x12e   : > { %v3083_v20 = vshll.u32 %v3032_v42, 16  ;;  %v3712_v61 = vsel %vm2407_vm7, %v3708_v38, %v3711_v9  ;;  %v3715_v26 = vor.u32 %v3713_v34, %v3711_v9  ;;  %v3087_v63 = vshrl.u32 %v3032_v42, 16 }
 0x12f   : > { %v3606_v2 = vpop.permute.xlu0 %3605  ;;  %6574 = vmatmul.mubr.msk.bf16.gmra.mxu0 %vm2479_vm8, %v3712_v61 }
 0x130   : > { %v3085_v54 = vrot.slane %v3083_v20, 1  ;;  %v3644_v19 = vsel %vm2346_vm3, %v9217_v57, %v3606_v2  ;;  %6577 = vmatprep.mubr.msk.bf16.mxu0 %vm6830_vm6, %v6829_v40  ;;  %v3628_v13 = vpop.permute.xlu1 %3627 }
 0x131   : > { %v3666_v39 = vsel %vm2377_vm4, %v3644_v19, %v3626_v14 }
 0x132   : > { %v3716_v0 = vshll.u32 %v3666_v39, 16  ;;  %v3086_v49 = vsel %vm2407_vm7, %v3082_v35, %v3085_v54  ;;  %v3089_v29 = vor.u32 %v3087_v63, %v3085_v54  ;;  %v3720_v62 = vshrl.u32 %v3666_v39, 16 }
 0x133   : > { %6540 = vmatmul.mubr.msk.bf16.gmra.mxu1 %vm2479_vm8, %v3086_v49  ;;  %v2958_v50 = vpop.permute.xlu0 %2957 }
 0x134   : > { %v3718_v48 = vrot.slane %v3716_v0, 1  ;;  %v3012_v31 = vsel %vm2346_vm3, %v9218_v7, %v2958_v50  ;;  %6543 = vmatprep.mubr.msk.bf16.mxu1 %vm6830_vm6, %v6829_v40  ;;  %v2994_v17 = vpop.permute.xlu1 %2993 }
 0x135   : > { %v3034_v24 = vsel %vm2377_vm4, %v3012_v31, %v2992_v21 }
 0x136   : > { %v3090_v46 = vshll.u32 %v3034_v24, 16  ;;  %v3719_v1 = vsel %vm2407_vm7, %v3715_v26, %v3718_v48  ;;  %v3722_v43 = vor.u32 %v3720_v62, %v3718_v48  ;;  %v3094_v8 = vshrl.u32 %v3034_v24, 16 }
 0x137   : > { %v3608_v18 = vpop.permute.xlu0 %3607  ;;  %6578 = vmatmul.mubr.msk.bf16.gmra.mxu0 %vm2479_vm8, %v3719_v1 }
 0x138   : > { %v3092_v58 = vrot.slane %v3090_v46, 1  ;;  %v3646_v27 = vsel %vm2346_vm3, %v8035_v3, %v3608_v18  ;;  %6581 = vmatprep.mubr.msk.bf16.mxu0 %vm6830_vm6, %v6829_v40  ;;  %v3630_v3 = vpop.permute.xlu1 %3629 }
 0x139   : > { %v3668_v30 = vsel %vm2377_vm4, %v3646_v27, %v3628_v13  ;;  %v8435_v13 = vld [vmem:[%s9070_s4] ss:$0 sm:$0xff] }
 0x13a   : > { %v3723_v51 = vshll.u32 %v3668_v30, 16  ;;  %v3093_v45 = vsel %vm2407_vm7, %v3089_v29, %v3092_v58  ;;  %v3096_v23 = vor.u32 %v3094_v8, %v3092_v58 }
 0x13b   : > { %6544 = vmatmul.mubr.msk.bf16.gmra.mxu1 %vm2479_vm8, %v3093_v45  ;;  %v2960_v15 = vpop.permute.xlu0 %2959 }
 0x13c   : > { %v3725_v59 = vrot.slane %v3723_v51, 1  ;;  %v3015_v37 = vsel %vm2346_vm3, %v2664_v55, %v2960_v15  ;;  %6547 = vmatprep.mubr.msk.bf16.mxu1 %vm6830_vm6, %v6829_v40  ;;  %v3727_v55 = vshrl.u32 %v3668_v30, 16  ;;  %v2996_v56 = vpop.permute.xlu1 %2995 }
 0x13d   : > { %v3036_v12 = vsel %vm2377_vm4, %v3015_v37, %v2994_v17 }
 0x13e   : > { %v3097_v5 = vshll.u32 %v3036_v12, 16  ;;  %v3726_v44 = vsel %vm2407_vm7, %v3722_v43, %v3725_v59  ;;  %v3729_v41 = vor.u32 %v3727_v55, %v3725_v59 }
 0x13f   : > { %v3610_v33 = vpop.permute.xlu0 %3609  ;;  %6582 = vmatmul.mubr.msk.bf16.gmra.mxu0 %vm2479_vm8, %v3726_v44 }
 0x140   : > { %v3099_v22 = vrot.slane %v3097_v5, 1  ;;  %v3649_v47 = vsel %vm2346_vm3, %v3314_v10, %v3610_v33  ;;  %6585 = vmatprep.mubr.msk.bf16.mxu0 %vm6830_vm6, %v6829_v40  ;;  %v3101_v10 = vshrl.u32 %v3036_v12, 16 }
 0x141   : > { %v3670_v4 = vsel %vm2377_vm4, %v3649_v47, %v3630_v3 }
 0x142   : > { %v3730_v52 = vshll.u32 %v3670_v4, 16  ;;  %v3100_v14 = vsel %vm2407_vm7, %v3096_v23, %v3099_v22  ;;  %v3103_v6 = vor.u32 %v3101_v10, %v3099_v22  ;;  %v3734_v60 = vshrl.u32 %v3670_v4, 16 }
 0x143   : > { %6548 = vmatmul.mubr.msk.bf16.gmra.mxu1 %vm2479_vm8, %v3100_v14  ;;  %v2962_v36 = vpop.permute.xlu0 %2961 }
 0x144   : > { %v3732_v28 = vrot.slane %v3730_v52, 1  ;;  %v3018_v16 = vsel %vm2346_vm3, %v8277_v11, %v2962_v36  ;;  %6551 = vmatprep.mubr.msk.bf16.mxu1 %vm6830_vm6, %v6829_v40  ;;  %v6831_v36 = vmov 1983009808  }
 0x145   : > { %v3038_v25 = vsel %vm2377_vm4, %v3018_v16, %v2996_v56 }
 0x146   : > { %v3104_v32 = vshll.u32 %v3038_v25, 16  ;;  %v3733_v38 = vsel %vm2407_vm7, %v3729_v41, %v3732_v28  ;;  %v3736_v2 = vor.u32 %v3734_v60, %v3732_v28  ;;  %v3919_v41 = vunpack.c.l.s4 %v6831_v36 }
 0x147   : > { %v3612_v9 = vpop.permute.xlu0 %3611  ;;  %6586 = vmatmul.mubr.msk.bf16.gmra.mxu0 %vm2479_vm8, %v3733_v38 }
 0x148   : > { %v3106_v53 = vrot.slane %v3104_v32, 1  ;;  %v3652_v21 = vsel %vm2346_vm3, %v8277_v11, %v3612_v9  ;;  %6589 = vmatprep.mubr.msk.bf16.mxu0 %vm6830_vm6, %v6829_v40  ;;  %v3920_v32 = vunpack.c.0.s8 %v3919_v41 }
 0x149   : > { %v3671_v42 = vsel %vm2377_vm4, %v3652_v21, %v2996_v56  ;;  %v9219_v21 = vld [vmem:[#allocation8_spill] sm:$0xff] }
 0x14a   : > { %v3737_v20 = vshll.u32 %v3671_v42, 16  ;;  %v3107_v61 = vsel %vm2407_vm7, %v3103_v6, %v3106_v53  ;;  %v8477_v42 = vsub.s32 %v3920_v32, %v9219_v21 }
 0x14b   : > { %6552 = vmatmul.mubr.msk.bf16.gmra.mxu1 %vm2479_vm8, %v3107_v61 }
 0x14c   : > { %v3739_v35 = vrot.slane %v3737_v20, 1 }
 0x14e   : > { %v3740_v54 = vsel %vm2407_vm7, %v3736_v2, %v3739_v35 }
 0x14f   : > { %6590 = vmatmul.mubr.msk.bf16.gmra.mxu0 %vm2479_vm8, %v3740_v54 }
 0x193   : > { %v2545_v57 = vpop.f32.mrf.mxu0 }
 0x194   : > { %v2546_v38 = vadd.f32 %v8435_v13, %v2545_v57  ;;  %v8483_v57 = vrot.slane %v6829_v40, %v8477_v42 }
 0x195   : > { %v6483_v19 = vpop.f32.mrf.mxu0 }
 0x196   : > { %v8490_v40 = vmul.f32 %v8483_v57, %v8483_v57 }
 0x197   : > { %v2548_v11 = vpop.f32.mrf.mxu0 }
 0x198   : > { %v2585_v39 = vpop.f32.mrf.mxu1  ;;  %v2549_v20 = vadd.f32 %v8435_v13, %v2548_v11 }
 0x199   : > { %v6484_v34 = vpop.f32.mrf.mxu0  ;;  %v8438_v0 = vadd.f32 %v8435_v13, %v2585_v39 }
 0x19a   : > { %v6503_v49 = vpop.f32.mrf.mxu1 }
 0x19c   : > { %v2588_v50 = vpop.f32.mrf.mxu1 }
 0x19d   : > { %v8441_v26 = vadd.f32 %v8435_v13, %v2588_v50 }
 0x19e   : > { %v6504_v48 = vpop.f32.mrf.mxu1 }
 0x1a0   : > { %v2553_v7 = vpop.f32.mrf.mxu0 }
 0x1a2   : > { %v6487_v31 = vpop.f32.mrf.mxu0 }
 0x1a4   : > { %v8443_v24 = vpop.f32.mrf.mxu0 }
 0x1a5   : > { %v2593_v63 = vpop.f32.mrf.mxu1 }
 0x1a6   : > { %v6488_v46 = vpop.f32.mrf.mxu0  ;;  %v8446_v1 = vadd.f32 %v8435_v13, %v2593_v63  ;;  %v2554_v63 = vadd.f32 %v8435_v13, %v2553_v7 }
 0x1a7   : > { %v6507_v17 = vpop.f32.mrf.mxu1 }
 0x1a9   : > { %v2596_v18 = vpop.f32.mrf.mxu1 }
 0x1aa   : > { %v8449_v29 = vadd.f32 %v8435_v13, %v2596_v18  ;;  %v8451_v58 = vpop.f32.mrf.mxu0 }
 0x1ab   : > { %v6508_v27 = vpop.f32.mrf.mxu1 }
 0x1ac   : > { %v6491_v30 = vpop.f32.mrf.mxu0 }
 0x1ae   : > { %v8453_v62 = vpop.f32.mrf.mxu0 }
 0x1b0   : > { %v6492_v51 = vpop.f32.mrf.mxu0 }
 0x1b6   : > { %v2601_v45 = vpop.f32.mrf.mxu1 }
 0x1b7   : > { %v8456_v15 = vadd.f32 %v8435_v13, %v2601_v45 }
 0x1b8   : > { %v6511_v43 = vpop.f32.mrf.mxu1 }
 0x1ba   : > { %v2604_v59 = vpop.f32.mrf.mxu1  ;;  %v2569_v37 = vpop.f32.mrf.mxu0 }
 0x1bb   : > { %v8459_v3 = vadd.f32 %v8435_v13, %v2604_v59  ;;  %v2557_v59 = vadd.f32 %v8435_v13, %v8443_v24 }
 0x1bc   : > { %v6512_v12 = vpop.f32.mrf.mxu1  ;;  %v6495_v8 = vpop.f32.mrf.mxu0 }
 0x1be   : > { %v2609_v5 = vpop.f32.mrf.mxu1  ;;  %v8461_v44 = vpop.f32.mrf.mxu0 }
 0x1bf   : > { %v8464_v33 = vadd.f32 %v8435_v13, %v2609_v5  ;;  %v2562_v5 = vadd.f32 %v8435_v13, %v8451_v58  ;;  %v8508_v58 = vadd.f32 %v8435_v13, %v8461_v44 }
 0x1c0   : > { %v6515_v23 = vpop.f32.mrf.mxu1  ;;  %v6496_v22 = vpop.f32.mrf.mxu0 }
 0x1c1   : > { %v8499_v23 = vadd.f32 %v8435_v13, %v8453_v62  ;;  %v8502_v22 = vadd.f32 %v8435_v13, %v2569_v37 }
 0x1c2   : > { %v2612_v47 = vpop.f32.mrf.mxu1  ;;  %v2577_v4 = vpop.f32.mrf.mxu0 }
 0x1c3   : > { %v8467_v55 = vadd.f32 %v8435_v13, %v2612_v47  ;;  %v8470_v52 = vadd.f32 %v8435_v13, %v2577_v4 }
 0x1c4   : > { %v6516_v14 = vpop.f32.mrf.mxu1  ;;  %v6499_v56 = vpop.f32.mrf.mxu0 }
 0x1c6   : > { %v2580_v28 = vpop.f32.mrf.mxu0 }
 0x1c7   : > { %v8473_v16 = vadd.f32 %v8435_v13, %v2580_v28 }
 0x1c8   : > { %v6500_v25 = vpop.f32.mrf.mxu0 }
 0x1c9   : > { %v3177_v10 = vpop.f32.mrf.mxu1 }
 0x1ca   : > { %v3248_v6 = vadd.f32 %v3177_v10, %v2546_v38 }
 0x1cb   : > { %v6521_v9 = vpop.f32.mrf.mxu1 }
 0x1cd   : > { %v3180_v53 = vpop.f32.mrf.mxu1 }
 0x1ce   : > { %v3810_v60 = vpop.f32.mrf.mxu0  ;;  %v3249_v54 = vadd.f32 %v3180_v53, %v2549_v20 }
 0x1cf   : > { %v3881_v61 = vadd.f32 %v3810_v60, %v3248_v6  ;;  %v6522_v2 = vpop.f32.mrf.mxu1 }
 0x1d0   : > { %v6559_v35 = vpop.f32.mrf.mxu0 }
 0x1d1   : > { %v3917_v19 = vcombine.high %v3881_v61, %v3881_v61  ;;  %v3924_v39 = vrot.slane %v3881_v61, %v8477_v42 }
 0x1d2   : > { %v3185_v34 = vpop.f32.mrf.mxu1  ;;  %v3813_v49 = vpop.f32.mrf.mxu0 }
 0x1d3   : > { %v3931_v50 = vrot.slane %v3917_v19, %v8477_v42  ;;  %v3932_v48 = vcombine.high %v3924_v39, %v3924_v39  ;;  %v3882_v31 = vadd.f32 %v3813_v49, %v3249_v54  ;;  %v3250_v51 = vadd.f32 %v3185_v34, %v2554_v63 }
 0x1d4   : > { %v6525_v11 = vpop.f32.mrf.mxu1  ;;  %v6560_v46 = vpop.f32.mrf.mxu0 }
 0x1d5   : > { %v3933_v17 = vcombine.high %v3931_v50, %v3931_v50  ;;  %v4223_v18 = vcombine.low %v3924_v39, %v3932_v48  ;;  %v3934_v27 = vcombine.high %v3882_v31, %v3882_v31  ;;  %v3941_v30 = vrot.slane %v3882_v31, %v8477_v42 }
 0x1d6   : > { %v3188_v45 = vpop.f32.mrf.mxu1  ;;  %v3818_v43 = vpop.f32.mrf.mxu0 }
 0x1d7   : > { %v4224_v7 = vcombine.low %v3931_v50, %v3933_v17  ;;  %v3948_v12 = vrot.slane %v3934_v27, %v8477_v42  ;;  %v3949_v8 = vcombine.high %v3941_v30, %v3941_v30  ;;  %v3883_v47 = vadd.f32 %v3818_v43, %v3250_v51 }
 0x1d8   : > { %v6526_v4 = vpop.f32.mrf.mxu1  ;;  %v6563_v14 = vpop.f32.mrf.mxu0  ;;  %v4231_v24 = vrot.slane %v4223_v18, %v8477_v42  ;;  %v3251_v28 = vadd.f32 %v3188_v45, %v2557_v59 }
 0x1d9   : > { %v4238_v56 = vrot.slane %v4224_v7, %v8477_v42  ;;  %v3950_v36 = vcombine.high %v3948_v12, %v3948_v12  ;;  %v4240_v41 = vcombine.low %v3941_v30, %v3949_v8  ;;  %v3951_v62 = vcombine.high %v3883_v47, %v3883_v47 }
 0x1da   : > { %v3958_v25 = vrot.slane %v3883_v47, %v8477_v42  ;;  %v3193_v37 = vpop.f32.mrf.mxu1  ;;  %v3821_v10 = vpop.f32.mrf.mxu0 }
 0x1db   : > { %v4239_v32 = vcombine.low %v4231_v24, %v4238_v56  ;;  %v6393_v38 = vcombine.low %v4238_v56, %v4238_v56  ;;  %v4241_v9 = vcombine.low %v3948_v12, %v3950_v36  ;;  %v4248_v6 = vrot.slane %v4240_v41, %v8477_v42 }
 0x1dc   : > { %v8520_v13 = vrot.slane %v3951_v62, %v8477_v42  ;;  %v3966_v44 = vcombine.high %v3958_v25, %v3958_v25  ;;  %v4263_v53 = vrot.slane %v3958_v25, %v8477_v42  ;;  %v8523_v21 = vadd.f32 %v3193_v37, %v2562_v5  ;;  %v6529_v60 = vpop.f32.mrf.mxu1  ;;  %v6564_v20 = vpop.f32.mrf.mxu0 }
 0x1dd   : > { %v6417_v61 = vpack.c.bf16 %v4239_v32, %v4239_v32  ;;  %v4760_v2 = vrot.slane %v4239_v32, %v8477_v42  ;;  %v4767_v35 = vrot.slane %v6393_v38, %v8477_v42  ;;  %v4255_v54 = vrot.slane %v4241_v9, %v8477_v42 }
 0x1de   : > { %v8529_v19 = vcombine.low %v3966_v44, %v8520_v13  ;;  %v6419_v39 = vpack.c.bf16 %v4263_v53, %v4263_v53  ;;  %v3884_v34 = vadd.f32 %v3821_v10, %v3251_v28  ;;  %v3967_v49 = vcombine.high %v8520_v13, %v8520_v13  ;;  %v3196_v50 = vpop.f32.mrf.mxu1  ;;  %v3826_v48 = vpop.f32.mrf.mxu0 }
 0x1df   : > { %4680 = vst.msk [vmem:[%s8517_s28] sm:$0xf] %vm4679_vm9, %v6417_v61  ;;  %v4768_v31 = vcombine.high %v4760_v2, %v4760_v2  ;;  %v4769_v63 = vcombine.high %v4767_v35, %v4767_v35  ;;  %v5519_v11 = vmul.f32 %v4760_v2, %v4760_v2  ;;  %v5521_v46 = vmul.f32 %v4767_v35, %v4767_v35 }
 0x1e0   : > { %v4256_v17 = vcombine.low %v4248_v6, %v4255_v54  ;;  %v6394_v18 = vcombine.low %v4255_v54, %v4255_v54  ;;  %v4272_v27 = vrot.slane %v8529_v19, %v8477_v42  ;;  %4683 = vst.msk [vmem:[%s8517_s28 + $0x8] sm:$0x1] %vm4682_vm10, %v6419_v39  ;;  %v3968_v30 = vcombine.high %v3884_v34, %v3884_v34  ;;  %v6530_v51 = vpop.f32.mrf.mxu1  ;;  %v6567_v45 = vpop.f32.mrf.mxu0 }
 0x1e1   : > { %v5153_v43 = vcombine.low %v4760_v2, %v4768_v31  ;;  %v5154_v59 = vcombine.low %v4767_v35, %v4769_v63  ;;  %v5520_v7 = vmul.f32 %v4768_v31, %v4768_v31  ;;  %v5522_v12 = vmul.f32 %v4769_v63, %v4769_v63 }
 0x1e2   : > { %v6418_v8 = vpack.c.bf16 %v4256_v17, %v4256_v17  ;;  %v4777_v5 = vrot.slane %v4256_v17, %v8477_v42  ;;  %v4784_v47 = vrot.slane %v6394_v18, %v8477_v42  ;;  %v3975_v4 = vrot.slane %v3884_v34, %v8477_v42  ;;  %v8542_v14 = vpop.f32.mrf.mxu1  ;;  %v8544_v24 = vpop.f32.mrf.mxu0 }
 0x1e3   : > { %v5161_v56 = vrot.slane %v5153_v43, %v8477_v42  ;;  %v5168_v36 = vrot.slane %v5154_v59, %v8477_v42  ;;  %v5663_v41 = vcombine.low %v5519_v11, %v5520_v7  ;;  %v5664_v28 = vcombine.low %v5521_v46, %v5522_v12 }
 0x1e4   : > { %4681 = vst.msk [vmem:[%s8517_s28 + $0x4] sm:$0xf] %vm4679_vm9, %v6418_v8  ;;  %v4785_v62 = vcombine.high %v4777_v5, %v4777_v5  ;;  %v4786_v25 = vcombine.high %v4784_v47, %v4784_v47  ;;  %v5523_v37 = vmul.f32 %v4777_v5, %v4777_v5  ;;  %v5525_v10 = vmul.f32 %v4784_v47, %v4784_v47  ;;  %v6533_v32 = vpop.f32.mrf.mxu1  ;;  %v6568_v38 = vpop.f32.mrf.mxu0 }
 0x1e5   : > { %v5169_v9 = vcombine.low %v5161_v56, %v5168_v36  ;;  %v5671_v6 = vrot.slane %v5663_v41, %v8477_v42  ;;  %v5678_v13 = vrot.slane %v5664_v28, %v8477_v42  ;;  %v3982_v44 = vrot.slane %v3968_v30, %v8477_v42 }
 0x1e6   : > { %v5170_v53 = vcombine.low %v4777_v5, %v4785_v62  ;;  %v5171_v60 = vcombine.low %v4784_v47, %v4786_v25  ;;  %v5524_v20 = vmul.f32 %v4785_v62, %v4785_v62  ;;  %v5526_v61 = vmul.f32 %v4786_v25, %v4786_v25  ;;  %v8553_v2 = vpop.f32.mrf.mxu1 }
 0x1e7   : > { %v8555_v35 = vpop.f32.mrf.mxu0  ;;  %v5477_v54 = vsel %vm2377_vm4, %v5169_v9, 0.0  ;;  %v5679_v19 = vcombine.low %v5671_v6, %v5678_v13  ;;  %v3983_v39 = vcombine.high %v3975_v4, %v3975_v4  ;;  %v4265_v34 = vcombine.low %v3967_v49, %v3975_v4 }
 0x1e8   : > { %v5178_v31 = vrot.slane %v5170_v53, %v8477_v42  ;;  %v5185_v63 = vrot.slane %v5171_v60, %v8477_v42  ;;  %v5680_v11 = vcombine.low %v5523_v37, %v5524_v20  ;;  %v5681_v46 = vcombine.low %v5525_v10, %v5526_v61  ;;  %v6534_v17 = vpop.f32.mrf.mxu1 }
 0x1e9   : > { %v6571_v18 = vpop.f32.mrf.mxu0  ;;  %v5987_v30 = vsel %vm2377_vm4, %v5679_v19, 0.0  ;;  %v4279_v51 = vrot.slane %v4265_v34, %v8477_v42  ;;  %v4281_v45 = vcombine.low %v3983_v39, %v3982_v44  ;;  %v8563_v43 = vadd.f32 %v3196_v50, %v8499_v23 }
 0x1ea   : > { %v5186_v59 = vcombine.low %v5178_v31, %v5185_v63  ;;  %v5688_v7 = vrot.slane %v5680_v11, %v8477_v42  ;;  %v5695_v49 = vrot.slane %v5681_v46, %v8477_v42  ;;  %v3885_v12 = vadd.f32 %v3826_v48, %v8523_v21 }
 0x1eb   : > { %v3209_v8 = vpop.f32.mrf.mxu1  ;;  %v8568_v5 = vpop.f32.mrf.mxu0  ;;  %v4280_v47 = vcombine.low %v4272_v27, %v4279_v51  ;;  %v4289_v4 = vrot.slane %v4281_v45, %v8477_v42  ;;  %v6395_v56 = vcombine.low %v4279_v51, %v4279_v51  ;;  %v3984_v36 = vcombine.high %v3982_v44, %v3982_v44 }
 0x1ec   : > { %v5478_v41 = vsel %vm2377_vm4, %v5186_v59, 0.0  ;;  %v5696_v28 = vcombine.low %v5688_v7, %v5695_v49  ;;  %v3985_v23 = vcombine.high %v3885_v12, %v3885_v12  ;;  %v3992_v50 = vrot.slane %v3885_v12, %v8477_v42 }
 0x1ed   : > { %v6537_v62 = vpop.f32.mrf.mxu1  ;;  %v6572_v25 = vpop.f32.mrf.mxu0  ;;  %v5479_v37 = vadd.f32 %v5478_v41, %v5477_v54  ;;  %v6420_v10 = vpack.c.bf16 %v4280_v47, %v4280_v47  ;;  %v4801_v21 = vrot.slane %v4280_v47, %v8477_v42  ;;  %v4808_v48 = vrot.slane %v6395_v56, %v8477_v42 }
 0x1ee   : > { %v5988_v27 = vsel %vm2377_vm4, %v5696_v28, 0.0  ;;  %v3999_v32 = vrot.slane %v3985_v23, %v8477_v42  ;;  %v4000_v38 = vcombine.high %v3992_v50, %v3992_v50  ;;  %v4282_v9 = vcombine.low %v3984_v36, %v3992_v50 }
 0x1ef   : > { %v8577_v6 = vpop.f32.mrf.mxu1  ;;  %v8579_v13 = vpop.f32.mrf.mxu0  ;;  %v5989_v44 = vadd.f32 %v5988_v27, %v5987_v30  ;;  %4684 = vst.msk [vmem:[%s8517_s28 + $0xc] sm:$0xf] %vm4679_vm9, %v6420_v10  ;;  %v4809_v53 = vcombine.high %v4801_v21, %v4801_v21  ;;  %v4810_v60 = vcombine.high %v4808_v48, %v4808_v48  ;;  %v5187_v20 = vcombine.low %v8483_v57, %v4801_v21 }
 0x1f0   : > { %v5528_v61 = vmul.f32 %v4801_v21, %v4801_v21  ;;  %v5530_v54 = vmul.f32 %v4808_v48, %v4808_v48  ;;  %v4001_v19 = vcombine.high %v3999_v32, %v3999_v32  ;;  %v4296_v39 = vrot.slane %v4282_v9, %v8477_v42 }
 0x1f1   : > { %v6538_v34 = vpop.f32.mrf.mxu1  ;;  %v6575_v31 = vpop.f32.mrf.mxu0  ;;  %v5188_v63 = vcombine.low %v4809_v53, %v4808_v48  ;;  %v5195_v11 = vrot.slane %v5187_v20, %v8477_v42  ;;  %v5529_v46 = vmul.f32 %v4809_v53, %v4809_v53  ;;  %v5531_v17 = vmul.f32 %v4810_v60, %v4810_v60 }
 0x1f2   : > { %v5697_v18 = vcombine.low %v8490_v40, %v5528_v61  ;;  %v4297_v30 = vcombine.low %v4289_v4, %v4296_v39  ;;  %v4304_v51 = vrot.slane %v4000_v38, %v8477_v42  ;;  %v8588_v45 = vcombine.low %v3999_v32, %v4001_v19 }
 0x1f3   : > { %v8590_v59 = vpop.f32.mrf.mxu1  ;;  %v8592_v7 = vpop.f32.mrf.mxu0  ;;  %v5202_v49 = vrot.slane %v5188_v63, %v8477_v42  ;;  %v5698_v12 = vcombine.low %v5529_v46, %v5530_v54  ;;  %v6396_v47 = vcombine.low %v4296_v39, %v4296_v39  ;;  %v3254_v56 = vadd.f32 %v8542_v14, %v8502_v22 }
 0x1f4   : > { %v5705_v36 = vrot.slane %v5697_v18, %v8477_v42  ;;  %v4313_v4 = vrot.slane %v8588_v45, %v8477_v42  ;;  %v6421_v41 = vpack.c.bf16 %v4297_v30, %v4297_v30  ;;  %v6422_v28 = vpack.c.bf16 %v4304_v51, %v4304_v51 }
 0x1f5   : > { %v6541_v23 = vpop.f32.mrf.mxu1  ;;  %v6576_v50 = vpop.f32.mrf.mxu0  ;;  %v5203_v62 = vcombine.low %v5195_v11, %v5202_v49  ;;  %v5712_v25 = vrot.slane %v5698_v12, %v8477_v42  ;;  %v4818_v10 = vrot.slane %v4297_v30, %v8477_v42  ;;  %v4825_v21 = vrot.slane %v6396_v47, %v8477_v42 }
 0x1f6   : > { %4685 = vst.msk [vmem:[%s8517_s28 + $0x10] sm:$0xf] %vm4679_vm9, %v6421_v41  ;;  %v3886_v22 = vadd.f32 %v8544_v24, %v8563_v43  ;;  %v3255_v14 = vadd.f32 %v8553_v2, %v8508_v58  ;;  %v3887_v48 = vadd.f32 %v8555_v35, %v3254_v56  ;;  %v8613_v27 = vadd.f32 %v3209_v8, %v8470_v52 }
 0x1f7   : > { %4686 = vst.msk [vmem:[%s8517_s28 + $0x14] sm:$0x1] %vm4682_vm10, %v6422_v28  ;;  %v8615_v32 = vpop.f32.mrf.mxu1  ;;  %v8617_v38 = vpop.f32.mrf.mxu0  ;;  %v5480_v9 = vsel %vm2377_vm4, %v5203_v62, 0.0  ;;  %v5713_v53 = vcombine.low %v5705_v36, %v5712_v25  ;;  %v4826_v20 = vcombine.high %v4818_v10, %v4818_v10  ;;  %v4827_v61 = vcombine.high %v4825_v21, %v4825_v21 }
 0x1f8   : > { %v5481_v54 = vadd.f32 %v5480_v9, %v5479_v37  ;;  %v5204_v19 = vcombine.low %v4810_v60, %v4818_v10  ;;  %v5532_v24 = vmul.f32 %v4818_v10, %v4818_v10  ;;  %v5534_v43 = vmul.f32 %v4825_v21, %v4825_v21 }
 0x1f9   : > { %v6542_v39 = vpop.f32.mrf.mxu1  ;;  %v6579_v58 = vpop.f32.mrf.mxu0  ;;  %v5990_v2 = vsel %vm2377_vm4, %v5713_v53, 0.0  ;;  %v5205_v35 = vcombine.low %v4826_v20, %v4825_v21  ;;  %v5221_v52 = vcombine.low %v4827_v61, %v8483_v57  ;;  %v5533_v8 = vmul.f32 %v4826_v20, %v4826_v20 }
 0x1fa   : > { %v5991_v34 = vadd.f32 %v5990_v2, %v5989_v44  ;;  %v5212_v31 = vrot.slane %v5204_v19, %v8477_v42  ;;  %v5535_v63 = vmul.f32 %v4827_v61, %v4827_v61  ;;  %v5714_v11 = vcombine.low %v5531_v17, %v5532_v24 }
 0x1fb   : > { %v8623_v46 = vpop.f32.mrf.mxu1  ;;  %v8625_v18 = vpop.f32.mrf.mxu0  ;;  %v5219_v37 = vrot.slane %v5205_v35, %v8477_v42  ;;  %v8629_v60 = vrot.slane %v5221_v52, %v8477_v42  ;;  %v5715_v30 = vcombine.low %v5533_v8, %v5534_v43  ;;  %v4002_v51 = vcombine.high %v3886_v22, %v3886_v22 }
 0x1fc   : > { %v5722_v49 = vrot.slane %v5714_v11, %v8477_v42  ;;  %v5731_v12 = vcombine.low %v5535_v63, %v8490_v40  ;;  %v4009_v44 = vrot.slane %v3886_v22, %v8477_v42  ;;  %v4019_v47 = vcombine.high %v3887_v48, %v3887_v48 }
 0x1fd   : > { %v6545_v56 = vpop.f32.mrf.mxu1  ;;  %v6580_v17 = vpop.f32.mrf.mxu0  ;;  %v5220_v36 = vcombine.low %v5212_v31, %v5219_v37  ;;  %v5729_v41 = vrot.slane %v5715_v30, %v8477_v42  ;;  %v4016_v28 = vrot.slane %v4002_v51, %v8477_v42  ;;  %v4026_v23 = vrot.slane %v3887_v48, %v8477_v42 }
 0x1fe   : > { %v8638_v50 = vrot.slane %v5731_v12, %v8477_v42  ;;  %v4017_v62 = vcombine.high %v4009_v44, %v4009_v44  ;;  %v4033_v25 = vrot.slane %v4019_v47, %v8477_v42  ;;  %v3888_v10 = vadd.f32 %v8568_v5, %v3255_v14 }
 0x1ff   : > { %v8642_v21 = vpop.f32.mrf.mxu1  ;;  %v8644_v22 = vpop.f32.mrf.mxu0  ;;  %v5482_v9 = vsel %vm2377_vm4, %v5220_v36, 0.0  ;;  %v5730_v53 = vcombine.low %v5722_v49, %v5729_v41  ;;  %v4018_v20 = vcombine.high %v4016_v28, %v4016_v28  ;;  %v4034_v61 = vcombine.high %v4026_v23, %v4026_v23 }
 0x200   : > { %v8647_v19 = vadd.f32 %v5482_v9, %v5481_v54  ;;  %v4306_v48 = vcombine.low %v4009_v44, %v4017_v62  ;;  %v4345_v24 = vrot.slane %v4033_v25, %v8477_v42  ;;  %v4035_v43 = vcombine.high %v4033_v25, %v4033_v25 }
 0x201   : > { %v6546_v39 = vpop.f32.mrf.mxu1  ;;  %v6583_v58 = vpop.f32.mrf.mxu0  ;;  %v5992_v2 = vsel %vm2377_vm4, %v5730_v53, 0.0  ;;  %v4322_v5 = vcombine.low %v4016_v28, %v4018_v20  ;;  %v4323_v14 = vcombine.low %v4026_v23, %v4034_v61  ;;  %v4036_v35 = vcombine.high %v3888_v10, %v3888_v10 }
 0x202   : > { %v8651_v52 = vadd.f32 %v5992_v2, %v5991_v34  ;;  %v4320_v8 = vrot.slane %v4306_v48, %v8477_v42  ;;  %v6425_v31 = vpack.c.bf16 %v4345_v24, %v4345_v24  ;;  %v4043_v54 = vrot.slane %v3888_v10, %v8477_v42 }
 0x203   : > { %v8655_v63 = vpop.f32.mrf.mxu1  ;;  %v8657_v11 = vpop.f32.mrf.mxu0  ;;  %v4330_v37 = vrot.slane %v4322_v5, %v8477_v42  ;;  %v4337_v30 = vrot.slane %v4323_v14, %v8477_v42  ;;  %v8662_v51 = vrot.slane %v4036_v35, %v8477_v42  ;;  %v8666_v34 = vadd.f32 %v8577_v6, %v8473_v16 }
 0x204   : > { %v4321_v49 = vcombine.low %v4313_v4, %v4320_v8  ;;  %v6397_v12 = vcombine.low %v4320_v8, %v4320_v8  ;;  %4689 = vst.msk [vmem:[%s8517_s28 + $0x20] sm:$0x1] %vm4682_vm10, %v6425_v31  ;;  %v4051_v44 = vcombine.high %v4043_v54, %v4043_v54  ;;  %v4346_v47 = vcombine.low %v4035_v43, %v4043_v54 }
 0x205   : > { %v6549_v56 = vpop.f32.mrf.mxu1  ;;  %v6584_v17 = vpop.f32.mrf.mxu0  ;;  %v4338_v36 = vcombine.low %v4330_v37, %v4337_v30  ;;  %v6398_v41 = vcombine.low %v4337_v30, %v4337_v30  ;;  %v8675_v28 = vadd.f32 %v8579_v13, %v8613_v27  ;;  %v4052_v16 = vcombine.high %v8662_v51, %v8662_v51 }
 0x206   : > { %v6423_v6 = vpack.c.bf16 %v4321_v49, %v4321_v49  ;;  %v4842_v45 = vrot.slane %v4321_v49, %v8477_v42  ;;  %v4849_v4 = vrot.slane %v6397_v12, %v8477_v42  ;;  %v4347_v23 = vcombine.low %v4051_v44, %v8662_v51 }
 0x207   : > { %v8682_v62 = vpop.f32.mrf.mxu1  ;;  %v8684_v25 = vpop.f32.mrf.mxu0  ;;  %v6424_v10 = vpack.c.bf16 %v4338_v36, %v4338_v36  ;;  %v4859_v9 = vrot.slane %v4338_v36, %v8477_v42  ;;  %v4866_v13 = vrot.slane %v6398_v41, %v8477_v42  ;;  %v4354_v27 = vrot.slane %v4346_v47, %v8477_v42 }
 0x208   : > { %4687 = vst.msk [vmem:[%s8517_s28 + $0x18] sm:$0xf] %vm4679_vm9, %v6423_v6  ;;  %v4850_v53 = vcombine.high %v4842_v45, %v4842_v45  ;;  %v4851_v20 = vcombine.high %v4849_v4, %v4849_v4  ;;  %v5537_v61 = vmul.f32 %v4842_v45, %v4842_v45  ;;  %v5539_v48 = vmul.f32 %v4849_v4, %v4849_v4 }
 0x209   : > { %v6550_v24 = vpop.f32.mrf.mxu1  ;;  %v6587_v43 = vpop.f32.mrf.mxu0  ;;  %4688 = vst.msk [vmem:[%s8517_s28 + $0x1c] sm:$0xf] %vm4679_vm9, %v6424_v10  ;;  %v4867_v39 = vcombine.high %v4859_v9, %v4859_v9  ;;  %v4868_v58 = vcombine.high %v4866_v13, %v4866_v13  ;;  %v5541_v2 = vmul.f32 %v4859_v9, %v4859_v9  ;;  %v5543_v5 = vmul.f32 %v4866_v13, %v4866_v13 }
 0x20a   : > { %v5222_v14 = vcombine.low %v4842_v45, %v4850_v53  ;;  %v5238_v35 = vcombine.low %v4849_v4, %v4851_v20  ;;  %v5538_v8 = vmul.f32 %v4850_v53, %v4850_v53  ;;  %v5540_v31 = vmul.f32 %v4851_v20, %v4851_v20 }
 0x20b   : > { %v8693_v54 = vpop.f32.mrf.mxu1  ;;  %v8695_v37 = vpop.f32.mrf.mxu0  ;;  %v5239_v30 = vcombine.low %v4859_v9, %v4867_v39  ;;  %v5255_v49 = vcombine.low %v4866_v13, %v4868_v58  ;;  %v5542_v12 = vmul.f32 %v4867_v39, %v4867_v39  ;;  %v5544_v44 = vmul.f32 %v4868_v58, %v4868_v58 }
 0x20c   : > { %v5236_v47 = vrot.slane %v5222_v14, %v8477_v42  ;;  %v5246_v56 = vrot.slane %v5238_v35, %v8477_v42  ;;  %v5732_v17 = vcombine.low %v5537_v61, %v5538_v8  ;;  %v5748_v36 = vcombine.low %v5539_v48, %v5540_v31 }
 0x20d   : > { %v6553_v41 = vpop.f32.mrf.mxu1  ;;  %v6588_v6 = vpop.f32.mrf.mxu0  ;;  %v5253_v45 = vrot.slane %v5239_v30, %v8477_v42  ;;  %v5263_v4 = vrot.slane %v5255_v49, %v8477_v42  ;;  %v5749_v10 = vcombine.low %v5541_v2, %v5542_v12  ;;  %v5765_v53 = vcombine.low %v5543_v5, %v5544_v44 }
 0x20e   : > { %v5237_v20 = vcombine.low %v8629_v60, %v5236_v47  ;;  %v5746_v9 = vrot.slane %v5732_v17, %v8477_v42  ;;  %v5756_v13 = vrot.slane %v5748_v36, %v8477_v42  ;;  %v4361_v24 = vrot.slane %v4347_v23, %v8477_v42 }
 0x20f   : > { %v8705_v43 = vpop.f32.mrf.mxu1  ;;  %v8707_v61 = vpop.f32.mrf.mxu0  ;;  %v5254_v48 = vcombine.low %v5246_v56, %v5253_v45  ;;  %v5763_v39 = vrot.slane %v5749_v10, %v8477_v42  ;;  %v5773_v58 = vrot.slane %v5765_v53, %v8477_v42  ;;  %v4053_v2 = vcombine.high %v8675_v28, %v8675_v28 }
 0x210   : > { %v5484_v60 = vsel %vm2377_vm4, %v5237_v20, 0.0  ;;  %v5747_v5 = vcombine.low %v8638_v50, %v5746_v9  ;;  %v4362_v14 = vcombine.low %v4354_v27, %v4361_v24  ;;  %v6399_v35 = vcombine.low %v4361_v24, %v4361_v24 }
 0x211   : > { %v6554_v23 = vpop.f32.mrf.mxu1  ;;  %v6591_v8 = vpop.f32.mrf.mxu0  ;;  %v5485_v31 = vadd.f32 %v5484_v60, %v8647_v19  ;;  %v5486_v30 = vsel %vm2377_vm4, %v5254_v48, 0.0  ;;  %v5764_v49 = vcombine.low %v5756_v13, %v5763_v39  ;;  %v4060_v12 = vrot.slane %v8675_v28, %v8477_v42 }
 0x212   : > { %v5994_v44 = vsel %vm2377_vm4, %v5747_v5, 0.0  ;;  %v6426_v47 = vpack.c.bf16 %v4362_v14, %v4362_v14  ;;  %v4883_v56 = vrot.slane %v4362_v14, %v8477_v42  ;;  %v4890_v50 = vrot.slane %v6399_v35, %v8477_v42 }
 0x213   : > { %v8722_v27 = vpop.f32.mrf.mxu0  ;;  %v5995_v17 = vadd.f32 %v5994_v44, %v8651_v52  ;;  %v5487_v36 = vadd.f32 %v5486_v30, %v5485_v31  ;;  %v5996_v19 = vsel %vm2377_vm4, %v5764_v49, 0.0  ;;  %v4067_v41 = vrot.slane %v4053_v2, %v8477_v42 }
 0x214   : > { %4690 = vst.msk [vmem:[%s8517_s28 + $0x24] sm:$0xf] %vm4679_vm9, %v6426_v47  ;;  %v4891_v6 = vcombine.high %v4883_v56, %v4883_v56  ;;  %v5256_v28 = vcombine.low %v8483_v57, %v4883_v56  ;;  %v5546_v45 = vmul.f32 %v4883_v56, %v4883_v56  ;;  %v5548_v10 = vmul.f32 %v4890_v50, %v4890_v50 }
 0x215   : > { %v6592_v53 = vpop.f32.mrf.mxu0  ;;  %v5997_v20 = vadd.f32 %v5996_v19, %v5995_v17  ;;  %v4068_v9 = vcombine.high %v4060_v12, %v4060_v12  ;;  %v4069_v13 = vcombine.high %v4067_v41, %v4067_v41  ;;  %v4363_v52 = vcombine.low %v4052_v16, %v4060_v12 }
 0x216   : > { %v5270_v24 = vrot.slane %v5256_v28, %v8477_v42  ;;  %v5272_v48 = vcombine.low %v4891_v6, %v4890_v50  ;;  %v5547_v39 = vmul.f32 %v4891_v6, %v4891_v6  ;;  %v5766_v2 = vcombine.low %v8490_v40, %v5546_v45 }
 0x217   : > { %v4364_v60 = vcombine.low %v4068_v9, %v4067_v41  ;;  %v4371_v5 = vrot.slane %v4363_v52, %v8477_v42  ;;  %v4386_v14 = vrot.slane %v4069_v13, %v8477_v42  ;;  %v4892_v35 = vcombine.high %v4890_v50, %v4890_v50 }
 0x218   : > { %v5271_v23 = vcombine.low %v5263_v4, %v5270_v24  ;;  %v5280_v8 = vrot.slane %v5272_v48, %v8477_v42  ;;  %v5780_v31 = vrot.slane %v5766_v2, %v8477_v42  ;;  %v5782_v51 = vcombine.low %v5547_v39, %v5548_v10 }
 0x219   : > { %v4378_v16 = vrot.slane %v4364_v60, %v8477_v42  ;;  %v6428_v30 = vpack.c.bf16 %v4386_v14, %v4386_v14  ;;  %v5549_v49 = vmul.f32 %v4892_v35, %v4892_v35  ;;  %v3258_v12 = vadd.f32 %v8590_v59, %v8438_v0 }
 0x21a   : > { %v5488_v44 = vsel %vm2377_vm4, %v5271_v23, 0.0  ;;  %v5781_v47 = vcombine.low %v5773_v58, %v5780_v31  ;;  %v5790_v56 = vrot.slane %v5782_v51, %v8477_v42  ;;  %v3890_v4 = vadd.f32 %v8592_v7, %v8666_v34 }
 0x21b   : > { %v5489_v50 = vadd.f32 %v5488_v44, %v5487_v36  ;;  %v4379_v17 = vcombine.low %v4371_v5, %v4378_v16  ;;  %4692 = vst.msk [vmem:[%s8517_s28 + $0x2c] sm:$0x1] %vm4682_vm10, %v6428_v30  ;;  %v6400_v19 = vcombine.low %v4378_v16, %v4378_v16  ;;  %v8750_v41 = vadd.f32 %v8615_v32, %v8441_v26 }
 0x21c   : > { %v5998_v0 = vsel %vm2377_vm4, %v5781_v47, 0.0  ;;  %v4070_v59 = vcombine.high %v3890_v4, %v3890_v4  ;;  %v4077_v58 = vrot.slane %v3890_v4, %v8477_v42  ;;  %v3891_v6 = vadd.f32 %v8617_v38, %v3258_v12 }
 0x21d   : > { %v5999_v28 = vadd.f32 %v5998_v0, %v5997_v20  ;;  %v6427_v45 = vpack.c.bf16 %v4379_v17, %v4379_v17  ;;  %v4900_v7 = vrot.slane %v4379_v17, %v8477_v42  ;;  %v4907_v34 = vrot.slane %v6400_v19, %v8477_v42 }
 0x21e   : > { %v4084_v36 = vrot.slane %v4070_v59, %v8477_v42  ;;  %v4085_v10 = vcombine.high %v4077_v58, %v4077_v58  ;;  %v4087_v53 = vcombine.high %v3891_v6, %v3891_v6  ;;  %v4094_v26 = vrot.slane %v3891_v6, %v8477_v42 }
 0x21f   : > { %4691 = vst.msk [vmem:[%s8517_s28 + $0x28] sm:$0xf] %vm4679_vm9, %v6427_v45  ;;  %v4908_v32 = vcombine.high %v4900_v7, %v4900_v7  ;;  %v4909_v9 = vcombine.high %v4907_v34, %v4907_v34  ;;  %v5273_v13 = vcombine.low %v4892_v35, %v4900_v7  ;;  %v5550_v52 = vmul.f32 %v4900_v7, %v4900_v7 }
 0x220   : > { %v5552_v24 = vmul.f32 %v4907_v34, %v4907_v34  ;;  %v4086_v38 = vcombine.high %v4084_v36, %v4084_v36  ;;  %v4387_v20 = vcombine.low %v4077_v58, %v4085_v10  ;;  %v4101_v48 = vrot.slane %v4087_v53, %v8477_v42 }
 0x221   : > { %v5287_v39 = vrot.slane %v5273_v13, %v8477_v42  ;;  %v5289_v2 = vcombine.low %v4908_v32, %v4907_v34  ;;  %v5290_v60 = vcombine.low %v4909_v9, %v8483_v57  ;;  %v5551_v5 = vmul.f32 %v4908_v32, %v4908_v32 }
 0x222   : > { %v5553_v14 = vmul.f32 %v4909_v9, %v4909_v9  ;;  %v5783_v23 = vcombine.low %v5549_v49, %v5550_v52  ;;  %v4388_v31 = vcombine.low %v4084_v36, %v4086_v38  ;;  %v4395_v51 = vrot.slane %v4387_v20, %v8477_v42 }
 0x223   : > { %v5288_v16 = vcombine.low %v5280_v8, %v5287_v39  ;;  %v5297_v35 = vrot.slane %v5289_v2, %v8477_v42  ;;  %v5304_v30 = vrot.slane %v5290_v60, %v8477_v42  ;;  %v5799_v12 = vcombine.low %v5551_v5, %v5552_v24 }
 0x224   : > { %v5797_v44 = vrot.slane %v5783_v23, %v8477_v42  ;;  %v5800_v47 = vcombine.low %v5553_v14, %v8490_v40  ;;  %v4402_v4 = vrot.slane %v4388_v31, %v8477_v42  ;;  %v4102_v17 = vcombine.high %v4094_v26, %v4094_v26 }
 0x225   : > { %v5305_v19 = vcombine.low %v5297_v35, %v5304_v30  ;;  %v5490_v0 = vsel %vm2377_vm4, %v5288_v16, 0.0  ;;  %v5807_v49 = vrot.slane %v5799_v12, %v8477_v42  ;;  %v4103_v59 = vcombine.high %v4101_v48, %v4101_v48 }
 0x226   : > { %v5491_v58 = vadd.f32 %v5490_v0, %v5489_v50  ;;  %v5798_v8 = vcombine.low %v5790_v56, %v5797_v44  ;;  %v5814_v6 = vrot.slane %v5800_v47, %v8477_v42  ;;  %v4403_v45 = vcombine.low %v4395_v51, %v4402_v4 }
 0x227   : > { %v5492_v7 = vsel %vm2377_vm4, %v5305_v19, 0.0  ;;  %v6401_v34 = vcombine.low %v4402_v4, %v4402_v4  ;;  %v4404_v36 = vcombine.low %v4094_v26, %v4102_v17  ;;  %v4405_v10 = vcombine.low %v4101_v48, %v4103_v59 }
 0x228   : > { %v5815_v53 = vcombine.low %v5807_v49, %v5814_v6  ;;  %v6000_v32 = vsel %vm2377_vm4, %v5798_v8, 0.0  ;;  %v6429_v9 = vpack.c.bf16 %v4403_v45, %v4403_v45  ;;  %v4924_v13 = vrot.slane %v4403_v45, %v8477_v42 }
 0x229   : > { %v6001_v52 = vadd.f32 %v6000_v32, %v5999_v28  ;;  %v4931_v24 = vrot.slane %v6401_v34, %v8477_v42  ;;  %v5493_v50 = vadd.f32 %v5492_v7, %v5491_v58  ;;  %v4412_v56 = vrot.slane %v4404_v36, %v8477_v42 }
 0x22a   : > { %v6002_v38 = vsel %vm2377_vm4, %v5815_v53, 0.0  ;;  %4693 = vst.msk [vmem:[%s8517_s28 + $0x30] sm:$0xf] %vm4679_vm9, %v6429_v9  ;;  %v4932_v20 = vcombine.high %v4924_v13, %v4924_v13  ;;  %v5555_v39 = vmul.f32 %v4924_v13, %v4924_v13  ;;  %v4419_v26 = vrot.slane %v4405_v10, %v8477_v42 }
 0x22b   : > { %v4933_v48 = vcombine.high %v4931_v24, %v4931_v24  ;;  %v5557_v2 = vmul.f32 %v4931_v24, %v4931_v24  ;;  %v6003_v60 = vadd.f32 %v6002_v38, %v6001_v52  ;;  %v3260_v5 = vadd.f32 %v8623_v46, %v8446_v1 }
 0x22c   : > { %v5306_v28 = vcombine.low %v4924_v13, %v4932_v20  ;;  %v5556_v14 = vmul.f32 %v4932_v20, %v4932_v20  ;;  %v4420_v23 = vcombine.low %v4412_v56, %v4419_v26  ;;  %v6402_v31 = vcombine.low %v4419_v26, %v4419_v26 }
 0x22d   : > { %v5307_v51 = vcombine.low %v4931_v24, %v4933_v48  ;;  %v5558_v16 = vmul.f32 %v4933_v48, %v4933_v48  ;;  %v3892_v35 = vadd.f32 %v8625_v18, %v8750_v41  ;;  %v3261_v30 = vadd.f32 %v8642_v21, %v8449_v29 }
 0x22e   : > { %v5314_v12 = vrot.slane %v5306_v28, %v8477_v42  ;;  %v5816_v44 = vcombine.low %v5555_v39, %v5556_v14  ;;  %v6430_v47 = vpack.c.bf16 %v4420_v23, %v4420_v23  ;;  %v4941_v4 = vrot.slane %v4420_v23, %v8477_v42 }
 0x22f   : > { %v5321_v1 = vrot.slane %v5307_v51, %v8477_v42  ;;  %v5817_v46 = vcombine.low %v5557_v2, %v5558_v16  ;;  %v4948_v17 = vrot.slane %v6402_v31, %v8477_v42  ;;  %v4104_v19 = vcombine.high %v3892_v35, %v3892_v35 }
 0x230   : > { %v5824_v0 = vrot.slane %v5816_v44, %v8477_v42  ;;  %4694 = vst.msk [vmem:[%s8517_s28 + $0x34] sm:$0xf] %vm4679_vm9, %v6430_v47  ;;  %v4949_v18 = vcombine.high %v4941_v4, %v4941_v4  ;;  %v5559_v41 = vmul.f32 %v4941_v4, %v4941_v4  ;;  %v4111_v29 = vrot.slane %v3892_v35, %v8477_v42 }
 0x231   : > { %v5322_v21 = vcombine.low %v5314_v12, %v5321_v1  ;;  %v5831_v49 = vrot.slane %v5817_v46, %v8477_v42  ;;  %v4950_v59 = vcombine.high %v4948_v17, %v4948_v17  ;;  %v5561_v58 = vmul.f32 %v4948_v17, %v4948_v17 }
 0x232   : > { %v5323_v8 = vcombine.low %v4941_v4, %v4949_v18  ;;  %v5560_v6 = vmul.f32 %v4949_v18, %v4949_v18  ;;  %v4118_v45 = vrot.slane %v4104_v19, %v8477_v42  ;;  %v4119_v7 = vcombine.high %v4111_v29, %v4111_v29 }
 0x233   : > { %v5494_v34 = vsel %vm2377_vm4, %v5322_v21, 0.0  ;;  %v5832_v36 = vcombine.low %v5824_v0, %v5831_v49  ;;  %v5324_v10 = vcombine.low %v4948_v17, %v4950_v59  ;;  %v5562_v53 = vmul.f32 %v4950_v59, %v4950_v59 }
 0x234   : > { %v5495_v32 = vadd.f32 %v5494_v34, %v5493_v50  ;;  %v5331_v9 = vrot.slane %v5323_v8, %v8477_v42  ;;  %v5833_v13 = vcombine.low %v5559_v41, %v5560_v6  ;;  %v4427_v52 = vrot.slane %v4111_v29, %v8477_v42 }
 0x235   : > { %v6004_v24 = vsel %vm2377_vm4, %v5832_v36, 0.0  ;;  %v5338_v56 = vrot.slane %v5324_v10, %v8477_v42  ;;  %v5834_v38 = vcombine.low %v5561_v58, %v5562_v53  ;;  %v4428_v20 = vcombine.low %v4119_v7, %v4118_v45 }
 0x236   : > { %v6005_v39 = vadd.f32 %v6004_v24, %v6003_v60  ;;  %v5841_v26 = vrot.slane %v5833_v13, %v8477_v42  ;;  %v6431_v48 = vpack.c.bf16 %v4427_v52, %v4427_v52  ;;  %v3893_v2 = vadd.f32 %v8644_v22, %v3260_v5 }
 0x237   : > { %v5339_v28 = vcombine.low %v5331_v9, %v5338_v56  ;;  %v5848_v50 = vrot.slane %v5834_v38, %v8477_v42  ;;  %v4436_v14 = vrot.slane %v4428_v20, %v8477_v42  ;;  %v4120_v23 = vcombine.high %v4118_v45, %v4118_v45 }
 0x238   : > { %4695 = vst.msk [vmem:[%s8517_s28 + $0x38] sm:$0x1] %vm4682_vm10, %v6431_v48  ;;  %v4121_v31 = vcombine.high %v3893_v2, %v3893_v2  ;;  %v4128_v51 = vrot.slane %v3893_v2, %v8477_v42  ;;  %v3262_v16 = vadd.f32 %v8655_v63, %v8456_v15  ;;  %v3894_v60 = vadd.f32 %v8657_v11, %v3261_v30 }
 0x239   : > { %v5496_v35 = vsel %vm2377_vm4, %v5339_v28, 0.0  ;;  %v5849_v12 = vcombine.low %v5841_v26, %v5848_v50  ;;  %v8816_v22 = vadd.f32 %v8682_v62, %v8459_v3  ;;  %v8820_v5 = vadd.f32 %v8693_v54, %v8464_v33 }
 0x23a   : > { %v8822_v44 = vadd.f32 %v5496_v35, %v5495_v32  ;;  %v4135_v47 = vrot.slane %v4121_v31, %v8477_v42  ;;  %v4136_v4 = vcombine.high %v4128_v51, %v4128_v51  ;;  %v4429_v1 = vcombine.low %v4120_v23, %v4128_v51 }
 0x23b   : > { %v6006_v15 = vsel %vm2377_vm4, %v5849_v12, 0.0  ;;  %v4138_v63 = vcombine.high %v3894_v60, %v3894_v60  ;;  %v4145_v11 = vrot.slane %v3894_v60, %v8477_v42  ;;  %v3895_v30 = vadd.f32 %v8684_v25, %v3262_v16 }
 0x23c   : > { %v8828_v46 = vadd.f32 %v6006_v15, %v6005_v39  ;;  %v4443_v3 = vrot.slane %v4429_v1, %v8477_v42  ;;  %v4445_v62 = vcombine.low %v4136_v4, %v4135_v47  ;;  %v4137_v33 = vcombine.high %v4135_v47, %v4135_v47 }
 0x23d   : > { %v4152_v54 = vrot.slane %v4138_v63, %v8477_v42  ;;  %v4153_v17 = vcombine.high %v4145_v11, %v4145_v11  ;;  %v4155_v19 = vcombine.high %v3895_v30, %v3895_v30  ;;  %v4162_v0 = vrot.slane %v3895_v30, %v8477_v42 }
 0x23e   : > { %v4444_v18 = vcombine.low %v4436_v14, %v4443_v3  ;;  %v4453_v41 = vrot.slane %v4445_v62, %v8477_v42  ;;  %v6403_v29 = vcombine.low %v4443_v3, %v4443_v3  ;;  %v4446_v21 = vcombine.low %v4137_v33, %v4145_v11 }
 0x23f   : > { %v4154_v49 = vcombine.high %v4152_v54, %v4152_v54  ;;  %v4468_v25 = vrot.slane %v4153_v17, %v8477_v42  ;;  %v4169_v59 = vrot.slane %v4155_v19, %v8477_v42  ;;  %v4170_v58 = vcombine.high %v4162_v0, %v4162_v0 }
 0x240   : > { %v6432_v8 = vpack.c.bf16 %v4444_v18, %v4444_v18  ;;  %v4965_v6 = vrot.slane %v4444_v18, %v8477_v42  ;;  %v4972_v45 = vrot.slane %v6403_v29, %v8477_v42  ;;  %v4460_v7 = vrot.slane %v4446_v21, %v8477_v42 }
 0x241   : > { %v4469_v34 = vcombine.low %v4152_v54, %v4154_v49  ;;  %v6434_v36 = vpack.c.bf16 %v4468_v25, %v4468_v25  ;;  %v4171_v10 = vcombine.high %v4169_v59, %v4169_v59  ;;  %v4470_v53 = vcombine.low %v4162_v0, %v4170_v58 }
 0x242   : > { %4696 = vst.msk [vmem:[%s8517_s28 + $0x3c] sm:$0xf] %vm4679_vm9, %v6432_v8  ;;  %v4973_v32 = vcombine.high %v4965_v6, %v4965_v6  ;;  %v4974_v9 = vcombine.high %v4972_v45, %v4972_v45  ;;  %v5340_v13 = vcombine.low %v8483_v57, %v4965_v6  ;;  %v5564_v52 = vmul.f32 %v4965_v6, %v4965_v6 }
 0x243   : > { %v5566_v24 = vmul.f32 %v4972_v45, %v4972_v45  ;;  %v4461_v56 = vcombine.low %v4453_v41, %v4460_v7  ;;  %v4477_v38 = vrot.slane %v4469_v34, %v8477_v42  ;;  %4698 = vst.msk [vmem:[%s8517_s28 + $0x44] sm:$0x1] %vm4682_vm10, %v6434_v36  ;;  %v6404_v20 = vcombine.low %v4460_v7, %v4460_v7 }
 0x244   : > { %v5341_v39 = vcombine.low %v4973_v32, %v4972_v45  ;;  %v5348_v26 = vrot.slane %v5340_v13, %v8477_v42  ;;  %v5565_v48 = vmul.f32 %v4973_v32, %v4973_v32  ;;  %v5567_v2 = vmul.f32 %v4974_v9, %v4974_v9 }
 0x245   : > { %v5850_v28 = vcombine.low %v8490_v40, %v5564_v52  ;;  %v6433_v50 = vpack.c.bf16 %v4461_v56, %v4461_v56  ;;  %v4982_v14 = vrot.slane %v4461_v56, %v8477_v42  ;;  %v4989_v23 = vrot.slane %v6404_v20, %v8477_v42 }
 0x246   : > { %v5355_v31 = vrot.slane %v5341_v39, %v8477_v42  ;;  %v5851_v51 = vcombine.low %v5565_v48, %v5566_v24  ;;  %v4484_v16 = vrot.slane %v4470_v53, %v8477_v42  ;;  %v8851_v60 = vcombine.low %v4169_v59, %v4171_v10 }
 0x247   : > { %v5858_v35 = vrot.slane %v5850_v28, %v8477_v42  ;;  %4697 = vst.msk [vmem:[%s8517_s28 + $0x40] sm:$0xf] %vm4679_vm9, %v6433_v50  ;;  %v4990_v12 = vcombine.high %v4982_v14, %v4982_v14  ;;  %v4991_v47 = vcombine.high %v4989_v23, %v4989_v23  ;;  %v5357_v4 = vcombine.low %v4974_v9, %v4982_v14 }
 0x248   : > { %v5356_v1 = vcombine.low %v5348_v26, %v5355_v31  ;;  %v5865_v15 = vrot.slane %v5851_v51, %v8477_v42  ;;  %v5568_v63 = vmul.f32 %v4982_v14, %v4982_v14  ;;  %v5570_v11 = vmul.f32 %v4989_v23, %v4989_v23 }
 0x249   : > { %v5358_v30 = vcombine.low %v4990_v12, %v4989_v23  ;;  %v5365_v3 = vrot.slane %v5357_v4, %v8477_v42  ;;  %v5374_v62 = vcombine.low %v4991_v47, %v8483_v57  ;;  %v5569_v33 = vmul.f32 %v4990_v12, %v4990_v12 }
 0x24a   : > { %v5498_v54 = vsel %vm2377_vm4, %v5356_v1, 0.0  ;;  %v5866_v17 = vcombine.low %v5858_v35, %v5865_v15  ;;  %v5571_v19 = vmul.f32 %v4991_v47, %v4991_v47  ;;  %v5867_v0 = vcombine.low %v5567_v2, %v5568_v63 }
 0x24b   : > { %v5499_v18 = vadd.f32 %v5498_v54, %v8822_v44  ;;  %v5372_v41 = vrot.slane %v5358_v30, %v8477_v42  ;;  %v5382_v29 = vrot.slane %v5374_v62, %v8477_v42  ;;  %v5868_v21 = vcombine.low %v5569_v33, %v5570_v11 }
 0x24c   : > { %v6008_v49 = vsel %vm2377_vm4, %v5866_v17, 0.0  ;;  %v5875_v25 = vrot.slane %v5867_v0, %v8477_v42  ;;  %v5884_v59 = vcombine.low %v5571_v19, %v8490_v40  ;;  %v4485_v58 = vcombine.low %v4477_v38, %v4484_v16 }
 0x24d   : > { %v8867_v8 = vadd.f32 %v6008_v49, %v8828_v46  ;;  %v5373_v6 = vcombine.low %v5365_v3, %v5372_v41  ;;  %v5882_v45 = vrot.slane %v5868_v21, %v8477_v42  ;;  %v4494_v44 = vrot.slane %v8851_v60, %v8477_v42 }
 0x24e   : > { %v8873_v7 = vrot.slane %v5884_v59, %v8477_v42  ;;  %v6435_v34 = vpack.c.bf16 %v4485_v58, %v4485_v58  ;;  %v6405_v36 = vcombine.low %v4484_v16, %v4484_v16  ;;  %v5006_v10 = vrot.slane %v4485_v58, %v8477_v42 }
 0x24f   : > { %v5500_v53 = vsel %vm2377_vm4, %v5373_v6, 0.0  ;;  %v5883_v32 = vcombine.low %v5875_v25, %v5882_v45  ;;  %v3896_v46 = vadd.f32 %v8695_v37, %v8816_v22  ;;  %v3265_v9 = vadd.f32 %v8705_v43, %v8467_v55 }
 0x250   : > { %v5501_v13 = vadd.f32 %v5500_v53, %v5499_v18  ;;  %4699 = vst.msk [vmem:[%s8517_s28 + $0x48] sm:$0xf] %vm4679_vm9, %v6435_v34  ;;  %v5013_v52 = vrot.slane %v6405_v36, %v8477_v42  ;;  %v5014_v24 = vcombine.high %v5006_v10, %v5006_v10  ;;  %v5573_v56 = vmul.f32 %v5006_v10, %v5006_v10 }
 0x251   : > { %v6010_v38 = vsel %vm2377_vm4, %v5883_v32, 0.0  ;;  %v4172_v20 = vcombine.high %v3896_v46, %v3896_v46  ;;  %v4179_v39 = vrot.slane %v3896_v46, %v8477_v42  ;;  %v3897_v26 = vadd.f32 %v8707_v61, %v8820_v5 }
 0x252   : > { %v5015_v48 = vcombine.high %v5013_v52, %v5013_v52  ;;  %v5375_v37 = vcombine.low %v5006_v10, %v5014_v24  ;;  %v5574_v22 = vmul.f32 %v5014_v24, %v5014_v24  ;;  %v5575_v2 = vmul.f32 %v5013_v52, %v5013_v52 }
 0x253   : > { %v4186_v55 = vrot.slane %v4172_v20, %v8477_v42  ;;  %v4187_v43 = vcombine.high %v4179_v39, %v4179_v39  ;;  %v4189_v28 = vcombine.high %v3897_v26, %v3897_v26  ;;  %v4196_v50 = vrot.slane %v3897_v26, %v8477_v42 }
 0x254   : > { %v5389_v14 = vrot.slane %v5375_v37, %v8477_v42  ;;  %v5391_v23 = vcombine.low %v5013_v52, %v5015_v48  ;;  %v5576_v31 = vmul.f32 %v5015_v48, %v5015_v48  ;;  %v5885_v51 = vcombine.low %v5573_v56, %v5574_v22 }
 0x255   : > { %v4487_v16 = vcombine.low %v4179_v39, %v4187_v43  ;;  %v4509_v60 = vrot.slane %v4186_v55, %v8477_v42  ;;  %v4188_v61 = vcombine.high %v4186_v55, %v4186_v55  ;;  %v4203_v5 = vrot.slane %v4189_v28, %v8477_v42 }
 0x256   : > { %v5390_v35 = vcombine.low %v5382_v29, %v5389_v14  ;;  %v8894_v12 = vrot.slane %v5391_v23, %v8477_v42  ;;  %v8897_v47 = vrot.slane %v5885_v51, %v8477_v42  ;;  %v5901_v4 = vcombine.low %v5575_v2, %v5576_v31 }
 0x257   : > { %v4501_v1 = vrot.slane %v4487_v16, %v8477_v42  ;;  %v6437_v15 = vpack.c.bf16 %v4509_v60, %v4509_v60  ;;  %v4204_v63 = vcombine.high %v4196_v50, %v4196_v50  ;;  %v4510_v11 = vcombine.low %v4188_v61, %v4196_v50 }
 0x258   : > { %v5502_v30 = vsel %vm2377_vm4, %v5390_v35, 0.0  ;;  %v5900_v3 = vcombine.low %v8873_v7, %v8897_v47  ;;  %v8904_v62 = vrot.slane %v5901_v4, %v8477_v42  ;;  %v3898_v33 = vadd.f32 %v8722_v27, %v3265_v9 }
 0x259   : > { %v4502_v54 = vcombine.low %v4494_v44, %v4501_v1  ;;  %4701 = vst.msk [vmem:[%s8517_s28 + $0x50] sm:$0x1] %vm4682_vm10, %v6437_v15  ;;  %v6406_v17 = vcombine.low %v4501_v1, %v4501_v1  ;;  %v4511_v19 = vcombine.low %v4204_v63, %v4203_v5  ;;  %v4518_v0 = vrot.slane %v4510_v11, %v8477_v42 }
 0x25a   : > { %v4205_v18 = vcombine.high %v4203_v5, %v4203_v5  ;;  %v4206_v41 = vcombine.high %v3898_v33, %v3898_v33  ;;  %v4213_v29 = vrot.slane %v3898_v33, %v8477_v42  ;;  %v8911_v21 = vadd.f32 %v5502_v30, %v5501_v13 }
 0x25b   : > { %v6436_v49 = vpack.c.bf16 %v4502_v54, %v4502_v54  ;;  %v5023_v25 = vrot.slane %v4502_v54, %v8477_v42  ;;  %v5030_v59 = vrot.slane %v6406_v17, %v8477_v42  ;;  %v4525_v27 = vrot.slane %v4511_v19, %v8477_v42 }
 0x25c   : > { %v4220_v58 = vrot.slane %v4206_v41, %v8477_v42  ;;  %v4221_v6 = vcombine.high %v4213_v29, %v4213_v29  ;;  %v4527_v45 = vcombine.low %v4205_v18, %v4213_v29  ;;  %v8918_v44 = vadd.f32 %v6010_v38, %v8867_v8 }
 0x25d   : > { %4700 = vst.msk [vmem:[%s8517_s28 + $0x4c] sm:$0xf] %vm4679_vm9, %v6436_v49  ;;  %v5031_v34 = vcombine.high %v5023_v25, %v5023_v25  ;;  %v5032_v36 = vcombine.high %v5030_v59, %v5030_v59  ;;  %v5577_v10 = vmul.f32 %v5023_v25, %v5023_v25  ;;  %v5579_v53 = vmul.f32 %v5030_v59, %v5030_v59 }
 0x25e   : > { %v4526_v32 = vcombine.low %v4518_v0, %v4525_v27  ;;  %v6407_v46 = vcombine.low %v4525_v27, %v4525_v27  ;;  %v4222_v9 = vcombine.high %v4220_v58, %v4220_v58  ;;  %v4528_v13 = vcombine.low %v4221_v6, %v4220_v58 }
 0x25f   : > { %v5392_v52 = vcombine.low %v5023_v25, %v5031_v34  ;;  %v5408_v24 = vcombine.low %v5030_v59, %v5032_v36  ;;  %v5578_v56 = vmul.f32 %v5031_v34, %v5031_v34  ;;  %v5580_v20 = vmul.f32 %v5032_v36, %v5032_v36 }
 0x260   : > { %v6438_v39 = vpack.c.bf16 %v4526_v32, %v4526_v32  ;;  %v5047_v26 = vrot.slane %v4526_v32, %v8477_v42  ;;  %v5054_v8 = vrot.slane %v6407_v46, %v8477_v42  ;;  %v4535_v38 = vrot.slane %v4527_v45, %v8477_v42 }
 0x261   : > { %v5406_v48 = vrot.slane %v5392_v52, %v8477_v42  ;;  %v5416_v37 = vrot.slane %v5408_v24, %v8477_v42  ;;  %v5902_v22 = vcombine.low %v5577_v10, %v5578_v56  ;;  %v5918_v2 = vcombine.low %v5579_v53, %v5580_v20 }
 0x262   : > { %4702 = vst.msk [vmem:[%s8517_s28 + $0x54] sm:$0xf] %vm4679_vm9, %v6438_v39  ;;  %v5055_v55 = vcombine.high %v5047_v26, %v5047_v26  ;;  %v5409_v43 = vcombine.low %v8483_v57, %v5047_v26  ;;  %v5582_v28 = vmul.f32 %v5047_v26, %v5047_v26  ;;  %v5584_v50 = vmul.f32 %v5054_v8, %v5054_v8 }
 0x263   : > { %v5407_v14 = vcombine.low %v8894_v12, %v5406_v48  ;;  %v5916_v23 = vrot.slane %v5902_v22, %v8477_v42  ;;  %v5926_v31 = vrot.slane %v5918_v2, %v8477_v42  ;;  %v4542_v51 = vrot.slane %v4528_v13, %v8477_v42 }
 0x264   : > { %v5423_v16 = vrot.slane %v5409_v43, %v8477_v42  ;;  %v5425_v60 = vcombine.low %v5055_v55, %v5054_v8  ;;  %v5583_v61 = vmul.f32 %v5055_v55, %v5055_v55  ;;  %v5919_v5 = vcombine.low %v8490_v40, %v5582_v28 }
 0x265   : > { %v5917_v35 = vcombine.low %v8904_v62, %v5916_v23  ;;  %v4543_v4 = vcombine.low %v4535_v38, %v4542_v51  ;;  %v4550_v1 = vrot.slane %v4222_v9, %v8477_v42  ;;  %v5056_v12 = vcombine.high %v5054_v8, %v5054_v8 }
 0x266   : > { %v5424_v15 = vcombine.low %v5416_v37, %v5423_v16  ;;  %v5433_v63 = vrot.slane %v5425_v60, %v8477_v42  ;;  %v5933_v11 = vrot.slane %v5919_v5, %v8477_v42  ;;  %v5935_v30 = vcombine.low %v5583_v61, %v5584_v50 }
 0x267   : > { %v6439_v33 = vpack.c.bf16 %v4543_v4, %v4543_v4  ;;  %v6440_v54 = vpack.c.bf16 %v4550_v1, %v4550_v1  ;;  %v6408_v17 = vcombine.low %v4542_v51, %v4542_v51  ;;  %v5064_v19 = vrot.slane %v4543_v4, %v8477_v42 }
 0x268   : > { %v5585_v0 = vmul.f32 %v5056_v12, %v5056_v12  ;;  %v5504_v62 = vsel %vm2377_vm4, %v5407_v14, 0.0  ;;  %v5506_v18 = vsel %vm2377_vm4, %v5424_v15, 0.0  ;;  %v5934_v41 = vcombine.low %v5926_v31, %v5933_v11 }
 0x269   : > { %4703 = vst.msk [vmem:[%s8517_s28 + $0x58] sm:$0xf] %vm4679_vm9, %v6439_v33  ;;  %v5071_v29 = vrot.slane %v6408_v17, %v8477_v42  ;;  %v5072_v49 = vcombine.high %v5064_v19, %v5064_v19  ;;  %v5426_v25 = vcombine.low %v5056_v12, %v5064_v19  ;;  %v5586_v59 = vmul.f32 %v5064_v19, %v5064_v19 }
 0x26a   : > { %4704 = vst.msk [vmem:[%s8517_s28 + $0x5c] sm:$0x1] %vm4682_vm10, %v6440_v54  ;;  %v5505_v27 = vadd.f32 %v5504_v62, %v8911_v21  ;;  %v5943_v58 = vrot.slane %v5935_v30, %v8477_v42  ;;  %v6012_v6 = vsel %vm2377_vm4, %v5900_v3, 0.0  ;;  %v6014_v45 = vsel %vm2377_vm4, %v5917_v35, 0.0  ;;  %s8981_s28 = scalar_lea.hbm %s9074_s8, %s6410_s23 }
 0x26b   : > { %v5073_v34 = vcombine.high %v5071_v29, %v5071_v29  ;;  %v5440_v36 = vrot.slane %v5426_v25, %v8477_v42  ;;  %v5442_v10 = vcombine.low %v5072_v49, %v5071_v29  ;;  %v5587_v53 = vmul.f32 %v5072_v49, %v5072_v49 }
 0x26c   : > { %v5588_v32 = vmul.f32 %v5071_v29, %v5071_v29  ;;  %v5936_v46 = vcombine.low %v5585_v0, %v5586_v59  ;;  %v5507_v9 = vadd.f32 %v5506_v18, %v5505_v27  ;;  %v6013_v13 = vadd.f32 %v6012_v6, %v8918_v44 }
 0x26d   : > { %v5443_v21 = vcombine.low %v5073_v34, %v8483_v57  ;;  %v5589_v52 = vmul.f32 %v5073_v34, %v5073_v34  ;;  %v5441_v24 = vcombine.low %v5433_v63, %v5440_v36  ;;  %v5450_v7 = vrot.slane %v5442_v10, %v8477_v42 }
 0x26e   : > { %v5950_v47 = vrot.slane %v5936_v46, %v8477_v42  ;;  %v5952_v3 = vcombine.low %v5587_v53, %v5588_v32  ;;  %v6015_v56 = vadd.f32 %v6014_v45, %v6013_v13  ;;  %v6016_v20 = vsel %vm2377_vm4, %v5934_v41, 0.0 }
 0x26f   : > { %v5457_v39 = vrot.slane %v5443_v21, %v8477_v42  ;;  %v5508_v26 = vsel %vm2377_vm4, %v5441_v24, 0.0  ;;  %v5953_v8 = vcombine.low %v5589_v52, %v8490_v40 }
 0x270   : > { %v5509_v44 = vadd.f32 %v5508_v26, %v5507_v9  ;;  %v5951_v57 = vcombine.low %v5943_v58, %v5950_v47  ;;  %v5960_v38 = vrot.slane %v5952_v3, %v8477_v42  ;;  %v6017_v48 = vadd.f32 %v6016_v20, %v6015_v56 }
 0x271   : > { %v5458_v37 = vcombine.low %v5450_v7, %v5457_v39  ;;  %v5967_v22 = vrot.slane %v5953_v8, %v8477_v42 }
 0x272   : > { %v6018_v2 = vsel %vm2377_vm4, %v5951_v57, 0.0 }
 0x273   : > { %v5510_v55 = vsel %vm2377_vm4, %v5458_v37, 0.0  ;;  %v5968_v43 = vcombine.low %v5960_v38, %v5967_v22  ;;  %v6019_v28 = vadd.f32 %v6018_v2, %v6017_v48 }
 0x274   : > { %v5511_v50 = vadd.f32 %v5510_v55, %v5509_v44 }
 0x275   : > { %v6020_v14 = vsel %vm2377_vm4, %v5968_v43, 0.0 }
 0x276   : > { %v5512_v40 = vrot.slane %v5511_v50, 4  ;;  %v6021_v23 = vadd.f32 %v6020_v14, %v6019_v28 }
 0x278   : > { %v5513_v31 = vadd.f32 %v5512_v40, %v5511_v50  ;;  %v6022_v51 = vrot.slane %v6021_v23, 4 }
 0x27a   : > { %v5514_v42 = vrot.slane %v5513_v31, 2  ;;  %v6023_v16 = vadd.f32 %v6022_v51, %v6021_v23 }
 0x27c   : > { %v5515_v60 = vadd.f32 %v5514_v42, %v5513_v31  ;;  %v6024_v61 = vrot.slane %v6023_v16, 2 }
 0x27e   : > { %v5516_v5 = vrot.slane %v5515_v60, 1  ;;  %v6025_v35 = vadd.f32 %v6024_v61, %v6023_v16 }
 0x280   : > { %v5517_v4 = vadd.f32 %v5516_v5, %v5515_v60  ;;  %v6026_v1 = vrot.slane %v6025_v35, 1 }
 0x282   : > { %5518 = vst.msk [vmem:[%s461_s24] sm:$0x1] %vm4682_vm10, %v5517_v4  ;;  %v6027_v12 = vadd.f32 %v6026_v1, %v6025_v35 }
 0x283   : > { %6714 = shalt.err (!%p6711_p13)
}
 0x284   : > { %s6715_s23 = scalar_lea.hbm %s8981_s28, 16  ;;  %s6719_s27 = scalar_lea.hbm %s9074_s8, 64 }
 0x285   : > { %p6716_p0 = scmp.ne.s32.totalorder %s8981_s28, %s6715_s23  ;;  %p6720_p4 = scmp.lt.s32.totalorder %s8981_s28, %s9074_s8 }
 0x286   : > { %p6721_p5 = scmp.lt.s32.totalorder %s6719_s27, %s6715_s23 }
 0x287   : > { %p6717_p1 = pnand %p6716_p0, %p6935_p3 }
 0x288   : > { %p6722_p6 = por %p6721_p5, %p6720_p4 }
 0x289   : > { %p6718_p2 = pneg %p6717_p1 }
 0x28b   : > { %p6723_p7 = pnand %p6722_p6, %p6718_p2 }
 0x28d   : > { %6726 = shalt.err (!%p6723_p7)
}
 0x28e   : > { %6599 = dma.vmem_to_hbm [thread:$0]  (%p6935_p3), %s8983_s15, 16, %s8981_s28, %s6040_s16  }
 0x28f   : > { %s9221_s0 = scalar_lea.vmem [#allocation4], %s8970_s19  ;;  %s6044_s1 = scalar_lea.sflag [#allocation5], %s8970_s19 }
 0x290   : > { %6028 = vst.msk [vmem:[%s9221_s0] sm:$0x1] %vm4682_vm10, %v6027_v12  ;;  %s6727_s2 = scalar_lea.vmem %s8991_s26, 16  ;;  %s6833_s22 = smov [#allocation4]  }
 0x291   : > { %p6728_p9 = scmp.ne.s32.totalorder %s8991_s26, %s6727_s2  ;;  %s6731_s23 = sshll.u32 %s6833_s22, 4  ;;  %s6732_s23 = int_to_ptr.vmem [resolvable:$false] %s6731_s23 }
 0x292   : > { %s6733_s24 = scalar_lea.vmem %s6732_s23, 32  ;;  %p6734_p12 = scmp.lt.s32.totalorder %s8991_s26, %s6732_s23 }
 0x293   : > { %p6729_p10 = pnand %p6728_p9, %p6935_p3  ;;  %p6735_p13 = scmp.lt.s32.totalorder %s6733_s24, %s6727_s2 }
 0x295   : > { %p6730_p11 = pneg %p6729_p10  ;;  %p6736_p0 = por %p6735_p13, %p6734_p12 }
 0x297   : > { %p6737_p1 = pnand %p6736_p0, %p6730_p11 }
 0x299   : > { %6740 = shalt.err (!%p6737_p1)
}
 0x29a   : > { %s6741_s15 = scalar_lea.hbm %s8989_s29, 16  ;;  %s6745_s28 = scalar_lea.hbm %s9075_s9, 64 }
 0x29b   : > { %p6742_p2 = scmp.ne.s32.totalorder %s8989_s29, %s6741_s15  ;;  %p6746_p6 = scmp.lt.s32.totalorder %s8989_s29, %s9075_s9 }
 0x29c   : > { %p6747_p7 = scmp.lt.s32.totalorder %s6745_s28, %s6741_s15 }
 0x29d   : > { %p6743_p4 = pnand %p6742_p2, %p6935_p3 }
 0x29e   : > { %p6748_p9 = por %p6747_p7, %p6746_p6 }
 0x29f   : > { %p6744_p5 = pneg %p6743_p4 }
 0x2a1   : > { %p6749_p10 = pnand %p6748_p9, %p6744_p5 }
 0x2a3   : > { %6752 = shalt.err (!%p6749_p10)
}
 0x2a4   : > { %6600 = dma.vmem_to_hbm [thread:$0]  (%p6935_p3), %s8991_s26, 16, %s8989_s29, %s6044_s1  }
 0x2a5 PF: > { %p6610_p11 = scmp.ge.s32.totalorder %s6823_s14, 2  ;;  %s6102_s11 = sand.u32 1, %s6795_s30  }
 0x2a6   : > { %s6103_s0 = scalar_lea.sflag [#allocation3], %s6102_s11 }
 0x2a7   : > { %p6604_p12 = pnand %p6610_p11, %p6944_p8 }
 0x2a9   : > { %p6605_p13 = pneg %p6604_p12 }
 0x2ab   : > { %6786 = dma.done.wait (%p6605_p13), %s6103_s0, 16  }
 0x2ac   : > { %6788 = vsyncadd (%p6605_p13), %s6103_s0, 4294967280  ;;  %s6111_s2 = scalar_lea.sflag [#allocation5], %s6102_s11 }
 0x2ad   : > { %6790 = dma.done.wait (%p6605_p13), %s6111_s2, 16  }
 0x2ae   : > { %6792 = vsyncadd (%p6605_p13), %s6111_s2, 4294967280  ;;  %s26_s14 = sadd.s32 1, %s6823_s14   ;;  %s9222_s30 = smov %s6799_s10 }
 0x2af   : > { %p23_p0 = scmp.ge.s32.totalorder %s26_s14, 6   ;;  %s9223_s10 = smov %s6803_s5 }
 0x2b0   : > { %s9224_s5 = smov %s6953_s25  ;;  %s9225_s6 = smov %s6815_s12 }
 0x2b1   : > { %s9226_s11 = smov %s6819_s13  ;;  %s9227_s12 = smov %s9230_s17 }
 0x2b2   : > { %s9228_s13 = smov %s9234_s18  ;;  %25 = sbr.rel (!%p23_p0) target bundleno = 11 (0xb), region = 120 }
 0x2b7   :  { %6115 = vsyncpa [#allocation3], 1 }
 0x2b8   :  { %6117 = vsyncpa [#allocation3 + $0x1], 1 }
 0x2b9   :  { %6118 = vsyncpa [#allocation5], 1 }
 0x2ba   :  { %6120 = vsyncpa [#allocation5 + $0x1], 1 }

</bundles_post_ra>
